<compile_context>
chip_gen: v5e
topology: v5e:2x2
jax: 0.10.0
libtpu: 0.0.40
codegen_flags: <defaults>
</compile_context>

<pallas_src>
import numpy as np
import jax
import jax.numpy as jnp
from jax import lax
from jax.experimental import pallas as pl
from jax.experimental.pallas import tpu as pltpu

H, W = 16, 16          # image domain
PR, PC = 8, 16         # data (measurement) domain
C_HID = 4              # hidden channels of the small CNNs
NUM_ITER = 3
FW_SWAPED = True       # fw_model (image-domain CNN) first, then fw_op
ADJ_SWAPED = False     # adj_op first, then adj_model (image-domain CNN)
LAM = 0.1              # step size used by step_function
WL = W * C_HID         # lane-stacked width (channels stacked along lanes)

# ---- constant-slab row offsets (each logical tensor starts at a multiple of 8) ----
_R_W1F, _R_W2F, _R_W1A, _R_W2A = 0, 16, 32, 48     # (9, WL) lane-expanded conv weights
_R_BIAS = 64                                       # row 64: b1f, 65: b1a, 66: LAM*adj_b2
_R_B, _R_BT, _R_CTTR, _R_CFW, _R_BSCT = 72, 80, 96, 112, 120
SLAB_ROWS = 184                                    # (184, 128) f32  ~ 94 KiB, one DMA


# -------------------------- Pallas kernel --------------------------------- #
def _iter_kernel(x_ref, y_ref, c_ref, x_out_ref):
    # ---------- prologue: unpack the packed constant slab (single DMA upstream) ----
    y    = y_ref[...]                                  # (PR, PC)
    w1f  = c_ref[_R_W1F:_R_W1F + 9, 0:WL]              # (9, WL) edge-masked, lane-expanded
    w2f  = c_ref[_R_W2F:_R_W2F + 9, 0:WL]
    w1a  = c_ref[_R_W1A:_R_W1A + 9, 0:WL]
    w2a  = c_ref[_R_W2A:_R_W2A + 9, 0:WL]              # LAM pre-folded (layer 2 is linear)
    b1f  = c_ref[_R_BIAS + 0:_R_BIAS + 1, 0:WL]        # (1, WL)
    b1a  = c_ref[_R_BIAS + 1:_R_BIAS + 2, 0:WL]        # (1, WL)
    cadj = c_ref[_R_BIAS + 2:_R_BIAS + 3, 0:W]         # (1, W)  == LAM * adj_b2
    B    = c_ref[_R_B:_R_B + PR, 0:H]                  # (PR, H)
    BT   = c_ref[_R_BT:_R_BT + H, 0:PR]                # (H, PR)
    CtTr = c_ref[_R_CTTR:_R_CTTR + PC, 0:WL]           # (PC, WL)  Ct^T tiled C_HID x on lanes
    cfw  = c_ref[_R_CFW:_R_CFW + PR, 0:PC]             # (PR, PC)  b2f * (B @ 1 @ Ct)
    BsCt = c_ref[_R_BSCT:_R_BSCT + WL, 0:PC]           # (WL, PC)  Bsum @ Ct

    # ---------- hoisted, loop-invariant broadcasts (emitted exactly once) ----------
    def tap_bcast(w):
        return tuple(jnp.broadcast_to(w[k:k + 1, :], (H, WL)) for k in range(9))
    w1f_t, w2f_t = tap_bcast(w1f), tap_bcast(w2f)
    w1a_t, w2a_t = tap_bcast(w1a), tap_bcast(w2a)
    b1f_b  = jnp.broadcast_to(b1f, (H, WL))
    b1a_b  = jnp.broadcast_to(b1a, (H, WL))
    cadj_b = jnp.broadcast_to(cadj, (H, W))

    zrow = jnp.zeros((1, WL), jnp.float32)
    zcol = jnp.zeros((H, 1), jnp.float32)

    # zero-padded 3x3 shifts, k = 3*dy + dx, value(i, j) = v[i+dy-1, j+dx-1].
    # No column masks needed here: the per-block edge masks were folded into the
    # lane-expanded weights on the host (a zero weight kills the cross-block leak).
    def shifts9(v):
        d = jnp.concatenate([zrow, v[:-1, :]], axis=0)          # v[i-1, j]
        u = jnp.concatenate([v[1:, :], zrow], axis=0)           # v[i+1, j]

        def jm1(t):                                             # t[i, j-1]
            return jnp.concatenate([zcol, t[:, :-1]], axis=1)

        def jp1(t):                                             # t[i, j+1]
            return jnp.concatenate([t[:, 1:], zcol], axis=1)

        return (jm1(d), d, jp1(d), jm1(v), v, jp1(v), jm1(u), u, jp1(u))

    def conv_block(v, w1t, b1b, w2t):
        # Conv2d(1, C_HID, 3, pad=1) -> ReLU -> Conv2d(C_HID, 1, 3, pad=1),
        # channels stacked along lanes (H, WL).  Returns the per-channel layer-2
        # partial sums; channel reduce + layer-2 bias are folded by the caller.
        sh = shifts9(v)
        h = b1b + w1t[0] * sh[0]
        for k in range(1, 9):
            h = h + w1t[k] * sh[k]
        h = jnp.maximum(h, 0.0)
        sh2 = shifts9(h)
        t = w2t[0] * sh2[0]
        for k in range(1, 9):
            t = t + w2t[k] * sh2[k]
        return t                                                # (H, WL)

    def body(_, x_img):
        # --- fw_model (image CNN) then fw_op (FW_SWAPED=True), reduce+bias folded ---
        v = jnp.concatenate([x_img] * C_HID, axis=1)            # (H, WL) lane-replicated
        t = conv_block(v, w1f_t, b1f_b, w2f_t)                  # (H, WL)
        u = jnp.dot(t, BsCt, preferred_element_type=jnp.float32)      # (H, W) = (t@Bsum)@Ct
        z = jnp.dot(B, u, preferred_element_type=jnp.float32) + cfw   # (PR, PC) = B@conv@Ct
        r = z - y
        # --- adj_op then adj_model (ADJ_SWAPED=False); CtTr emits lane-replicated img ---
        a = jnp.dot(r, CtTr, preferred_element_type=jnp.float32)      # (PR, WL)
        a = jnp.dot(BT, a, preferred_element_type=jnp.float32)        # (H, WL) rep(B^T r Ct^T)
        t2 = conv_block(a, w1a_t, b1a_b, w2a_t)                       # LAM already in w2a
        red = t2[:, 0:W]
        for c in range(1, C_HID):                                     # channel reduce, no MXU
            red = red + t2[:, c * W:(c + 1) * W]
        # --- step_function: x <- x - LAM * adj_model(adj_op(fw_op(fw_model(x)) - y)) ---
        return x_img - red - cadj_b

    x_out_ref[...] = lax.fori_loop(0, NUM_ITER, body, x_ref[...], unroll=True)


# -------------------------- parameters ------------------------------------ #
def make_params(key):
    """Logical (PyTorch-style) parameters, used by the numpy reference."""
    ks = jax.random.split(key, 10)
    p = {}
    p["fw_w1"] = (jax.random.normal(ks[0], (9, C_HID)) * 0.2).astype(jnp.float32)
    p["fw_b1"] = (jax.random.normal(ks[1], (C_HID,)) * 0.05).astype(jnp.float32)
    p["fw_w2"] = (jax.random.normal(ks[2], (9, C_HID)) * 0.2).astype(jnp.float32)
    p["fw_b2"] = (jax.random.normal(ks[3], (1,)) * 0.05).astype(jnp.float32)
    p["adj_w1"] = (jax.random.normal(ks[4], (9, C_HID)) * 0.2).astype(jnp.float32)
    p["adj_b1"] = (jax.random.normal(ks[5], (C_HID,)) * 0.05).astype(jnp.float32)
    p["adj_w2"] = (jax.random.normal(ks[6], (9, C_HID)) * 0.2).astype(jnp.float32)
    p["adj_b2"] = (jax.random.normal(ks[7], (1,)) * 0.05).astype(jnp.float32)
    p["B"] = (jax.random.normal(ks[8], (PR, H)) / np.sqrt(H)).astype(jnp.float32)
    p["Ct"] = (jax.random.normal(ks[9], (W, PC)) / np.sqrt(W)).astype(jnp.float32)
    p["lam"] = jnp.array([LAM], jnp.float32)
    return p


def prepare_kernel_params(p):
    """One-time host-side packing of every constant into a single (8,128)-aligned slab:
       * lane-expanded conv weights with per-block column-edge masks folded in,
       * LAM folded into the adjoint CNN's second (linear) layer weights + bias,
       * forward CNN channel-reduce + bias folded into the forward operator
         (BsCt = Bsum @ Ct, const_fw = b2f * B @ 1 @ Ct),
       * Ct^T lane-tiled so the adjoint operator output is already lane-replicated."""
    assert FW_SWAPED and not ADJ_SWAPED, "operator folds assume this ordering"
    lam = float(np.asarray(p["lam"])[0])
    B64 = np.asarray(p["B"], np.float64)
    Ct64 = np.asarray(p["Ct"], np.float64)
    jj = np.arange(WL) % W

    def lane_w(w):   # (9, C_HID) -> (9, WL), with column-edge masks folded in
        wl = np.repeat(np.asarray(w, np.float64), W, axis=1)
        wl[0::3, :] *= (jj != 0)          # dx = -1 taps: zero at block-left edges
        wl[2::3, :] *= (jj != W - 1)      # dx = +1 taps: zero at block-right edges
        return wl

    def lane_b(b):   # (C_HID,) -> (1, WL)
        return np.repeat(np.asarray(b, np.float64), W)[None, :]

    bsum = np.zeros((WL, W), np.float64)
    for c in range(C_HID):
        bsum[c * W:(c + 1) * W, :] = np.eye(W)

    slab = np.zeros((SLAB_ROWS, 128), np.float64)
    slab[_R_W1F:_R_W1F + 9, 0:WL] = lane_w(p["fw_w1"])
    slab[_R_W2F:_R_W2F + 9, 0:WL] = lane_w(p["fw_w2"])
    slab[_R_W1A:_R_W1A + 9, 0:WL] = lane_w(p["adj_w1"])
    slab[_R_W2A:_R_W2A + 9, 0:WL] = lam * lane_w(p["adj_w2"])   # LAM fold (layer 2 linear)
    slab[_R_BIAS + 0:_R_BIAS + 1, 0:WL] = lane_b(p["fw_b1"])
    slab[_R_BIAS + 1:_R_BIAS + 2, 0:WL] = lane_b(p["adj_b1"])
    slab[_R_BIAS + 2, :] = lam * float(np.asarray(p["adj_b2"])[0])
    slab[_R_B:_R_B + PR, 0:H] = B64
    slab[_R_BT:_R_BT + H, 0:PR] = B64.T
    slab[_R_CTTR:_R_CTTR + PC, 0:WL] = np.tile(Ct64.T, (1, C_HID))
    slab[_R_CFW:_R_CFW + PR, 0:PC] = (
        float(np.asarray(p["fw_b2"])[0]) * (B64 @ np.ones((H, W)) @ Ct64))
    slab[_R_BSCT:_R_BSCT + WL, 0:PC] = bsum @ Ct64
    return jnp.asarray(slab, jnp.float32)


# -------------------------- wrapper ---------------------------------------- #
def multiple_iterations_model(x, y, slab):
    """x: (1,H,W), y: (1,PR,PC). Returns [x_new, y] like the PyTorch module."""
    vmem = pl.BlockSpec(memory_space=pltpu.MemorySpace.VMEM)
    x_new = pl.pallas_call(
        _iter_kernel,
        out_shape=jax.ShapeDtypeStruct((H, W), jnp.float32),
        in_specs=[vmem, vmem, vmem],
        out_specs=vmem,
    )(x[0], y[0], slab)
    return [x_new[None], y]


# -------------------------- numpy reference -------------------------------- #
def _conv_block_np(img, w1, b1, w2, b2):
    Hh, Ww = img.shape
    xp = np.pad(img, ((1, 1), (1, 1)))
    hidden = []
    for c in range(C_HID):
        acc = np.full((Hh, Ww), b1[c], dtype=np.float64)
        for k in range(9):
            dy, dx = k // 3, k % 3
            acc = acc + w1[k, c] * xp[dy:dy + Hh, dx:dx + Ww]
        hidden.append(np.maximum(acc, 0.0))
    out = np.full((Hh, Ww), b2[0], dtype=np.float64)
    for c in range(C_HID):
        hp = np.pad(hidden[c], ((1, 1), (1, 1)))
        for k in range(9):
            dy, dx = k // 3, k % 3
            out = out + w2[k, c] * hp[dy:dy + Hh, dx:dx + Ww]
    return out


def _reference_np(x, y, p):
    x2 = x[0].astype(np.float64)
    y2 = y[0].astype(np.float64)
    B = p["B"].astype(np.float64)
    Ct = p["Ct"].astype(np.float64)
    for _ in range(NUM_ITER):
        if FW_SWAPED:
            z = _conv_block_np(x2, p["fw_w1"], p["fw_b1"], p["fw_w2"], p["fw_b2"])
            z = B @ z @ Ct
        else:
            z = B @ x2 @ Ct
            z = _conv_block_np(z, p["fw_w1"], p["fw_b1"], p["fw_w2"], p["fw_b2"])
        r = z - y2
        if ADJ_SWAPED:
            r = _conv_block_np(r, p["adj_w1"], p["adj_b1"], p["adj_w2"], p["adj_b2"])
            r = B.T @ r @ Ct.T
        else:
            r = B.T @ r @ Ct.T
            r = _conv_block_np(r, p["adj_w1"], p["adj_b1"], p["adj_w2"], p["adj_b2"])
        x2 = x2 - float(p["lam"][0]) * r
    return x2


if __name__ == "__main__":
    key = jax.random.PRNGKey(0)
    kx, ky, kparam = jax.random.split(key, 3)
    x = jax.random.normal(kx, (1, H, W), jnp.float32)      # d[0]
    y = jax.random.normal(ky, (1, PR, PC), jnp.float32)    # d[1]
    params = make_params(kparam)
    slab = prepare_kernel_params(params)

    out = multiple_iterations_model(x, y, slab)
    jax.block_until_ready(out)

    ref = _reference_np(np.asarray(x), np.asarray(y),
                        {k: np.asarray(v) for k, v in params.items()})
    got = np.asarray(out[0][0])
    # Tolerance tightened vs the previous 1e-2; kept above 1e-4 only to allow for the
    # MXU's multi-pass f32 matmul precision vs. the float64 numpy reference.
    if not np.allclose(got, ref, atol=5e-3, rtol=5e-3):
        raise AssertionError(
            f"Pallas result differs from reference; max abs err "
            f"{np.max(np.abs(got - ref)):.3e}")
    print("KERNEL_OK")
</pallas_src>

<mosaic_0001>
module attributes {stable_mosaic.version = 11 : i64} {
  func.func @_iter_kernel(%arg0: memref<16x16xf32, #tpu.memory_space<vmem>>, %arg1: memref<8x16xf32, #tpu.memory_space<vmem>>, %arg2: memref<184x128xf32, #tpu.memory_space<vmem>>, %arg3: memref<16x16xf32, #tpu.memory_space<vmem>>) attributes {dimension_semantics = [], scalar_prefetch = 0 : i64, scratch_operands = 0 : i64, tpu.core_type = #tpu.core_type<tc>} {
    %c0 = arith.constant 0 : index
    %c0_0 = arith.constant 0 : index
    %0 = vector.load %arg1[%c0, %c0_0] : memref<8x16xf32, #tpu.memory_space<vmem>>, vector<8x16xf32>
    %c0_1 = arith.constant 0 : index
    %c0_2 = arith.constant 0 : index
    %1 = vector.load %arg2[%c0_1, %c0_2] : memref<184x128xf32, #tpu.memory_space<vmem>>, vector<9x64xf32>
    %c16 = arith.constant 16 : index
    %c0_3 = arith.constant 0 : index
    %2 = vector.load %arg2[%c16, %c0_3] : memref<184x128xf32, #tpu.memory_space<vmem>>, vector<9x64xf32>
    %c32 = arith.constant 32 : index
    %c0_4 = arith.constant 0 : index
    %3 = vector.load %arg2[%c32, %c0_4] : memref<184x128xf32, #tpu.memory_space<vmem>>, vector<9x64xf32>
    %c48 = arith.constant 48 : index
    %c0_5 = arith.constant 0 : index
    %4 = vector.load %arg2[%c48, %c0_5] : memref<184x128xf32, #tpu.memory_space<vmem>>, vector<9x64xf32>
    %c64 = arith.constant 64 : index
    %c0_6 = arith.constant 0 : index
    %5 = vector.load %arg2[%c64, %c0_6] : memref<184x128xf32, #tpu.memory_space<vmem>>, vector<1x64xf32>
    %c65 = arith.constant 65 : index
    %c0_7 = arith.constant 0 : index
    %6 = vector.load %arg2[%c65, %c0_7] : memref<184x128xf32, #tpu.memory_space<vmem>>, vector<1x64xf32>
    %c66 = arith.constant 66 : index
    %c0_8 = arith.constant 0 : index
    %7 = vector.load %arg2[%c66, %c0_8] : memref<184x128xf32, #tpu.memory_space<vmem>>, vector<1x16xf32>
    %c72 = arith.constant 72 : index
    %c0_9 = arith.constant 0 : index
    %8 = vector.load %arg2[%c72, %c0_9] : memref<184x128xf32, #tpu.memory_space<vmem>>, vector<8x16xf32>
    %c80 = arith.constant 80 : index
    %c0_10 = arith.constant 0 : index
    %9 = vector.load %arg2[%c80, %c0_10] : memref<184x128xf32, #tpu.memory_space<vmem>>, vector<16x8xf32>
    %c96 = arith.constant 96 : index
    %c0_11 = arith.constant 0 : index
    %10 = vector.load %arg2[%c96, %c0_11] : memref<184x128xf32, #tpu.memory_space<vmem>>, vector<16x64xf32>
    %c112 = arith.constant 112 : index
    %c0_12 = arith.constant 0 : index
    %11 = vector.load %arg2[%c112, %c0_12] : memref<184x128xf32, #tpu.memory_space<vmem>>, vector<8x16xf32>
    %c120 = arith.constant 120 : index
    %c0_13 = arith.constant 0 : index
    %12 = vector.load %arg2[%c120, %c0_13] : memref<184x128xf32, #tpu.memory_space<vmem>>, vector<64x16xf32>
    %13 = vector.extract_strided_slice %1 {offsets = [0, 0], sizes = [1, 64], strides = [1, 1]} : vector<9x64xf32> to vector<1x64xf32>
    %14 = vector.shape_cast %13 : vector<1x64xf32> to vector<1x64xf32>
    %15 = vector.broadcast %14 : vector<1x64xf32> to vector<16x64xf32>
    %16 = vector.extract_strided_slice %1 {offsets = [1, 0], sizes = [1, 64], strides = [1, 1]} : vector<9x64xf32> to vector<1x64xf32>
    %17 = vector.shape_cast %16 : vector<1x64xf32> to vector<1x64xf32>
    %18 = vector.broadcast %17 : vector<1x64xf32> to vector<16x64xf32>
    %19 = vector.extract_strided_slice %1 {offsets = [2, 0], sizes = [1, 64], strides = [1, 1]} : vector<9x64xf32> to vector<1x64xf32>
    %20 = vector.shape_cast %19 : vector<1x64xf32> to vector<1x64xf32>
    %21 = vector.broadcast %20 : vector<1x64xf32> to vector<16x64xf32>
    %22 = vector.extract_strided_slice %1 {offsets = [3, 0], sizes = [1, 64], strides = [1, 1]} : vector<9x64xf32> to vector<1x64xf32>
    %23 = vector.shape_cast %22 : vector<1x64xf32> to vector<1x64xf32>
    %24 = vector.broadcast %23 : vector<1x64xf32> to vector<16x64xf32>
    %25 = vector.extract_strided_slice %1 {offsets = [4, 0], sizes = [1, 64], strides = [1, 1]} : vector<9x64xf32> to vector<1x64xf32>
    %26 = vector.shape_cast %25 : vector<1x64xf32> to vector<1x64xf32>
    %27 = vector.broadcast %26 : vector<1x64xf32> to vector<16x64xf32>
    %28 = vector.extract_strided_slice %1 {offsets = [5, 0], sizes = [1, 64], strides = [1, 1]} : vector<9x64xf32> to vector<1x64xf32>
    %29 = vector.shape_cast %28 : vector<1x64xf32> to vector<1x64xf32>
    %30 = vector.broadcast %29 : vector<1x64xf32> to vector<16x64xf32>
    %31 = vector.extract_strided_slice %1 {offsets = [6, 0], sizes = [1, 64], strides = [1, 1]} : vector<9x64xf32> to vector<1x64xf32>
    %32 = vector.shape_cast %31 : vector<1x64xf32> to vector<1x64xf32>
    %33 = vector.broadcast %32 : vector<1x64xf32> to vector<16x64xf32>
    %34 = vector.extract_strided_slice %1 {offsets = [7, 0], sizes = [1, 64], strides = [1, 1]} : vector<9x64xf32> to vector<1x64xf32>
    %35 = vector.shape_cast %34 : vector<1x64xf32> to vector<1x64xf32>
    %36 = vector.broadcast %35 : vector<1x64xf32> to vector<16x64xf32>
    %37 = vector.extract_strided_slice %1 {offsets = [8, 0], sizes = [1, 64], strides = [1, 1]} : vector<9x64xf32> to vector<1x64xf32>
    %38 = vector.shape_cast %37 : vector<1x64xf32> to vector<1x64xf32>
    %39 = vector.broadcast %38 : vector<1x64xf32> to vector<16x64xf32>
    %40 = vector.extract_strided_slice %2 {offsets = [0, 0], sizes = [1, 64], strides = [1, 1]} : vector<9x64xf32> to vector<1x64xf32>
    %41 = vector.shape_cast %40 : vector<1x64xf32> to vector<1x64xf32>
    %42 = vector.broadcast %41 : vector<1x64xf32> to vector<16x64xf32>
    %43 = vector.extract_strided_slice %2 {offsets = [1, 0], sizes = [1, 64], strides = [1, 1]} : vector<9x64xf32> to vector<1x64xf32>
    %44 = vector.shape_cast %43 : vector<1x64xf32> to vector<1x64xf32>
    %45 = vector.broadcast %44 : vector<1x64xf32> to vector<16x64xf32>
    %46 = vector.extract_strided_slice %2 {offsets = [2, 0], sizes = [1, 64], strides = [1, 1]} : vector<9x64xf32> to vector<1x64xf32>
    %47 = vector.shape_cast %46 : vector<1x64xf32> to vector<1x64xf32>
    %48 = vector.broadcast %47 : vector<1x64xf32> to vector<16x64xf32>
    %49 = vector.extract_strided_slice %2 {offsets = [3, 0], sizes = [1, 64], strides = [1, 1]} : vector<9x64xf32> to vector<1x64xf32>
    %50 = vector.shape_cast %49 : vector<1x64xf32> to vector<1x64xf32>
    %51 = vector.broadcast %50 : vector<1x64xf32> to vector<16x64xf32>
    %52 = vector.extract_strided_slice %2 {offsets = [4, 0], sizes = [1, 64], strides = [1, 1]} : vector<9x64xf32> to vector<1x64xf32>
    %53 = vector.shape_cast %52 : vector<1x64xf32> to vector<1x64xf32>
    %54 = vector.broadcast %53 : vector<1x64xf32> to vector<16x64xf32>
    %55 = vector.extract_strided_slice %2 {offsets = [5, 0], sizes = [1, 64], strides = [1, 1]} : vector<9x64xf32> to vector<1x64xf32>
    %56 = vector.shape_cast %55 : vector<1x64xf32> to vector<1x64xf32>
    %57 = vector.broadcast %56 : vector<1x64xf32> to vector<16x64xf32>
    %58 = vector.extract_strided_slice %2 {offsets = [6, 0], sizes = [1, 64], strides = [1, 1]} : vector<9x64xf32> to vector<1x64xf32>
    %59 = vector.shape_cast %58 : vector<1x64xf32> to vector<1x64xf32>
    %60 = vector.broadcast %59 : vector<1x64xf32> to vector<16x64xf32>
    %61 = vector.extract_strided_slice %2 {offsets = [7, 0], sizes = [1, 64], strides = [1, 1]} : vector<9x64xf32> to vector<1x64xf32>
    %62 = vector.shape_cast %61 : vector<1x64xf32> to vector<1x64xf32>
    %63 = vector.broadcast %62 : vector<1x64xf32> to vector<16x64xf32>
    %64 = vector.extract_strided_slice %2 {offsets = [8, 0], sizes = [1, 64], strides = [1, 1]} : vector<9x64xf32> to vector<1x64xf32>
    %65 = vector.shape_cast %64 : vector<1x64xf32> to vector<1x64xf32>
    %66 = vector.broadcast %65 : vector<1x64xf32> to vector<16x64xf32>
    %67 = vector.extract_strided_slice %3 {offsets = [0, 0], sizes = [1, 64], strides = [1, 1]} : vector<9x64xf32> to vector<1x64xf32>
    %68 = vector.shape_cast %67 : vector<1x64xf32> to vector<1x64xf32>
    %69 = vector.broadcast %68 : vector<1x64xf32> to vector<16x64xf32>
    %70 = vector.extract_strided_slice %3 {offsets = [1, 0], sizes = [1, 64], strides = [1, 1]} : vector<9x64xf32> to vector<1x64xf32>
    %71 = vector.shape_cast %70 : vector<1x64xf32> to vector<1x64xf32>
    %72 = vector.broadcast %71 : vector<1x64xf32> to vector<16x64xf32>
    %73 = vector.extract_strided_slice %3 {offsets = [2, 0], sizes = [1, 64], strides = [1, 1]} : vector<9x64xf32> to vector<1x64xf32>
    %74 = vector.shape_cast %73 : vector<1x64xf32> to vector<1x64xf32>
    %75 = vector.broadcast %74 : vector<1x64xf32> to vector<16x64xf32>
    %76 = vector.extract_strided_slice %3 {offsets = [3, 0], sizes = [1, 64], strides = [1, 1]} : vector<9x64xf32> to vector<1x64xf32>
    %77 = vector.shape_cast %76 : vector<1x64xf32> to vector<1x64xf32>
    %78 = vector.broadcast %77 : vector<1x64xf32> to vector<16x64xf32>
    %79 = vector.extract_strided_slice %3 {offsets = [4, 0], sizes = [1, 64], strides = [1, 1]} : vector<9x64xf32> to vector<1x64xf32>
    %80 = vector.shape_cast %79 : vector<1x64xf32> to vector<1x64xf32>
    %81 = vector.broadcast %80 : vector<1x64xf32> to vector<16x64xf32>
    %82 = vector.extract_strided_slice %3 {offsets = [5, 0], sizes = [1, 64], strides = [1, 1]} : vector<9x64xf32> to vector<1x64xf32>
    %83 = vector.shape_cast %82 : vector<1x64xf32> to vector<1x64xf32>
    %84 = vector.broadcast %83 : vector<1x64xf32> to vector<16x64xf32>
    %85 = vector.extract_strided_slice %3 {offsets = [6, 0], sizes = [1, 64], strides = [1, 1]} : vector<9x64xf32> to vector<1x64xf32>
    %86 = vector.shape_cast %85 : vector<1x64xf32> to vector<1x64xf32>
    %87 = vector.broadcast %86 : vector<1x64xf32> to vector<16x64xf32>
    %88 = vector.extract_strided_slice %3 {offsets = [7, 0], sizes = [1, 64], strides = [1, 1]} : vector<9x64xf32> to vector<1x64xf32>
    %89 = vector.shape_cast %88 : vector<1x64xf32> to vector<1x64xf32>
    %90 = vector.broadcast %89 : vector<1x64xf32> to vector<16x64xf32>
    %91 = vector.extract_strided_slice %3 {offsets = [8, 0], sizes = [1, 64], strides = [1, 1]} : vector<9x64xf32> to vector<1x64xf32>
    %92 = vector.shape_cast %91 : vector<1x64xf32> to vector<1x64xf32>
    %93 = vector.broadcast %92 : vector<1x64xf32> to vector<16x64xf32>
    %94 = vector.extract_strided_slice %4 {offsets = [0, 0], sizes = [1, 64], strides = [1, 1]} : vector<9x64xf32> to vector<1x64xf32>
    %95 = vector.shape_cast %94 : vector<1x64xf32> to vector<1x64xf32>
    %96 = vector.broadcast %95 : vector<1x64xf32> to vector<16x64xf32>
    %97 = vector.extract_strided_slice %4 {offsets = [1, 0], sizes = [1, 64], strides = [1, 1]} : vector<9x64xf32> to vector<1x64xf32>
    %98 = vector.shape_cast %97 : vector<1x64xf32> to vector<1x64xf32>
    %99 = vector.broadcast %98 : vector<1x64xf32> to vector<16x64xf32>
    %100 = vector.extract_strided_slice %4 {offsets = [2, 0], sizes = [1, 64], strides = [1, 1]} : vector<9x64xf32> to vector<1x64xf32>
    %101 = vector.shape_cast %100 : vector<1x64xf32> to vector<1x64xf32>
    %102 = vector.broadcast %101 : vector<1x64xf32> to vector<16x64xf32>
    %103 = vector.extract_strided_slice %4 {offsets = [3, 0], sizes = [1, 64], strides = [1, 1]} : vector<9x64xf32> to vector<1x64xf32>
    %104 = vector.shape_cast %103 : vector<1x64xf32> to vector<1x64xf32>
    %105 = vector.broadcast %104 : vector<1x64xf32> to vector<16x64xf32>
    %106 = vector.extract_strided_slice %4 {offsets = [4, 0], sizes = [1, 64], strides = [1, 1]} : vector<9x64xf32> to vector<1x64xf32>
    %107 = vector.shape_cast %106 : vector<1x64xf32> to vector<1x64xf32>
    %108 = vector.broadcast %107 : vector<1x64xf32> to vector<16x64xf32>
    %109 = vector.extract_strided_slice %4 {offsets = [5, 0], sizes = [1, 64], strides = [1, 1]} : vector<9x64xf32> to vector<1x64xf32>
    %110 = vector.shape_cast %109 : vector<1x64xf32> to vector<1x64xf32>
    %111 = vector.broadcast %110 : vector<1x64xf32> to vector<16x64xf32>
    %112 = vector.extract_strided_slice %4 {offsets = [6, 0], sizes = [1, 64], strides = [1, 1]} : vector<9x64xf32> to vector<1x64xf32>
    %113 = vector.shape_cast %112 : vector<1x64xf32> to vector<1x64xf32>
    %114 = vector.broadcast %113 : vector<1x64xf32> to vector<16x64xf32>
    %115 = vector.extract_strided_slice %4 {offsets = [7, 0], sizes = [1, 64], strides = [1, 1]} : vector<9x64xf32> to vector<1x64xf32>
    %116 = vector.shape_cast %115 : vector<1x64xf32> to vector<1x64xf32>
    %117 = vector.broadcast %116 : vector<1x64xf32> to vector<16x64xf32>
    %118 = vector.extract_strided_slice %4 {offsets = [8, 0], sizes = [1, 64], strides = [1, 1]} : vector<9x64xf32> to vector<1x64xf32>
    %119 = vector.shape_cast %118 : vector<1x64xf32> to vector<1x64xf32>
    %120 = vector.broadcast %119 : vector<1x64xf32> to vector<16x64xf32>
    %121 = vector.shape_cast %5 : vector<1x64xf32> to vector<1x64xf32>
    %122 = vector.broadcast %121 : vector<1x64xf32> to vector<16x64xf32>
    %123 = vector.shape_cast %6 : vector<1x64xf32> to vector<1x64xf32>
    %124 = vector.broadcast %123 : vector<1x64xf32> to vector<16x64xf32>
    %125 = vector.shape_cast %7 : vector<1x16xf32> to vector<1x16xf32>
    %126 = vector.broadcast %125 : vector<1x16xf32> to vector<16x16xf32>
    %cst = arith.constant 0.000000e+00 : f32
    %127 = vector.broadcast %cst : f32 to vector<1x64xf32>
    %cst_14 = arith.constant 0.000000e+00 : f32
    %128 = vector.broadcast %cst_14 : f32 to vector<16x1xf32>
    %c0_15 = arith.constant 0 : index
    %c0_16 = arith.constant 0 : index
    %129 = vector.load %arg0[%c0_15, %c0_16] : memref<16x16xf32, #tpu.memory_space<vmem>>, vector<16x16xf32>
    %c0_i32 = arith.constant 0 : i32
    %130 = tpu.concatenate %129, %129, %129, %129 in 1 : vector<16x16xf32>, vector<16x16xf32>, vector<16x16xf32>, vector<16x16xf32> -> vector<16x64xf32>
    %131 = vector.extract_strided_slice %130 {offsets = [0, 0], sizes = [15, 64], strides = [1, 1]} : vector<16x64xf32> to vector<15x64xf32>
    %132 = tpu.concatenate %127, %131 in 0 : vector<1x64xf32>, vector<15x64xf32> -> vector<16x64xf32>
    %133 = vector.extract_strided_slice %130 {offsets = [1, 0], sizes = [15, 64], strides = [1, 1]} : vector<16x64xf32> to vector<15x64xf32>
    %134 = tpu.concatenate %133, %127 in 0 : vector<15x64xf32>, vector<1x64xf32> -> vector<16x64xf32>
    %135 = vector.extract_strided_slice %132 {offsets = [0, 0], sizes = [16, 63], strides = [1, 1]} : vector<16x64xf32> to vector<16x63xf32>
    %136 = tpu.concatenate %128, %135 in 1 : vector<16x1xf32>, vector<16x63xf32> -> vector<16x64xf32>
    %137 = vector.extract_strided_slice %132 {offsets = [0, 1], sizes = [16, 63], strides = [1, 1]} : vector<16x64xf32> to vector<16x63xf32>
    %138 = tpu.concatenate %137, %128 in 1 : vector<16x63xf32>, vector<16x1xf32> -> vector<16x64xf32>
    %139 = vector.extract_strided_slice %130 {offsets = [0, 0], sizes = [16, 63], strides = [1, 1]} : vector<16x64xf32> to vector<16x63xf32>
    %140 = tpu.concatenate %128, %139 in 1 : vector<16x1xf32>, vector<16x63xf32> -> vector<16x64xf32>
    %141 = vector.extract_strided_slice %130 {offsets = [0, 1], sizes = [16, 63], strides = [1, 1]} : vector<16x64xf32> to vector<16x63xf32>
    %142 = tpu.concatenate %141, %128 in 1 : vector<16x63xf32>, vector<16x1xf32> -> vector<16x64xf32>
    %143 = vector.extract_strided_slice %134 {offsets = [0, 0], sizes = [16, 63], strides = [1, 1]} : vector<16x64xf32> to vector<16x63xf32>
    %144 = tpu.concatenate %128, %143 in 1 : vector<16x1xf32>, vector<16x63xf32> -> vector<16x64xf32>
    %145 = vector.extract_strided_slice %134 {offsets = [0, 1], sizes = [16, 63], strides = [1, 1]} : vector<16x64xf32> to vector<16x63xf32>
    %146 = tpu.concatenate %145, %128 in 1 : vector<16x63xf32>, vector<16x1xf32> -> vector<16x64xf32>
    %147 = arith.mulf %15, %136 : vector<16x64xf32>
    %148 = arith.addf %122, %147 : vector<16x64xf32>
    %149 = arith.mulf %18, %132 : vector<16x64xf32>
    %150 = arith.addf %148, %149 : vector<16x64xf32>
    %151 = arith.mulf %21, %138 : vector<16x64xf32>
    %152 = arith.addf %150, %151 : vector<16x64xf32>
    %153 = arith.mulf %24, %140 : vector<16x64xf32>
    %154 = arith.addf %152, %153 : vector<16x64xf32>
    %155 = arith.mulf %27, %130 : vector<16x64xf32>
    %156 = arith.addf %154, %155 : vector<16x64xf32>
    %157 = arith.mulf %30, %142 : vector<16x64xf32>
    %158 = arith.addf %156, %157 : vector<16x64xf32>
    %159 = arith.mulf %33, %144 : vector<16x64xf32>
    %160 = arith.addf %158, %159 : vector<16x64xf32>
    %161 = arith.mulf %36, %134 : vector<16x64xf32>
    %162 = arith.addf %160, %161 : vector<16x64xf32>
    %163 = arith.mulf %39, %146 : vector<16x64xf32>
    %164 = arith.addf %162, %163 : vector<16x64xf32>
    %cst_17 = arith.constant 0.000000e+00 : f32
    %165 = vector.broadcast %cst_17 : f32 to vector<16x64xf32>
    %166 = arith.maximumf %164, %165 : vector<16x64xf32>
    %167 = vector.extract_strided_slice %166 {offsets = [0, 0], sizes = [15, 64], strides = [1, 1]} : vector<16x64xf32> to vector<15x64xf32>
    %168 = tpu.concatenate %127, %167 in 0 : vector<1x64xf32>, vector<15x64xf32> -> vector<16x64xf32>
    %169 = vector.extract_strided_slice %166 {offsets = [1, 0], sizes = [15, 64], strides = [1, 1]} : vector<16x64xf32> to vector<15x64xf32>
    %170 = tpu.concatenate %169, %127 in 0 : vector<15x64xf32>, vector<1x64xf32> -> vector<16x64xf32>
    %171 = vector.extract_strided_slice %168 {offsets = [0, 0], sizes = [16, 63], strides = [1, 1]} : vector<16x64xf32> to vector<16x63xf32>
    %172 = tpu.concatenate %128, %171 in 1 : vector<16x1xf32>, vector<16x63xf32> -> vector<16x64xf32>
    %173 = vector.extract_strided_slice %168 {offsets = [0, 1], sizes = [16, 63], strides = [1, 1]} : vector<16x64xf32> to vector<16x63xf32>
    %174 = tpu.concatenate %173, %128 in 1 : vector<16x63xf32>, vector<16x1xf32> -> vector<16x64xf32>
    %175 = vector.extract_strided_slice %166 {offsets = [0, 0], sizes = [16, 63], strides = [1, 1]} : vector<16x64xf32> to vector<16x63xf32>
    %176 = tpu.concatenate %128, %175 in 1 : vector<16x1xf32>, vector<16x63xf32> -> vector<16x64xf32>
    %177 = vector.extract_strided_slice %166 {offsets = [0, 1], sizes = [16, 63], strides = [1, 1]} : vector<16x64xf32> to vector<16x63xf32>
    %178 = tpu.concatenate %177, %128 in 1 : vector<16x63xf32>, vector<16x1xf32> -> vector<16x64xf32>
    %179 = vector.extract_strided_slice %170 {offsets = [0, 0], sizes = [16, 63], strides = [1, 1]} : vector<16x64xf32> to vector<16x63xf32>
    %180 = tpu.concatenate %128, %179 in 1 : vector<16x1xf32>, vector<16x63xf32> -> vector<16x64xf32>
    %181 = vector.extract_strided_slice %170 {offsets = [0, 1], sizes = [16, 63], strides = [1, 1]} : vector<16x64xf32> to vector<16x63xf32>
    %182 = tpu.concatenate %181, %128 in 1 : vector<16x63xf32>, vector<16x1xf32> -> vector<16x64xf32>
    %183 = arith.mulf %42, %172 : vector<16x64xf32>
    %184 = arith.mulf %45, %168 : vector<16x64xf32>
    %185 = arith.addf %183, %184 : vector<16x64xf32>
    %186 = arith.mulf %48, %174 : vector<16x64xf32>
    %187 = arith.addf %185, %186 : vector<16x64xf32>
    %188 = arith.mulf %51, %176 : vector<16x64xf32>
    %189 = arith.addf %187, %188 : vector<16x64xf32>
    %190 = arith.mulf %54, %166 : vector<16x64xf32>
    %191 = arith.addf %189, %190 : vector<16x64xf32>
    %192 = arith.mulf %57, %178 : vector<16x64xf32>
    %193 = arith.addf %191, %192 : vector<16x64xf32>
    %194 = arith.mulf %60, %180 : vector<16x64xf32>
    %195 = arith.addf %193, %194 : vector<16x64xf32>
    %196 = arith.mulf %63, %170 : vector<16x64xf32>
    %197 = arith.addf %195, %196 : vector<16x64xf32>
    %198 = arith.mulf %66, %182 : vector<16x64xf32>
    %199 = arith.addf %197, %198 : vector<16x64xf32>
    %cst_18 = arith.constant dense<0.000000e+00> : vector<16x16xf32>
    %200 = tpu.matmul %199, %12, %cst_18 {dimension_numbers = #tpu.dot_dimension_numbers<[1], [0], [0], [1], [0, 0, 1, 1], [], []>} : vector<16x64xf32>, vector<64x16xf32>, vector<16x16xf32> -> vector<16x16xf32>
    %cst_19 = arith.constant dense<0.000000e+00> : vector<8x16xf32>
    %201 = tpu.matmul %8, %200, %cst_19 {dimension_numbers = #tpu.dot_dimension_numbers<[1], [0], [0], [1], [0, 0, 1, 1], [], []>} : vector<8x16xf32>, vector<16x16xf32>, vector<8x16xf32> -> vector<8x16xf32>
    %202 = arith.addf %201, %11 : vector<8x16xf32>
    %203 = arith.subf %202, %0 : vector<8x16xf32>
    %cst_20 = arith.constant dense<0.000000e+00> : vector<8x64xf32>
    %204 = tpu.matmul %203, %10, %cst_20 {dimension_numbers = #tpu.dot_dimension_numbers<[1], [0], [0], [1], [0, 0, 1, 1], [], []>} : vector<8x16xf32>, vector<16x64xf32>, vector<8x64xf32> -> vector<8x64xf32>
    %cst_21 = arith.constant dense<0.000000e+00> : vector<16x64xf32>
    %205 = tpu.matmul %9, %204, %cst_21 {dimension_numbers = #tpu.dot_dimension_numbers<[1], [0], [0], [1], [0, 0, 1, 1], [], []>} : vector<16x8xf32>, vector<8x64xf32>, vector<16x64xf32> -> vector<16x64xf32>
    %206 = vector.extract_strided_slice %205 {offsets = [0, 0], sizes = [15, 64], strides = [1, 1]} : vector<16x64xf32> to vector<15x64xf32>
    %207 = tpu.concatenate %127, %206 in 0 : vector<1x64xf32>, vector<15x64xf32> -> vector<16x64xf32>
    %208 = vector.extract_strided_slice %205 {offsets = [1, 0], sizes = [15, 64], strides = [1, 1]} : vector<16x64xf32> to vector<15x64xf32>
    %209 = tpu.concatenate %208, %127 in 0 : vector<15x64xf32>, vector<1x64xf32> -> vector<16x64xf32>
    %210 = vector.extract_strided_slice %207 {offsets = [0, 0], sizes = [16, 63], strides = [1, 1]} : vector<16x64xf32> to vector<16x63xf32>
    %211 = tpu.concatenate %128, %210 in 1 : vector<16x1xf32>, vector<16x63xf32> -> vector<16x64xf32>
    %212 = vector.extract_strided_slice %207 {offsets = [0, 1], sizes = [16, 63], strides = [1, 1]} : vector<16x64xf32> to vector<16x63xf32>
    %213 = tpu.concatenate %212, %128 in 1 : vector<16x63xf32>, vector<16x1xf32> -> vector<16x64xf32>
    %214 = vector.extract_strided_slice %205 {offsets = [0, 0], sizes = [16, 63], strides = [1, 1]} : vector<16x64xf32> to vector<16x63xf32>
    %215 = tpu.concatenate %128, %214 in 1 : vector<16x1xf32>, vector<16x63xf32> -> vector<16x64xf32>
    %216 = vector.extract_strided_slice %205 {offsets = [0, 1], sizes = [16, 63], strides = [1, 1]} : vector<16x64xf32> to vector<16x63xf32>
    %217 = tpu.concatenate %216, %128 in 1 : vector<16x63xf32>, vector<16x1xf32> -> vector<16x64xf32>
    %218 = vector.extract_strided_slice %209 {offsets = [0, 0], sizes = [16, 63], strides = [1, 1]} : vector<16x64xf32> to vector<16x63xf32>
    %219 = tpu.concatenate %128, %218 in 1 : vector<16x1xf32>, vector<16x63xf32> -> vector<16x64xf32>
    %220 = vector.extract_strided_slice %209 {offsets = [0, 1], sizes = [16, 63], strides = [1, 1]} : vector<16x64xf32> to vector<16x63xf32>
    %221 = tpu.concatenate %220, %128 in 1 : vector<16x63xf32>, vector<16x1xf32> -> vector<16x64xf32>
    %222 = arith.mulf %69, %211 : vector<16x64xf32>
    %223 = arith.addf %124, %222 : vector<16x64xf32>
    %224 = arith.mulf %72, %207 : vector<16x64xf32>
    %225 = arith.addf %223, %224 : vector<16x64xf32>
    %226 = arith.mulf %75, %213 : vector<16x64xf32>
    %227 = arith.addf %225, %226 : vector<16x64xf32>
    %228 = arith.mulf %78, %215 : vector<16x64xf32>
    %229 = arith.addf %227, %228 : vector<16x64xf32>
    %230 = arith.mulf %81, %205 : vector<16x64xf32>
    %231 = arith.addf %229, %230 : vector<16x64xf32>
    %232 = arith.mulf %84, %217 : vector<16x64xf32>
    %233 = arith.addf %231, %232 : vector<16x64xf32>
    %234 = arith.mulf %87, %219 : vector<16x64xf32>
    %235 = arith.addf %233, %234 : vector<16x64xf32>
    %236 = arith.mulf %90, %209 : vector<16x64xf32>
    %237 = arith.addf %235, %236 : vector<16x64xf32>
    %238 = arith.mulf %93, %221 : vector<16x64xf32>
    %239 = arith.addf %237, %238 : vector<16x64xf32>
    %cst_22 = arith.constant 0.000000e+00 : f32
    %240 = vector.broadcast %cst_22 : f32 to vector<16x64xf32>
    %241 = arith.maximumf %239, %240 : vector<16x64xf32>
    %242 = vector.extract_strided_slice %241 {offsets = [0, 0], sizes = [15, 64], strides = [1, 1]} : vector<16x64xf32> to vector<15x64xf32>
    %243 = tpu.concatenate %127, %242 in 0 : vector<1x64xf32>, vector<15x64xf32> -> vector<16x64xf32>
    %244 = vector.extract_strided_slice %241 {offsets = [1, 0], sizes = [15, 64], strides = [1, 1]} : vector<16x64xf32> to vector<15x64xf32>
    %245 = tpu.concatenate %244, %127 in 0 : vector<15x64xf32>, vector<1x64xf32> -> vector<16x64xf32>
    %246 = vector.extract_strided_slice %243 {offsets = [0, 0], sizes = [16, 63], strides = [1, 1]} : vector<16x64xf32> to vector<16x63xf32>
    %247 = tpu.concatenate %128, %246 in 1 : vector<16x1xf32>, vector<16x63xf32> -> vector<16x64xf32>
    %248 = vector.extract_strided_slice %243 {offsets = [0, 1], sizes = [16, 63], strides = [1, 1]} : vector<16x64xf32> to vector<16x63xf32>
    %249 = tpu.concatenate %248, %128 in 1 : vector<16x63xf32>, vector<16x1xf32> -> vector<16x64xf32>
    %250 = vector.extract_strided_slice %241 {offsets = [0, 0], sizes = [16, 63], strides = [1, 1]} : vector<16x64xf32> to vector<16x63xf32>
    %251 = tpu.concatenate %128, %250 in 1 : vector<16x1xf32>, vector<16x63xf32> -> vector<16x64xf32>
    %252 = vector.extract_strided_slice %241 {offsets = [0, 1], sizes = [16, 63], strides = [1, 1]} : vector<16x64xf32> to vector<16x63xf32>
    %253 = tpu.concatenate %252, %128 in 1 : vector<16x63xf32>, vector<16x1xf32> -> vector<16x64xf32>
    %254 = vector.extract_strided_slice %245 {offsets = [0, 0], sizes = [16, 63], strides = [1, 1]} : vector<16x64xf32> to vector<16x63xf32>
    %255 = tpu.concatenate %128, %254 in 1 : vector<16x1xf32>, vector<16x63xf32> -> vector<16x64xf32>
    %256 = vector.extract_strided_slice %245 {offsets = [0, 1], sizes = [16, 63], strides = [1, 1]} : vector<16x64xf32> to vector<16x63xf32>
    %257 = tpu.concatenate %256, %128 in 1 : vector<16x63xf32>, vector<16x1xf32> -> vector<16x64xf32>
    %258 = arith.mulf %96, %247 : vector<16x64xf32>
    %259 = arith.mulf %99, %243 : vector<16x64xf32>
    %260 = arith.addf %258, %259 : vector<16x64xf32>
    %261 = arith.mulf %102, %249 : vector<16x64xf32>
    %262 = arith.addf %260, %261 : vector<16x64xf32>
    %263 = arith.mulf %105, %251 : vector<16x64xf32>
    %264 = arith.addf %262, %263 : vector<16x64xf32>
    %265 = arith.mulf %108, %241 : vector<16x64xf32>
    %266 = arith.addf %264, %265 : vector<16x64xf32>
    %267 = arith.mulf %111, %253 : vector<16x64xf32>
    %268 = arith.addf %266, %267 : vector<16x64xf32>
    %269 = arith.mulf %114, %255 : vector<16x64xf32>
    %270 = arith.addf %268, %269 : vector<16x64xf32>
    %271 = arith.mulf %117, %245 : vector<16x64xf32>
    %272 = arith.addf %270, %271 : vector<16x64xf32>
    %273 = arith.mulf %120, %257 : vector<16x64xf32>
    %274 = arith.addf %272, %273 : vector<16x64xf32>
    %275 = vector.extract_strided_slice %274 {offsets = [0, 0], sizes = [16, 16], strides = [1, 1]} : vector<16x64xf32> to vector<16x16xf32>
    %276 = vector.extract_strided_slice %274 {offsets = [0, 16], sizes = [16, 16], strides = [1, 1]} : vector<16x64xf32> to vector<16x16xf32>
    %277 = arith.addf %275, %276 : vector<16x16xf32>
    %278 = vector.extract_strided_slice %274 {offsets = [0, 32], sizes = [16, 16], strides = [1, 1]} : vector<16x64xf32> to vector<16x16xf32>
    %279 = arith.addf %277, %278 : vector<16x16xf32>
    %280 = vector.extract_strided_slice %274 {offsets = [0, 48], sizes = [16, 16], strides = [1, 1]} : vector<16x64xf32> to vector<16x16xf32>
    %281 = arith.addf %279, %280 : vector<16x16xf32>
    %282 = arith.subf %129, %281 : vector<16x16xf32>
    %283 = arith.subf %282, %126 : vector<16x16xf32>
    %c1_i32 = arith.constant 1 : i32
    %284 = tpu.concatenate %283, %283, %283, %283 in 1 : vector<16x16xf32>, vector<16x16xf32>, vector<16x16xf32>, vector<16x16xf32> -> vector<16x64xf32>
    %285 = vector.extract_strided_slice %284 {offsets = [0, 0], sizes = [15, 64], strides = [1, 1]} : vector<16x64xf32> to vector<15x64xf32>
    %286 = tpu.concatenate %127, %285 in 0 : vector<1x64xf32>, vector<15x64xf32> -> vector<16x64xf32>
    %287 = vector.extract_strided_slice %284 {offsets = [1, 0], sizes = [15, 64], strides = [1, 1]} : vector<16x64xf32> to vector<15x64xf32>
    %288 = tpu.concatenate %287, %127 in 0 : vector<15x64xf32>, vector<1x64xf32> -> vector<16x64xf32>
    %289 = vector.extract_strided_slice %286 {offsets = [0, 0], sizes = [16, 63], strides = [1, 1]} : vector<16x64xf32> to vector<16x63xf32>
    %290 = tpu.concatenate %128, %289 in 1 : vector<16x1xf32>, vector<16x63xf32> -> vector<16x64xf32>
    %291 = vector.extract_strided_slice %286 {offsets = [0, 1], sizes = [16, 63], strides = [1, 1]} : vector<16x64xf32> to vector<16x63xf32>
    %292 = tpu.concatenate %291, %128 in 1 : vector<16x63xf32>, vector<16x1xf32> -> vector<16x64xf32>
    %293 = vector.extract_strided_slice %284 {offsets = [0, 0], sizes = [16, 63], strides = [1, 1]} : vector<16x64xf32> to vector<16x63xf32>
    %294 = tpu.concatenate %128, %293 in 1 : vector<16x1xf32>, vector<16x63xf32> -> vector<16x64xf32>
    %295 = vector.extract_strided_slice %284 {offsets = [0, 1], sizes = [16, 63], strides = [1, 1]} : vector<16x64xf32> to vector<16x63xf32>
    %296 = tpu.concatenate %295, %128 in 1 : vector<16x63xf32>, vector<16x1xf32> -> vector<16x64xf32>
    %297 = vector.extract_strided_slice %288 {offsets = [0, 0], sizes = [16, 63], strides = [1, 1]} : vector<16x64xf32> to vector<16x63xf32>
    %298 = tpu.concatenate %128, %297 in 1 : vector<16x1xf32>, vector<16x63xf32> -> vector<16x64xf32>
    %299 = vector.extract_strided_slice %288 {offsets = [0, 1], sizes = [16, 63], strides = [1, 1]} : vector<16x64xf32> to vector<16x63xf32>
    %300 = tpu.concatenate %299, %128 in 1 : vector<16x63xf32>, vector<16x1xf32> -> vector<16x64xf32>
    %301 = arith.mulf %15, %290 : vector<16x64xf32>
    %302 = arith.addf %122, %301 : vector<16x64xf32>
    %303 = arith.mulf %18, %286 : vector<16x64xf32>
    %304 = arith.addf %302, %303 : vector<16x64xf32>
    %305 = arith.mulf %21, %292 : vector<16x64xf32>
    %306 = arith.addf %304, %305 : vector<16x64xf32>
    %307 = arith.mulf %24, %294 : vector<16x64xf32>
    %308 = arith.addf %306, %307 : vector<16x64xf32>
    %309 = arith.mulf %27, %284 : vector<16x64xf32>
    %310 = arith.addf %308, %309 : vector<16x64xf32>
    %311 = arith.mulf %30, %296 : vector<16x64xf32>
    %312 = arith.addf %310, %311 : vector<16x64xf32>
    %313 = arith.mulf %33, %298 : vector<16x64xf32>
    %314 = arith.addf %312, %313 : vector<16x64xf32>
    %315 = arith.mulf %36, %288 : vector<16x64xf32>
    %316 = arith.addf %314, %315 : vector<16x64xf32>
    %317 = arith.mulf %39, %300 : vector<16x64xf32>
    %318 = arith.addf %316, %317 : vector<16x64xf32>
    %cst_23 = arith.constant 0.000000e+00 : f32
    %319 = vector.broadcast %cst_23 : f32 to vector<16x64xf32>
    %320 = arith.maximumf %318, %319 : vector<16x64xf32>
    %321 = vector.extract_strided_slice %320 {offsets = [0, 0], sizes = [15, 64], strides = [1, 1]} : vector<16x64xf32> to vector<15x64xf32>
    %322 = tpu.concatenate %127, %321 in 0 : vector<1x64xf32>, vector<15x64xf32> -> vector<16x64xf32>
    %323 = vector.extract_strided_slice %320 {offsets = [1, 0], sizes = [15, 64], strides = [1, 1]} : vector<16x64xf32> to vector<15x64xf32>
    %324 = tpu.concatenate %323, %127 in 0 : vector<15x64xf32>, vector<1x64xf32> -> vector<16x64xf32>
    %325 = vector.extract_strided_slice %322 {offsets = [0, 0], sizes = [16, 63], strides = [1, 1]} : vector<16x64xf32> to vector<16x63xf32>
    %326 = tpu.concatenate %128, %325 in 1 : vector<16x1xf32>, vector<16x63xf32> -> vector<16x64xf32>
    %327 = vector.extract_strided_slice %322 {offsets = [0, 1], sizes = [16, 63], strides = [1, 1]} : vector<16x64xf32> to vector<16x63xf32>
    %328 = tpu.concatenate %327, %128 in 1 : vector<16x63xf32>, vector<16x1xf32> -> vector<16x64xf32>
    %329 = vector.extract_strided_slice %320 {offsets = [0, 0], sizes = [16, 63], strides = [1, 1]} : vector<16x64xf32> to vector<16x63xf32>
    %330 = tpu.concatenate %128, %329 in 1 : vector<16x1xf32>, vector<16x63xf32> -> vector<16x64xf32>
    %331 = vector.extract_strided_slice %320 {offsets = [0, 1], sizes = [16, 63], strides = [1, 1]} : vector<16x64xf32> to vector<16x63xf32>
    %332 = tpu.concatenate %331, %128 in 1 : vector<16x63xf32>, vector<16x1xf32> -> vector<16x64xf32>
    %333 = vector.extract_strided_slice %324 {offsets = [0, 0], sizes = [16, 63], strides = [1, 1]} : vector<16x64xf32> to vector<16x63xf32>
    %334 = tpu.concatenate %128, %333 in 1 : vector<16x1xf32>, vector<16x63xf32> -> vector<16x64xf32>
    %335 = vector.extract_strided_slice %324 {offsets = [0, 1], sizes = [16, 63], strides = [1, 1]} : vector<16x64xf32> to vector<16x63xf32>
    %336 = tpu.concatenate %335, %128 in 1 : vector<16x63xf32>, vector<16x1xf32> -> vector<16x64xf32>
    %337 = arith.mulf %42, %326 : vector<16x64xf32>
    %338 = arith.mulf %45, %322 : vector<16x64xf32>
    %339 = arith.addf %337, %338 : vector<16x64xf32>
    %340 = arith.mulf %48, %328 : vector<16x64xf32>
    %341 = arith.addf %339, %340 : vector<16x64xf32>
    %342 = arith.mulf %51, %330 : vector<16x64xf32>
    %343 = arith.addf %341, %342 : vector<16x64xf32>
    %344 = arith.mulf %54, %320 : vector<16x64xf32>
    %345 = arith.addf %343, %344 : vector<16x64xf32>
    %346 = arith.mulf %57, %332 : vector<16x64xf32>
    %347 = arith.addf %345, %346 : vector<16x64xf32>
    %348 = arith.mulf %60, %334 : vector<16x64xf32>
    %349 = arith.addf %347, %348 : vector<16x64xf32>
    %350 = arith.mulf %63, %324 : vector<16x64xf32>
    %351 = arith.addf %349, %350 : vector<16x64xf32>
    %352 = arith.mulf %66, %336 : vector<16x64xf32>
    %353 = arith.addf %351, %352 : vector<16x64xf32>
    %cst_24 = arith.constant dense<0.000000e+00> : vector<16x16xf32>
    %354 = tpu.matmul %353, %12, %cst_24 {dimension_numbers = #tpu.dot_dimension_numbers<[1], [0], [0], [1], [0, 0, 1, 1], [], []>} : vector<16x64xf32>, vector<64x16xf32>, vector<16x16xf32> -> vector<16x16xf32>
    %cst_25 = arith.constant dense<0.000000e+00> : vector<8x16xf32>
    %355 = tpu.matmul %8, %354, %cst_25 {dimension_numbers = #tpu.dot_dimension_numbers<[1], [0], [0], [1], [0, 0, 1, 1], [], []>} : vector<8x16xf32>, vector<16x16xf32>, vector<8x16xf32> -> vector<8x16xf32>
    %356 = arith.addf %355, %11 : vector<8x16xf32>
    %357 = arith.subf %356, %0 : vector<8x16xf32>
    %cst_26 = arith.constant dense<0.000000e+00> : vector<8x64xf32>
    %358 = tpu.matmul %357, %10, %cst_26 {dimension_numbers = #tpu.dot_dimension_numbers<[1], [0], [0], [1], [0, 0, 1, 1], [], []>} : vector<8x16xf32>, vector<16x64xf32>, vector<8x64xf32> -> vector<8x64xf32>
    %cst_27 = arith.constant dense<0.000000e+00> : vector<16x64xf32>
    %359 = tpu.matmul %9, %358, %cst_27 {dimension_numbers = #tpu.dot_dimension_numbers<[1], [0], [0], [1], [0, 0, 1, 1], [], []>} : vector<16x8xf32>, vector<8x64xf32>, vector<16x64xf32> -> vector<16x64xf32>
    %360 = vector.extract_strided_slice %359 {offsets = [0, 0], sizes = [15, 64], strides = [1, 1]} : vector<16x64xf32> to vector<15x64xf32>
    %361 = tpu.concatenate %127, %360 in 0 : vector<1x64xf32>, vector<15x64xf32> -> vector<16x64xf32>
    %362 = vector.extract_strided_slice %359 {offsets = [1, 0], sizes = [15, 64], strides = [1, 1]} : vector<16x64xf32> to vector<15x64xf32>
    %363 = tpu.concatenate %362, %127 in 0 : vector<15x64xf32>, vector<1x64xf32> -> vector<16x64xf32>
    %364 = vector.extract_strided_slice %361 {offsets = [0, 0], sizes = [16, 63], strides = [1, 1]} : vector<16x64xf32> to vector<16x63xf32>
    %365 = tpu.concatenate %128, %364 in 1 : vector<16x1xf32>, vector<16x63xf32> -> vector<16x64xf32>
    %366 = vector.extract_strided_slice %361 {offsets = [0, 1], sizes = [16, 63], strides = [1, 1]} : vector<16x64xf32> to vector<16x63xf32>
    %367 = tpu.concatenate %366, %128 in 1 : vector<16x63xf32>, vector<16x1xf32> -> vector<16x64xf32>
    %368 = vector.extract_strided_slice %359 {offsets = [0, 0], sizes = [16, 63], strides = [1, 1]} : vector<16x64xf32> to vector<16x63xf32>
    %369 = tpu.concatenate %128, %368 in 1 : vector<16x1xf32>, vector<16x63xf32> -> vector<16x64xf32>
    %370 = vector.extract_strided_slice %359 {offsets = [0, 1], sizes = [16, 63], strides = [1, 1]} : vector<16x64xf32> to vector<16x63xf32>
    %371 = tpu.concatenate %370, %128 in 1 : vector<16x63xf32>, vector<16x1xf32> -> vector<16x64xf32>
    %372 = vector.extract_strided_slice %363 {offsets = [0, 0], sizes = [16, 63], strides = [1, 1]} : vector<16x64xf32> to vector<16x63xf32>
    %373 = tpu.concatenate %128, %372 in 1 : vector<16x1xf32>, vector<16x63xf32> -> vector<16x64xf32>
    %374 = vector.extract_strided_slice %363 {offsets = [0, 1], sizes = [16, 63], strides = [1, 1]} : vector<16x64xf32> to vector<16x63xf32>
    %375 = tpu.concatenate %374, %128 in 1 : vector<16x63xf32>, vector<16x1xf32> -> vector<16x64xf32>
    %376 = arith.mulf %69, %365 : vector<16x64xf32>
    %377 = arith.addf %124, %376 : vector<16x64xf32>
    %378 = arith.mulf %72, %361 : vector<16x64xf32>
    %379 = arith.addf %377, %378 : vector<16x64xf32>
    %380 = arith.mulf %75, %367 : vector<16x64xf32>
    %381 = arith.addf %379, %380 : vector<16x64xf32>
    %382 = arith.mulf %78, %369 : vector<16x64xf32>
    %383 = arith.addf %381, %382 : vector<16x64xf32>
    %384 = arith.mulf %81, %359 : vector<16x64xf32>
    %385 = arith.addf %383, %384 : vector<16x64xf32>
    %386 = arith.mulf %84, %371 : vector<16x64xf32>
    %387 = arith.addf %385, %386 : vector<16x64xf32>
    %388 = arith.mulf %87, %373 : vector<16x64xf32>
    %389 = arith.addf %387, %388 : vector<16x64xf32>
    %390 = arith.mulf %90, %363 : vector<16x64xf32>
    %391 = arith.addf %389, %390 : vector<16x64xf32>
    %392 = arith.mulf %93, %375 : vector<16x64xf32>
    %393 = arith.addf %391, %392 : vector<16x64xf32>
    %cst_28 = arith.constant 0.000000e+00 : f32
    %394 = vector.broadcast %cst_28 : f32 to vector<16x64xf32>
    %395 = arith.maximumf %393, %394 : vector<16x64xf32>
    %396 = vector.extract_strided_slice %395 {offsets = [0, 0], sizes = [15, 64], strides = [1, 1]} : vector<16x64xf32> to vector<15x64xf32>
    %397 = tpu.concatenate %127, %396 in 0 : vector<1x64xf32>, vector<15x64xf32> -> vector<16x64xf32>
    %398 = vector.extract_strided_slice %395 {offsets = [1, 0], sizes = [15, 64], strides = [1, 1]} : vector<16x64xf32> to vector<15x64xf32>
    %399 = tpu.concatenate %398, %127 in 0 : vector<15x64xf32>, vector<1x64xf32> -> vector<16x64xf32>
    %400 = vector.extract_strided_slice %397 {offsets = [0, 0], sizes = [16, 63], strides = [1, 1]} : vector<16x64xf32> to vector<16x63xf32>
    %401 = tpu.concatenate %128, %400 in 1 : vector<16x1xf32>, vector<16x63xf32> -> vector<16x64xf32>
    %402 = vector.extract_strided_slice %397 {offsets = [0, 1], sizes = [16, 63], strides = [1, 1]} : vector<16x64xf32> to vector<16x63xf32>
    %403 = tpu.concatenate %402, %128 in 1 : vector<16x63xf32>, vector<16x1xf32> -> vector<16x64xf32>
    %404 = vector.extract_strided_slice %395 {offsets = [0, 0], sizes = [16, 63], strides = [1, 1]} : vector<16x64xf32> to vector<16x63xf32>
    %405 = tpu.concatenate %128, %404 in 1 : vector<16x1xf32>, vector<16x63xf32> -> vector<16x64xf32>
    %406 = vector.extract_strided_slice %395 {offsets = [0, 1], sizes = [16, 63], strides = [1, 1]} : vector<16x64xf32> to vector<16x63xf32>
    %407 = tpu.concatenate %406, %128 in 1 : vector<16x63xf32>, vector<16x1xf32> -> vector<16x64xf32>
    %408 = vector.extract_strided_slice %399 {offsets = [0, 0], sizes = [16, 63], strides = [1, 1]} : vector<16x64xf32> to vector<16x63xf32>
    %409 = tpu.concatenate %128, %408 in 1 : vector<16x1xf32>, vector<16x63xf32> -> vector<16x64xf32>
    %410 = vector.extract_strided_slice %399 {offsets = [0, 1], sizes = [16, 63], strides = [1, 1]} : vector<16x64xf32> to vector<16x63xf32>
    %411 = tpu.concatenate %410, %128 in 1 : vector<16x63xf32>, vector<16x1xf32> -> vector<16x64xf32>
    %412 = arith.mulf %96, %401 : vector<16x64xf32>
    %413 = arith.mulf %99, %397 : vector<16x64xf32>
    %414 = arith.addf %412, %413 : vector<16x64xf32>
    %415 = arith.mulf %102, %403 : vector<16x64xf32>
    %416 = arith.addf %414, %415 : vector<16x64xf32>
    %417 = arith.mulf %105, %405 : vector<16x64xf32>
    %418 = arith.addf %416, %417 : vector<16x64xf32>
    %419 = arith.mulf %108, %395 : vector<16x64xf32>
    %420 = arith.addf %418, %419 : vector<16x64xf32>
    %421 = arith.mulf %111, %407 : vector<16x64xf32>
    %422 = arith.addf %420, %421 : vector<16x64xf32>
    %423 = arith.mulf %114, %409 : vector<16x64xf32>
    %424 = arith.addf %422, %423 : vector<16x64xf32>
    %425 = arith.mulf %117, %399 : vector<16x64xf32>
    %426 = arith.addf %424, %425 : vector<16x64xf32>
    %427 = arith.mulf %120, %411 : vector<16x64xf32>
    %428 = arith.addf %426, %427 : vector<16x64xf32>
    %429 = vector.extract_strided_slice %428 {offsets = [0, 0], sizes = [16, 16], strides = [1, 1]} : vector<16x64xf32> to vector<16x16xf32>
    %430 = vector.extract_strided_slice %428 {offsets = [0, 16], sizes = [16, 16], strides = [1, 1]} : vector<16x64xf32> to vector<16x16xf32>
    %431 = arith.addf %429, %430 : vector<16x16xf32>
    %432 = vector.extract_strided_slice %428 {offsets = [0, 32], sizes = [16, 16], strides = [1, 1]} : vector<16x64xf32> to vector<16x16xf32>
    %433 = arith.addf %431, %432 : vector<16x16xf32>
    %434 = vector.extract_strided_slice %428 {offsets = [0, 48], sizes = [16, 16], strides = [1, 1]} : vector<16x64xf32> to vector<16x16xf32>
    %435 = arith.addf %433, %434 : vector<16x16xf32>
    %436 = arith.subf %283, %435 : vector<16x16xf32>
    %437 = arith.subf %436, %126 : vector<16x16xf32>
    %c2_i32 = arith.constant 2 : i32
    %438 = tpu.concatenate %437, %437, %437, %437 in 1 : vector<16x16xf32>, vector<16x16xf32>, vector<16x16xf32>, vector<16x16xf32> -> vector<16x64xf32>
    %439 = vector.extract_strided_slice %438 {offsets = [0, 0], sizes = [15, 64], strides = [1, 1]} : vector<16x64xf32> to vector<15x64xf32>
    %440 = tpu.concatenate %127, %439 in 0 : vector<1x64xf32>, vector<15x64xf32> -> vector<16x64xf32>
    %441 = vector.extract_strided_slice %438 {offsets = [1, 0], sizes = [15, 64], strides = [1, 1]} : vector<16x64xf32> to vector<15x64xf32>
    %442 = tpu.concatenate %441, %127 in 0 : vector<15x64xf32>, vector<1x64xf32> -> vector<16x64xf32>
    %443 = vector.extract_strided_slice %440 {offsets = [0, 0], sizes = [16, 63], strides = [1, 1]} : vector<16x64xf32> to vector<16x63xf32>
    %444 = tpu.concatenate %128, %443 in 1 : vector<16x1xf32>, vector<16x63xf32> -> vector<16x64xf32>
    %445 = vector.extract_strided_slice %440 {offsets = [0, 1], sizes = [16, 63], strides = [1, 1]} : vector<16x64xf32> to vector<16x63xf32>
    %446 = tpu.concatenate %445, %128 in 1 : vector<16x63xf32>, vector<16x1xf32> -> vector<16x64xf32>
    %447 = vector.extract_strided_slice %438 {offsets = [0, 0], sizes = [16, 63], strides = [1, 1]} : vector<16x64xf32> to vector<16x63xf32>
    %448 = tpu.concatenate %128, %447 in 1 : vector<16x1xf32>, vector<16x63xf32> -> vector<16x64xf32>
    %449 = vector.extract_strided_slice %438 {offsets = [0, 1], sizes = [16, 63], strides = [1, 1]} : vector<16x64xf32> to vector<16x63xf32>
    %450 = tpu.concatenate %449, %128 in 1 : vector<16x63xf32>, vector<16x1xf32> -> vector<16x64xf32>
    %451 = vector.extract_strided_slice %442 {offsets = [0, 0], sizes = [16, 63], strides = [1, 1]} : vector<16x64xf32> to vector<16x63xf32>
    %452 = tpu.concatenate %128, %451 in 1 : vector<16x1xf32>, vector<16x63xf32> -> vector<16x64xf32>
    %453 = vector.extract_strided_slice %442 {offsets = [0, 1], sizes = [16, 63], strides = [1, 1]} : vector<16x64xf32> to vector<16x63xf32>
    %454 = tpu.concatenate %453, %128 in 1 : vector<16x63xf32>, vector<16x1xf32> -> vector<16x64xf32>
    %455 = arith.mulf %15, %444 : vector<16x64xf32>
    %456 = arith.addf %122, %455 : vector<16x64xf32>
    %457 = arith.mulf %18, %440 : vector<16x64xf32>
    %458 = arith.addf %456, %457 : vector<16x64xf32>
    %459 = arith.mulf %21, %446 : vector<16x64xf32>
    %460 = arith.addf %458, %459 : vector<16x64xf32>
    %461 = arith.mulf %24, %448 : vector<16x64xf32>
    %462 = arith.addf %460, %461 : vector<16x64xf32>
    %463 = arith.mulf %27, %438 : vector<16x64xf32>
    %464 = arith.addf %462, %463 : vector<16x64xf32>
    %465 = arith.mulf %30, %450 : vector<16x64xf32>
    %466 = arith.addf %464, %465 : vector<16x64xf32>
    %467 = arith.mulf %33, %452 : vector<16x64xf32>
    %468 = arith.addf %466, %467 : vector<16x64xf32>
    %469 = arith.mulf %36, %442 : vector<16x64xf32>
    %470 = arith.addf %468, %469 : vector<16x64xf32>
    %471 = arith.mulf %39, %454 : vector<16x64xf32>
    %472 = arith.addf %470, %471 : vector<16x64xf32>
    %cst_29 = arith.constant 0.000000e+00 : f32
    %473 = vector.broadcast %cst_29 : f32 to vector<16x64xf32>
    %474 = arith.maximumf %472, %473 : vector<16x64xf32>
    %475 = vector.extract_strided_slice %474 {offsets = [0, 0], sizes = [15, 64], strides = [1, 1]} : vector<16x64xf32> to vector<15x64xf32>
    %476 = tpu.concatenate %127, %475 in 0 : vector<1x64xf32>, vector<15x64xf32> -> vector<16x64xf32>
    %477 = vector.extract_strided_slice %474 {offsets = [1, 0], sizes = [15, 64], strides = [1, 1]} : vector<16x64xf32> to vector<15x64xf32>
    %478 = tpu.concatenate %477, %127 in 0 : vector<15x64xf32>, vector<1x64xf32> -> vector<16x64xf32>
    %479 = vector.extract_strided_slice %476 {offsets = [0, 0], sizes = [16, 63], strides = [1, 1]} : vector<16x64xf32> to vector<16x63xf32>
    %480 = tpu.concatenate %128, %479 in 1 : vector<16x1xf32>, vector<16x63xf32> -> vector<16x64xf32>
    %481 = vector.extract_strided_slice %476 {offsets = [0, 1], sizes = [16, 63], strides = [1, 1]} : vector<16x64xf32> to vector<16x63xf32>
    %482 = tpu.concatenate %481, %128 in 1 : vector<16x63xf32>, vector<16x1xf32> -> vector<16x64xf32>
    %483 = vector.extract_strided_slice %474 {offsets = [0, 0], sizes = [16, 63], strides = [1, 1]} : vector<16x64xf32> to vector<16x63xf32>
    %484 = tpu.concatenate %128, %483 in 1 : vector<16x1xf32>, vector<16x63xf32> -> vector<16x64xf32>
    %485 = vector.extract_strided_slice %474 {offsets = [0, 1], sizes = [16, 63], strides = [1, 1]} : vector<16x64xf32> to vector<16x63xf32>
    %486 = tpu.concatenate %485, %128 in 1 : vector<16x63xf32>, vector<16x1xf32> -> vector<16x64xf32>
    %487 = vector.extract_strided_slice %478 {offsets = [0, 0], sizes = [16, 63], strides = [1, 1]} : vector<16x64xf32> to vector<16x63xf32>
    %488 = tpu.concatenate %128, %487 in 1 : vector<16x1xf32>, vector<16x63xf32> -> vector<16x64xf32>
    %489 = vector.extract_strided_slice %478 {offsets = [0, 1], sizes = [16, 63], strides = [1, 1]} : vector<16x64xf32> to vector<16x63xf32>
    %490 = tpu.concatenate %489, %128 in 1 : vector<16x63xf32>, vector<16x1xf32> -> vector<16x64xf32>
    %491 = arith.mulf %42, %480 : vector<16x64xf32>
    %492 = arith.mulf %45, %476 : vector<16x64xf32>
    %493 = arith.addf %491, %492 : vector<16x64xf32>
    %494 = arith.mulf %48, %482 : vector<16x64xf32>
    %495 = arith.addf %493, %494 : vector<16x64xf32>
    %496 = arith.mulf %51, %484 : vector<16x64xf32>
    %497 = arith.addf %495, %496 : vector<16x64xf32>
    %498 = arith.mulf %54, %474 : vector<16x64xf32>
    %499 = arith.addf %497, %498 : vector<16x64xf32>
    %500 = arith.mulf %57, %486 : vector<16x64xf32>
    %501 = arith.addf %499, %500 : vector<16x64xf32>
    %502 = arith.mulf %60, %488 : vector<16x64xf32>
    %503 = arith.addf %501, %502 : vector<16x64xf32>
    %504 = arith.mulf %63, %478 : vector<16x64xf32>
    %505 = arith.addf %503, %504 : vector<16x64xf32>
    %506 = arith.mulf %66, %490 : vector<16x64xf32>
    %507 = arith.addf %505, %506 : vector<16x64xf32>
    %cst_30 = arith.constant dense<0.000000e+00> : vector<16x16xf32>
    %508 = tpu.matmul %507, %12, %cst_30 {dimension_numbers = #tpu.dot_dimension_numbers<[1], [0], [0], [1], [0, 0, 1, 1], [], []>} : vector<16x64xf32>, vector<64x16xf32>, vector<16x16xf32> -> vector<16x16xf32>
    %cst_31 = arith.constant dense<0.000000e+00> : vector<8x16xf32>
    %509 = tpu.matmul %8, %508, %cst_31 {dimension_numbers = #tpu.dot_dimension_numbers<[1], [0], [0], [1], [0, 0, 1, 1], [], []>} : vector<8x16xf32>, vector<16x16xf32>, vector<8x16xf32> -> vector<8x16xf32>
    %510 = arith.addf %509, %11 : vector<8x16xf32>
    %511 = arith.subf %510, %0 : vector<8x16xf32>
    %cst_32 = arith.constant dense<0.000000e+00> : vector<8x64xf32>
    %512 = tpu.matmul %511, %10, %cst_32 {dimension_numbers = #tpu.dot_dimension_numbers<[1], [0], [0], [1], [0, 0, 1, 1], [], []>} : vector<8x16xf32>, vector<16x64xf32>, vector<8x64xf32> -> vector<8x64xf32>
    %cst_33 = arith.constant dense<0.000000e+00> : vector<16x64xf32>
    %513 = tpu.matmul %9, %512, %cst_33 {dimension_numbers = #tpu.dot_dimension_numbers<[1], [0], [0], [1], [0, 0, 1, 1], [], []>} : vector<16x8xf32>, vector<8x64xf32>, vector<16x64xf32> -> vector<16x64xf32>
    %514 = vector.extract_strided_slice %513 {offsets = [0, 0], sizes = [15, 64], strides = [1, 1]} : vector<16x64xf32> to vector<15x64xf32>
    %515 = tpu.concatenate %127, %514 in 0 : vector<1x64xf32>, vector<15x64xf32> -> vector<16x64xf32>
    %516 = vector.extract_strided_slice %513 {offsets = [1, 0], sizes = [15, 64], strides = [1, 1]} : vector<16x64xf32> to vector<15x64xf32>
    %517 = tpu.concatenate %516, %127 in 0 : vector<15x64xf32>, vector<1x64xf32> -> vector<16x64xf32>
    %518 = vector.extract_strided_slice %515 {offsets = [0, 0], sizes = [16, 63], strides = [1, 1]} : vector<16x64xf32> to vector<16x63xf32>
    %519 = tpu.concatenate %128, %518 in 1 : vector<16x1xf32>, vector<16x63xf32> -> vector<16x64xf32>
    %520 = vector.extract_strided_slice %515 {offsets = [0, 1], sizes = [16, 63], strides = [1, 1]} : vector<16x64xf32> to vector<16x63xf32>
    %521 = tpu.concatenate %520, %128 in 1 : vector<16x63xf32>, vector<16x1xf32> -> vector<16x64xf32>
    %522 = vector.extract_strided_slice %513 {offsets = [0, 0], sizes = [16, 63], strides = [1, 1]} : vector<16x64xf32> to vector<16x63xf32>
    %523 = tpu.concatenate %128, %522 in 1 : vector<16x1xf32>, vector<16x63xf32> -> vector<16x64xf32>
    %524 = vector.extract_strided_slice %513 {offsets = [0, 1], sizes = [16, 63], strides = [1, 1]} : vector<16x64xf32> to vector<16x63xf32>
    %525 = tpu.concatenate %524, %128 in 1 : vector<16x63xf32>, vector<16x1xf32> -> vector<16x64xf32>
    %526 = vector.extract_strided_slice %517 {offsets = [0, 0], sizes = [16, 63], strides = [1, 1]} : vector<16x64xf32> to vector<16x63xf32>
    %527 = tpu.concatenate %128, %526 in 1 : vector<16x1xf32>, vector<16x63xf32> -> vector<16x64xf32>
    %528 = vector.extract_strided_slice %517 {offsets = [0, 1], sizes = [16, 63], strides = [1, 1]} : vector<16x64xf32> to vector<16x63xf32>
    %529 = tpu.concatenate %528, %128 in 1 : vector<16x63xf32>, vector<16x1xf32> -> vector<16x64xf32>
    %530 = arith.mulf %69, %519 : vector<16x64xf32>
    %531 = arith.addf %124, %530 : vector<16x64xf32>
    %532 = arith.mulf %72, %515 : vector<16x64xf32>
    %533 = arith.addf %531, %532 : vector<16x64xf32>
    %534 = arith.mulf %75, %521 : vector<16x64xf32>
    %535 = arith.addf %533, %534 : vector<16x64xf32>
    %536 = arith.mulf %78, %523 : vector<16x64xf32>
    %537 = arith.addf %535, %536 : vector<16x64xf32>
    %538 = arith.mulf %81, %513 : vector<16x64xf32>
    %539 = arith.addf %537, %538 : vector<16x64xf32>
    %540 = arith.mulf %84, %525 : vector<16x64xf32>
    %541 = arith.addf %539, %540 : vector<16x64xf32>
    %542 = arith.mulf %87, %527 : vector<16x64xf32>
    %543 = arith.addf %541, %542 : vector<16x64xf32>
    %544 = arith.mulf %90, %517 : vector<16x64xf32>
    %545 = arith.addf %543, %544 : vector<16x64xf32>
    %546 = arith.mulf %93, %529 : vector<16x64xf32>
    %547 = arith.addf %545, %546 : vector<16x64xf32>
    %cst_34 = arith.constant 0.000000e+00 : f32
    %548 = vector.broadcast %cst_34 : f32 to vector<16x64xf32>
    %549 = arith.maximumf %547, %548 : vector<16x64xf32>
    %550 = vector.extract_strided_slice %549 {offsets = [0, 0], sizes = [15, 64], strides = [1, 1]} : vector<16x64xf32> to vector<15x64xf32>
    %551 = tpu.concatenate %127, %550 in 0 : vector<1x64xf32>, vector<15x64xf32> -> vector<16x64xf32>
    %552 = vector.extract_strided_slice %549 {offsets = [1, 0], sizes = [15, 64], strides = [1, 1]} : vector<16x64xf32> to vector<15x64xf32>
    %553 = tpu.concatenate %552, %127 in 0 : vector<15x64xf32>, vector<1x64xf32> -> vector<16x64xf32>
    %554 = vector.extract_strided_slice %551 {offsets = [0, 0], sizes = [16, 63], strides = [1, 1]} : vector<16x64xf32> to vector<16x63xf32>
    %555 = tpu.concatenate %128, %554 in 1 : vector<16x1xf32>, vector<16x63xf32> -> vector<16x64xf32>
    %556 = vector.extract_strided_slice %551 {offsets = [0, 1], sizes = [16, 63], strides = [1, 1]} : vector<16x64xf32> to vector<16x63xf32>
    %557 = tpu.concatenate %556, %128 in 1 : vector<16x63xf32>, vector<16x1xf32> -> vector<16x64xf32>
    %558 = vector.extract_strided_slice %549 {offsets = [0, 0], sizes = [16, 63], strides = [1, 1]} : vector<16x64xf32> to vector<16x63xf32>
    %559 = tpu.concatenate %128, %558 in 1 : vector<16x1xf32>, vector<16x63xf32> -> vector<16x64xf32>
    %560 = vector.extract_strided_slice %549 {offsets = [0, 1], sizes = [16, 63], strides = [1, 1]} : vector<16x64xf32> to vector<16x63xf32>
    %561 = tpu.concatenate %560, %128 in 1 : vector<16x63xf32>, vector<16x1xf32> -> vector<16x64xf32>
    %562 = vector.extract_strided_slice %553 {offsets = [0, 0], sizes = [16, 63], strides = [1, 1]} : vector<16x64xf32> to vector<16x63xf32>
    %563 = tpu.concatenate %128, %562 in 1 : vector<16x1xf32>, vector<16x63xf32> -> vector<16x64xf32>
    %564 = vector.extract_strided_slice %553 {offsets = [0, 1], sizes = [16, 63], strides = [1, 1]} : vector<16x64xf32> to vector<16x63xf32>
    %565 = tpu.concatenate %564, %128 in 1 : vector<16x63xf32>, vector<16x1xf32> -> vector<16x64xf32>
    %566 = arith.mulf %96, %555 : vector<16x64xf32>
    %567 = arith.mulf %99, %551 : vector<16x64xf32>
    %568 = arith.addf %566, %567 : vector<16x64xf32>
    %569 = arith.mulf %102, %557 : vector<16x64xf32>
    %570 = arith.addf %568, %569 : vector<16x64xf32>
    %571 = arith.mulf %105, %559 : vector<16x64xf32>
    %572 = arith.addf %570, %571 : vector<16x64xf32>
    %573 = arith.mulf %108, %549 : vector<16x64xf32>
    %574 = arith.addf %572, %573 : vector<16x64xf32>
    %575 = arith.mulf %111, %561 : vector<16x64xf32>
    %576 = arith.addf %574, %575 : vector<16x64xf32>
    %577 = arith.mulf %114, %563 : vector<16x64xf32>
    %578 = arith.addf %576, %577 : vector<16x64xf32>
    %579 = arith.mulf %117, %553 : vector<16x64xf32>
    %580 = arith.addf %578, %579 : vector<16x64xf32>
    %581 = arith.mulf %120, %565 : vector<16x64xf32>
    %582 = arith.addf %580, %581 : vector<16x64xf32>
    %583 = vector.extract_strided_slice %582 {offsets = [0, 0], sizes = [16, 16], strides = [1, 1]} : vector<16x64xf32> to vector<16x16xf32>
    %584 = vector.extract_strided_slice %582 {offsets = [0, 16], sizes = [16, 16], strides = [1, 1]} : vector<16x64xf32> to vector<16x16xf32>
    %585 = arith.addf %583, %584 : vector<16x16xf32>
    %586 = vector.extract_strided_slice %582 {offsets = [0, 32], sizes = [16, 16], strides = [1, 1]} : vector<16x64xf32> to vector<16x16xf32>
    %587 = arith.addf %585, %586 : vector<16x16xf32>
    %588 = vector.extract_strided_slice %582 {offsets = [0, 48], sizes = [16, 16], strides = [1, 1]} : vector<16x64xf32> to vector<16x16xf32>
    %589 = arith.addf %587, %588 : vector<16x16xf32>
    %590 = arith.subf %437, %589 : vector<16x16xf32>
    %591 = arith.subf %590, %126 : vector<16x16xf32>
    %c0_35 = arith.constant 0 : index
    %c0_36 = arith.constant 0 : index
    %592 = vector.load %arg3[%c0_35, %c0_36] : memref<16x16xf32, #tpu.memory_space<vmem>>, vector<16x16xf32>
    tpu.vector_store %arg3[%c0_35, %c0_36], %591 {strides = array<i32>} : memref<16x16xf32, #tpu.memory_space<vmem>>, vector<16x16xf32>,
    return
  }
}

</mosaic_0001>

<bundles_post_ra>
// kernel: tpu_custom_call.1
= control target key start
LH: loop header
LB: loop body
LE: loop exit
PB: predicated region body
PF: predicated region fallthrough
CT: control target
= control target key end

     0   :  { %8 = vsyncpa [#allocation3], 0  ;;  %s2909_s0 = inlined_call_operand.hbm [shape: f32[16,16], index: 0, kind: input, shape index: {}]   ;;  %s2910_s1 = inlined_call_operand.hbm [shape: f32[8,16], index: 1, kind: input, shape index: {}]   ;;  %s2911_s2 = inlined_call_operand.hbm [shape: f32[184,128], index: 2, kind: input, shape index: {}]   ;;  %s2912_s3 = inlined_call_operand.hbm [shape: f32[16,16], index: 3, kind: output, shape index: {}]  }
   0x1   :  { %9 = vsyncpa [#allocation6], 0  ;;  %s29_s14 = sshll.u32 %s2910_s1, 4  ;;  %s30_s14 = int_to_ptr.hbm [resolvable:$true] %s29_s14 }
   0x2   :  { %10 = vsyncpa [#allocation4], 0  ;;  %s1976_s15 = smov [#allocation5]   ;;  %s15_s19 = sshll.u32 %s2909_s0, 4  ;;  %s16_s19 = int_to_ptr.hbm [resolvable:$true] %s15_s19 }
   0x3   :  { %s31_s16 = sshll.u32 %s1976_s15, 4  ;;  %s1977_s20 = smov [#allocation2]   ;;  %s32_s16 = int_to_ptr.vmem [resolvable:$true] %s31_s16 }
   0x4   :  { %34 = dma.hbm_to_vmem [thread:$0]  %s30_s14, 128, %s32_s16, [#allocation6]  }
   0x5   :  { %s17_s21 = sshll.u32 %s1977_s20, 4  ;;  %s1978_s22 = smov 128   ;;  %s18_s21 = int_to_ptr.vmem [resolvable:$true] %s17_s21 }
   0x6   :  { %s1979_s23 = smov 8   ;;  %s39_s25 = sshll.u32 %s2911_s2, 4  ;;  %s40_s25 = int_to_ptr.hbm [resolvable:$true] %s39_s25 }
   0x7   :  { %23 = dma.hbm_to_vmem [thread:$0]  %s16_s19, 256, %s18_s21, [#allocation3], %s1978_s22, %s1978_s22, %s1979_s23  }
   0x8   :  { %s1980_s26 = smov [#allocation7]  }
   0x9   :  { %s41_s27 = sshll.u32 %s1980_s26, 4  ;;  %s42_s27 = int_to_ptr.vmem [resolvable:$true] %s41_s27 }
   0xa   :  { %47 = dma.hbm_to_vmem [thread:$0]  %s40_s25, 2944, %s42_s27, [#allocation6], %s1978_s22, %s1978_s22, %s1979_s23  }
   0xb   :  { %1970 = dma.done.wait [#allocation3], 256  }
   0xc   :  { %1971 = vsyncadd [#allocation3], 4294967040 }
   0xd   :  { %1972 = dma.done.wait [#allocation6], 3072  }
   0xe   :  { %1973 = vsyncadd [#allocation6], 4294964224  ;;  %v2025_v0 = vld [vmem:[#allocation2] sm:$0xff]  ;;  %v2027_v1 = vld [vmem:[#allocation2 + $0x8] sm:$0xff]  ;;  %s1981_s0 = smov 48   ;;  %s1982_s2 = smov 16  }
   0xf   :  { %141 = vrot.lane.b32.xlu1 %v2025_v0, %s1981_s0  ;;  %129 = vrot.lane.b32.xlu0 %v2025_v0, %s1982_s2  ;;  %s1983_s28 = smov 32   ;;  %vm147_vm0 = vcmask 130048   ;;  %vm150_vm1 = vcmask 261120   ;;  %vm153_vm2 = vcmask 392192   ;;  %vm158_vm3 = vcmask 1040384   ;;  %s1984_s29 = smov 127  }
  0x10   :  { %137 = vrot.lane.b32.xlu2 %v2027_v1, %s1983_s28  ;;  %s1985_s30 = smov 1   ;;  %vm165_vm4 = vcmask 1046528   ;;  %v61_v23 = vld [vmem:[#allocation7] sm:$0xff]  ;;  %vm179_vm5 = vcmask 7168   ;;  %vm188_vm6 = vcmask 515072   ;;  %vm360_vm7 = vcmask 523264  }
  0x11   :  { %v2075_v25 = vperm.slane %v61_v23, 0  ;;  %v2077_v26 = vperm.slane %v61_v23, 1  ;;  %v2079_v28 = vld [vmem:[#allocation7 + $0x40] ss:$0 sm:$0xff]  ;;  %v2085_v33 = vperm.slane %v61_v23, 3  ;;  %v2087_v34 = vperm.slane %v61_v23, 2 }
  0x12   :  { %v2091_v40 = vperm.slane %v61_v23, 4  ;;  %v2100_v51 = vperm.slane %v61_v23, 5  ;;  %v2106_v59 = vperm.slane %v61_v23, 6  ;;  %v2109_v61 = vperm.slane %v61_v23, 7  ;;  %s1986_s4 = smov 80   ;;  %s1987_s5 = smov 96  }
  0x13   :  { %vm437_vm8 = vcmask 64512   ;;  %s1988_s6 = smov 112   ;;  %s1989_s7 = smov [#allocation8]  }
  0x14   :  { %s1807_s8 = sshll.u32 %s1989_s7, 4  ;;  %s1809_s11 = sshll.u32 %s2912_s3, 4  ;;  %s1808_s8 = int_to_ptr.vmem [resolvable:$true] %s1807_s8  ;;  %s1810_s11 = int_to_ptr.hbm [resolvable:$true] %s1809_s11 }
  0x17   :  { %131 = vrot.lane.b32.xlu1 %v2027_v1, %s1982_s2  ;;  %135 = vrot.lane.b32.xlu0 %v2025_v0, %s1983_s28 }
  0x18   :  { %143 = vrot.lane.b32.xlu2 %v2027_v1, %s1981_s0 }
  0x6a   :  { %v138_v2 = vpop.permute.xlu2 %137 }
  0x72   :  { %v144_v5 = vpop.permute.xlu2 %143 }
  0x81   :  { %v142_v3 = vpop.permute.xlu1 %141  ;;  %v130_v4 = vpop.permute.xlu0 %129 }
  0x82   :  { %v148_v6 = vsel %vm147_vm0, %v2025_v0, %v130_v4 }
  0x89   :  { %v132_v7 = vpop.permute.xlu1 %131  ;;  %v136_v8 = vpop.permute.xlu0 %135 }
  0x8a   :  { %v149_v9 = vsel %vm147_vm0, %v2027_v1, %v132_v7  ;;  %v151_v10 = vsel %vm150_vm1, %v148_v6, %v136_v8  ;;  %v2115_v6 = vld [vmem:[#allocation7 + $0x8] ss:$0 sm:$0xff] }
  0x8b   :  { %v154_v11 = vsel %vm153_vm2, %v151_v10, %v142_v3  ;;  %v152_v12 = vsel %vm150_vm1, %v149_v9, %v138_v2 }
  0x8c   :  { %v2049_v13 = vsel %vm153_vm2, %v152_v12, %v144_v5  ;;  %199 = vrot.lane.b32.xlu1 %v154_v11, %s1984_s29  ;;  %191 = vrot.lane.b32.xlu2 %v154_v11, %s1985_s30  ;;  %v159_v14 = vrot.slane %v154_v11, 7  ;;  %v166_v18 = vrot.slane %v154_v11, 1  ;;  %v240_v47 = vmul.f32 %v154_v11, %v2091_v40 }
  0x8d   :  { %v160_v16 = vrot.slane %v2049_v13, 7  ;;  %v167_v19 = vrot.slane %v2049_v13, 1  ;;  %v241_v5 = vmul.f32 %v2049_v13, %v2091_v40 }
  0x8e   :  { %v164_v15 = vsel %vm158_vm3, 0.0, %v159_v14 }
  0x8f   :  { %173 = vrot.lane.b32.xlu0 %v164_v15, %s1985_s30  ;;  %v161_v17 = vsel %vm158_vm3, %v159_v14, %v160_v16  ;;  %v168_v20 = vsel %vm165_vm4, %v166_v18, %v167_v19  ;;  %v2067_v21 = vsel %vm165_vm4, %v167_v19, 0.0  ;;  %v228_v31 = vmul.f32 %v164_v15, %v2077_v26 }
  0x90   :  { %v229_v50 = vmul.f32 %v161_v17, %v2077_v26  ;;  %v252_v11 = vmul.f32 %v168_v20, %v2109_v61 }
  0x94   :  { %182 = vrot.lane.b32.xlu1 %v164_v15, %s1984_s29  ;;  %184 = vrot.lane.b32.xlu2 %v161_v17, %s1984_s29 }
  0x97   :  { %175 = vrot.lane.b32.xlu0 %v161_v17, %s1985_s30 }
  0x9c   :  { %193 = vrot.lane.b32.xlu1 %v2049_v13, %s1985_s30  ;;  %216 = vrot.lane.b32.xlu2 %v168_v20, %s1984_s29 }
  0x9f   :  { %208 = vrot.lane.b32.xlu0 %v168_v20, %s1985_s30 }
  0xa4   :  { %210 = vrot.lane.b32.xlu1 %v2067_v21, %s1985_s30  ;;  %218 = vrot.lane.b32.xlu2 %v2067_v21, %s1984_s29 }
  0xa7   :  { %201 = vrot.lane.b32.xlu0 %v2049_v13, %s1984_s29 }
  0xe6   :  { %v192_v22 = vpop.permute.xlu2 %191 }
  0xe7   :  { %v197_v36 = vsel %vm179_vm5, 0.0, %v192_v22 }
  0xe8   :  { %v236_v43 = vmul.f32 %v197_v36, %v2085_v33 }
  0xee   :  { %v185_v37 = vpop.permute.xlu2 %184 }
  0xef   :  { %v190_v48 = vsel %vm188_vm6, %v185_v37, 0.0 }
  0xf0   :  { %v233_v56 = vmul.f32 %v190_v48, %v2087_v34  ;;  %v2168_v48 = vld [vmem:[#allocation7 + $0xa8] sm:$0xff] }
  0xf6   :  { %v217_v62 = vpop.permute.xlu2 %216 }
  0xf7   :  { %v222_v10 = vsel %vm188_vm6, %v217_v62, 0.0 }
  0xf8   :  { %v256_v15 = vmul.f32 %v2115_v6, %v222_v10 }
  0xfe   :  { %v200_v24 = vpop.permute.xlu1 %199  ;;  %v219_v23 = vpop.permute.xlu2 %218 }
  0xff   :  { %v205_v53 = vsel %vm188_vm6, %v200_v24, 0.0 }
 0x100   :  { %v244_v63 = vmul.f32 %v205_v53, %v2100_v51  ;;  %v2180_v53 = vld [vmem:[#allocation7 + $0x88] sm:$0xff] }
 0x101   :  { %v174_v27 = vpop.permute.xlu0 %173 }
 0x102   :  { %v180_v29 = vsel %vm179_vm5, 0.0, %v174_v27 }
 0x103   :  { %v224_v30 = vmul.f32 %v180_v29, %v2075_v25 }
 0x105   :  { %v226_v32 = vadd.f32 %v2079_v28, %v224_v30 }
 0x106   :  { %v183_v35 = vpop.permute.xlu1 %182 }
 0x107   :  { %v189_v38 = vsel %vm188_vm6, %v183_v35, 0.0  ;;  %v230_v39 = vadd.f32 %v228_v31, %v226_v32  ;;  %v223_v31 = vsel %vm188_vm6, %v219_v23, 0.0  ;;  %v253_v32 = vmul.f32 %v2067_v21, %v2109_v61 }
 0x108   :  { %v232_v41 = vmul.f32 %v189_v38, %v2087_v34  ;;  %v257_v37 = vmul.f32 %v2115_v6, %v223_v31 }
 0x109   :  { %v176_v42 = vpop.permute.xlu0 %175 }
 0x10a   :  { %v234_v44 = vadd.f32 %v232_v41, %v230_v39  ;;  %v181_v45 = vsel %vm179_vm5, 0.0, %v176_v42 }
 0x10b   :  { %v225_v46 = vmul.f32 %v181_v45, %v2075_v25 }
 0x10c   :  { %v238_v49 = vadd.f32 %v236_v43, %v234_v44 }
 0x10d   :  { %v227_v52 = vadd.f32 %v2079_v28, %v225_v46 }
 0x10e   :  { %v194_v54 = vpop.permute.xlu1 %193  ;;  %v242_v55 = vadd.f32 %v240_v47, %v238_v49  ;;  %v2165_v47 = vld [vmem:[#allocation7 + $0xb0] sm:$0xff]  ;;  %v2171_v49 = vld [vmem:[#allocation7 + $0xa0] sm:$0xff] }
 0x10f   :  { %v231_v57 = vadd.f32 %v229_v50, %v227_v52  ;;  %v198_v58 = vsel %vm179_vm5, 0.0, %v194_v54  ;;  %375 = vmatpush.msra.mxu0 %v2165_v47  ;;  %v2174_v50 = vld [vmem:[#allocation7 + $0x98] sm:$0xff]  ;;  %v2177_v52 = vld [vmem:[#allocation7 + $0x90] sm:$0xff]  ;;  %v2183_v54 = vld [vmem:[#allocation7 + $0x80] sm:$0xff] }
 0x110   :  { %v237_v60 = vmul.f32 %v198_v58, %v2085_v33  ;;  %v246_v8 = vadd.f32 %v244_v63, %v242_v55  ;;  %v2186_v55 = vld [vmem:[#allocation7 + $0x78] sm:$0xff] }
 0x111   :  { %v235_v2 = vadd.f32 %v233_v56, %v231_v57  ;;  %v209_v3 = vpop.permute.xlu0 %208  ;;  %376 = vmatpush.msra.mxu0 %v2168_v48  ;;  %v63_v57 = vld [vmem:[#allocation7 + $0x10] sm:$0xff] }
 0x112   :  { %v214_v4 = vsel %vm179_vm5, 0.0, %v209_v3  ;;  %v2189_v58 = vperm.slane %v63_v57, 0  ;;  %v2191_v63 = vperm.slane %v63_v57, 1 }
 0x113   :  { %v239_v7 = vadd.f32 %v237_v60, %v235_v2  ;;  %v248_v9 = vmul.f32 %v214_v4, %v2106_v59  ;;  %377 = vmatpush.msra.mxu0 %v2171_v49 }
 0x115   :  { %v250_v12 = vadd.f32 %v248_v9, %v246_v8  ;;  %v243_v14 = vadd.f32 %v241_v5, %v239_v7  ;;  %378 = vmatpush.msra.mxu0 %v2174_v50  ;;  %v2196_v5 = vperm.slane %v63_v57, 3  ;;  %v2198_v7 = vperm.slane %v63_v57, 2 }
 0x116   :  { %v211_v17 = vpop.permute.xlu1 %210 }
 0x117   :  { %v254_v16 = vadd.f32 %v252_v11, %v250_v12  ;;  %v215_v13 = vsel %vm179_vm5, 0.0, %v211_v17  ;;  %379 = vmatpush.msra.mxu0 %v2177_v52 }
 0x118   :  { %v249_v29 = vmul.f32 %v215_v13, %v2106_v59 }
 0x119   :  { %v258_v18 = vadd.f32 %v256_v15, %v254_v16  ;;  %v202_v19 = vpop.permute.xlu0 %201  ;;  %380 = vmatpush.msra.mxu0 %v2180_v53 }
 0x11a   :  { %v206_v22 = vsel %vm188_vm6, %v202_v19, 0.0 }
 0x11b   :  { %v2123_v24 = vmax.f32 %v258_v18, 0.0  ;;  %v245_v27 = vmul.f32 %v206_v22, %v2100_v51  ;;  %381 = vmatpush.msra.mxu0 %v2183_v54 }
 0x11d   :  { %v247_v20 = vadd.f32 %v245_v27, %v243_v14  ;;  %301 = vrot.lane.b32.xlu1 %v2123_v24, %s1984_s29  ;;  %293 = vrot.lane.b32.xlu2 %v2123_v24, %s1985_s30  ;;  %v264_v30 = vrot.slane %v2123_v24, 7  ;;  %v270_v43 = vrot.slane %v2123_v24, 1  ;;  %v2203_v14 = vperm.slane %v63_v57, 4 }
 0x11e   :  { %382 = vmatpush.msra.mxu0 %v2186_v55 }
 0x11f   :  { %v251_v35 = vadd.f32 %v249_v29, %v247_v20  ;;  %v269_v36 = vsel %vm158_vm3, 0.0, %v264_v30  ;;  %v340_v23 = vmul.f32 %v2123_v24, %v2203_v14  ;;  %v2220_v24 = vperm.slane %v63_v57, 7 }
 0x120   :  { %277 = vrot.lane.b32.xlu0 %v269_v36, %s1985_s30  ;;  %v328_v4 = vmul.f32 %v269_v36, %v2191_v63 }
 0x121   :  { %v255_v38 = vadd.f32 %v253_v32, %v251_v35  ;;  %v2213_v32 = vperm.slane %v63_v57, 5 }
 0x123   :  { %v259_v39 = vadd.f32 %v257_v37, %v255_v38 }
 0x125   :  { %v2138_v41 = vmax.f32 %v259_v39, 0.0  ;;  %285 = vrot.lane.b32.xlu1 %v269_v36, %s1984_s29 }
 0x127   :  { %v265_v42 = vrot.slane %v2138_v41, 7  ;;  %v271_v44 = vrot.slane %v2138_v41, 1 }
 0x129   :  { %v266_v21 = vsel %vm158_vm3, %v264_v30, %v265_v42  ;;  %v2146_v45 = vsel %vm165_vm4, %v270_v43, %v271_v44  ;;  %v2157_v46 = vsel %vm165_vm4, %v271_v44, 0.0  ;;  %v2218_v42 = vperm.slane %v63_v57, 6 }
 0x12a   :  { %287 = vrot.lane.b32.xlu2 %v266_v21, %s1984_s29  ;;  %279 = vrot.lane.b32.xlu0 %v266_v21, %s1985_s30  ;;  %v329_v27 = vmul.f32 %v266_v21, %v2191_v63  ;;  %v352_v57 = vmul.f32 %v2146_v45, %v2220_v24 }
 0x12d   :  { %295 = vrot.lane.b32.xlu1 %v2138_v41, %s1985_s30 }
 0x132   :  { %318 = vrot.lane.b32.xlu2 %v2146_v45, %s1984_s29  ;;  %310 = vrot.lane.b32.xlu0 %v2146_v45, %s1985_s30 }
 0x135   :  { %312 = vrot.lane.b32.xlu1 %v2157_v46, %s1985_s30 }
 0x13a   :  { %320 = vrot.lane.b32.xlu2 %v2157_v46, %s1984_s29  ;;  %303 = vrot.lane.b32.xlu0 %v2138_v41, %s1984_s29 }
 0x177   :  { %v294_v60 = vpop.permute.xlu2 %293 }
 0x178   :  { %v299_v9 = vsel %vm179_vm5, 0.0, %v294_v60 }
 0x179   :  { %v336_v16 = vmul.f32 %v299_v9, %v2196_v5 }
 0x184   :  { %v288_v15 = vpop.permute.xlu2 %287 }
 0x185   :  { %v292_v19 = vsel %vm188_vm6, %v288_v15, 0.0 }
 0x186   :  { %v333_v31 = vmul.f32 %v292_v19, %v2198_v7 }
 0x18c   :  { %v319_v43 = vpop.permute.xlu2 %318 }
 0x18d   :  { %v324_v9 = vsel %vm188_vm6, %v319_v43, 0.0  ;;  %v2249_v43 = vld [vmem:[#allocation5] sm:$0xff] }
 0x18f   :  { %v302_v56 = vpop.permute.xlu1 %301 }
 0x190   :  { %v307_v37 = vsel %vm188_vm6, %v302_v56, 0.0 }
 0x191   :  { %v344_v44 = vmul.f32 %v307_v37, %v2213_v32  ;;  %v2243_v37 = vld [vmem:[#allocation7 + $0x48] sm:$0xff] }
 0x192   :  { %v278_v62 = vpop.permute.xlu0 %277 }
 0x193   :  { %v283_v2 = vsel %vm179_vm5, 0.0, %v278_v62  ;;  %v341_v62 = vmul.f32 %v2138_v41, %v2203_v14 }
 0x194   :  { %v326_v3 = vmul.f32 %v283_v2, %v2189_v58  ;;  %v321_v19 = vpop.permute.xlu2 %320 }
 0x196   :  { %v330_v11 = vadd.f32 %v328_v4, %v326_v3  ;;  %v2226_v3 = vld [vmem:[#allocation7 + $0x18] ss:$0 sm:$0xff] }
 0x197   :  { %v286_v8 = vpop.permute.xlu1 %285 }
 0x198   :  { %v291_v10 = vsel %vm188_vm6, %v286_v8, 0.0 }
 0x199   :  { %v332_v12 = vmul.f32 %v291_v10, %v2198_v7 }
 0x19b   :  { %v334_v17 = vadd.f32 %v332_v12, %v330_v11  ;;  %v356_v11 = vmul.f32 %v2226_v3, %v324_v9  ;;  %v65_v9 = vld [vmem:[#allocation7 + $0x20] sm:$0xff] }
 0x19c   :  { %v280_v18 = vpop.permute.xlu0 %279 }
 0x19d   :  { %v338_v13 = vadd.f32 %v336_v16, %v334_v17  ;;  %v284_v22 = vsel %vm179_vm5, 0.0, %v280_v18 }
 0x19e   :  { %v327_v29 = vmul.f32 %v284_v22, %v2189_v58 }
 0x19f   :  { %v296_v20 = vpop.permute.xlu1 %295  ;;  %v342_v30 = vadd.f32 %v340_v23, %v338_v13  ;;  %v325_v23 = vsel %vm188_vm6, %v321_v19, 0.0 }
 0x1a0   :  { %v331_v35 = vadd.f32 %v329_v27, %v327_v29  ;;  %v300_v36 = vsel %vm179_vm5, 0.0, %v296_v20  ;;  %v353_v27 = vmul.f32 %v2157_v46, %v2220_v24  ;;  %v357_v20 = vmul.f32 %v2226_v3, %v325_v23  ;;  %v2247_v46 = vld [vmem:[#allocation7 + $0x70] sm:$0xff] }
 0x1a1   :  { %v337_v38 = vmul.f32 %v300_v36, %v2196_v5  ;;  %v346_v56 = vadd.f32 %v344_v44, %v342_v30 }
 0x1a2   :  { %v335_v39 = vadd.f32 %v333_v31, %v331_v35 }
 0x1a4   :  { %v339_v21 = vadd.f32 %v337_v38, %v335_v39  ;;  %v311_v60 = vpop.permute.xlu0 %310  ;;  %v76_v38 = vld [vmem:[#allocation7 + $0x68] sm:$0xff]  ;;  %v75_v39 = vld [vmem:[#allocation7 + $0x60] sm:$0xff] }
 0x1a5   :  { %v316_v2 = vsel %vm179_vm5, 0.0, %v311_v60  ;;  %431 = vmatpush.msra.mxu2 %v76_v38 }
 0x1a6   :  { %v348_v4 = vmul.f32 %v316_v2, %v2218_v42  ;;  %v343_v8 = vadd.f32 %v341_v62, %v339_v21  ;;  %v2262_v62 = vld [vmem:[#allocation7 + $0x50] sm:$0xff] }
 0x1a7   :  { %v313_v12 = vpop.permute.xlu1 %312  ;;  %432 = vmatpush.msra.mxu2 %v75_v39 }
 0x1a8   :  { %v350_v10 = vadd.f32 %v348_v4, %v346_v56  ;;  %v317_v17 = vsel %vm179_vm5, 0.0, %v313_v12  ;;  %v2268_v56 = vld [vmem:[#allocation7 + $0x58] sm:$0xff]  ;;  %v2306_v12 = vperm.slane %v65_v9, 1 }
 0x1a9   :  { %v349_v22 = vmul.f32 %v317_v17, %v2218_v42  ;;  %990 = vmatpush.msrb.mxu2 %v76_v38 }
 0x1aa   :  { %v354_v15 = vadd.f32 %v352_v57, %v350_v10 }
 0x1ab   :  { %991 = vmatpush.msrb.mxu2 %v75_v39 }
 0x1ac   :  { %v304_v41 = vpop.permute.xlu0 %303  ;;  %v358_v16 = vadd.f32 %v356_v11, %v354_v15  ;;  %v2304_v11 = vperm.slane %v65_v9, 0  ;;  %v2308_v15 = vld [vmem:[#allocation7 + $0x41] ss:$0 sm:$0xff] }
 0x1ad   :  { %v308_v18 = vsel %vm188_vm6, %v304_v41, 0.0 }
 0x1ae   :  { %v345_v13 = vmul.f32 %v308_v18, %v2213_v32  ;;  %1823 = vmatmul.msk.f32.vlgmr.msra.gmra.mxu0 %vm360_vm7, %v358_v16 }
 0x1b0   :  { %v347_v45 = vadd.f32 %v345_v13, %v343_v8  ;;  %v2314_v13 = vperm.slane %v65_v9, 3 }
 0x1b2   :  { %v351_v29 = vadd.f32 %v349_v22, %v347_v45  ;;  %v2316_v22 = vperm.slane %v65_v9, 2 }
 0x1b4   :  { %v355_v30 = vadd.f32 %v353_v27, %v351_v29 }
 0x1b6   :  { %v359_v31 = vadd.f32 %v357_v20, %v355_v30  ;;  %v2320_v30 = vperm.slane %v65_v9, 4 }
 0x1b8   :  { %1824 = vmatmul.msk.f32.gmra.mxu0 %vm360_vm7, %v359_v31 }
 0x22b   :  { %v384_v35 = vpop.f32.mrf.mxu0 }
 0x235   :  { %v387_v36 = vpop.f32.mrf.mxu0 }
 0x236   :  { %407 = vmatpush.msrb.mxu0 %v387_v36 }
 0x238   :  { %408 = vmatpush.msrb.mxu0 %v384_v35 }
 0x239   :  { %1825 = vmatmul.msk.f32.vlgmr.msrb.gmra.mxu0 %vm147_vm0, %v2243_v37 }
 0x2b6   :  { %v410_v44 = vpop.f32.mrf.mxu0 }
 0x2b7   :  { %v411_v21 = vadd.f32 %v410_v44, %v2247_v46 }
 0x2b9   :  { %v413_v60 = vsub.f32 %v411_v21, %v2249_v43 }
 0x2bb   :  { %1826 = vmatmul.msk.f32.vlgmr.msra.gmra.mxu2 %vm147_vm0, %v413_v60 }
 0x2bc   :  { %1489 = vmatpush.msra.mxu2 %v2165_v47 }
 0x2be   :  { %1490 = vmatpush.msra.mxu2 %v2168_v48 }
 0x2c0   :  { %1491 = vmatpush.msra.mxu2 %v2171_v49 }
 0x2c2   :  { %1492 = vmatpush.msra.mxu2 %v2174_v50 }
 0x2c4   :  { %1493 = vmatpush.msra.mxu2 %v2177_v52 }
 0x2c6   :  { %1494 = vmatpush.msra.mxu2 %v2180_v53 }
 0x2c8   :  { %1495 = vmatpush.msra.mxu2 %v2183_v54 }
 0x2ca   :  { %1496 = vmatpush.msra.mxu2 %v2186_v55 }
 0x33e   :  { %v434_v2 = vpop.f32.mrf.mxu2 }
 0x33f   :  { %459 = vmatpush.msra.mxu3 %v434_v2 }
 0x340   :  { %1827 = vmatmul.msk.f32.vlgmr.msra.gmra.mxu3 %vm437_vm8, %v2262_v62 }
 0x341   :  { %937 = vmatpush.msrb.mxu3 %v2165_v47 }
 0x343   :  { %938 = vmatpush.msrb.mxu3 %v2168_v48 }
 0x345   :  { %939 = vmatpush.msrb.mxu3 %v2171_v49 }
 0x347   :  { %940 = vmatpush.msrb.mxu3 %v2174_v50 }
 0x348   :  { %1828 = vmatmul.msk.f32.gmra.mxu3 %vm437_vm8, %v2268_v56 }
 0x349   :  { %941 = vmatpush.msrb.mxu3 %v2177_v52 }
 0x34b   :  { %942 = vmatpush.msrb.mxu3 %v2180_v53 }
 0x34d   :  { %943 = vmatpush.msrb.mxu3 %v2183_v54 }
 0x34f   :  { %944 = vmatpush.msrb.mxu3 %v2186_v55 }
 0x351   :  { %1542 = vmatpush.msra.mxu3 %v76_v38 }
 0x353   :  { %1543 = vmatpush.msra.mxu3 %v75_v39 }
 0x3c3   :  { %v461_v47 = vpop.f32.mrf.mxu3 }
 0x3c4   :  { %506 = vrot.lane.b32.xlu1 %v461_v47, %s1984_s29  ;;  %498 = vrot.lane.b32.xlu2 %v461_v47, %s1985_s30  ;;  %v469_v48 = vrot.slane %v461_v47, 7  ;;  %v475_v55 = vrot.slane %v461_v47, 1  ;;  %v547_v21 = vmul.f32 %v461_v47, %v2320_v30 }
 0x3c6   :  { %v474_v49 = vsel %vm158_vm3, 0.0, %v469_v48 }
 0x3c7   :  { %482 = vrot.lane.b32.xlu0 %v474_v49, %s1985_s30  ;;  %v535_v18 = vmul.f32 %v474_v49, %v2306_v12 }
 0x3cb   :  { %v2282_v50 = vpop.f32.mrf.mxu3 }
 0x3cc   :  { %490 = vrot.lane.b32.xlu1 %v474_v49, %s1984_s29  ;;  %v470_v52 = vrot.slane %v2282_v50, 7  ;;  %v476_v54 = vrot.slane %v2282_v50, 1 }
 0x3ce   :  { %v471_v53 = vsel %vm158_vm3, %v469_v48, %v470_v52  ;;  %v477_v4 = vsel %vm165_vm4, %v475_v55, %v476_v54  ;;  %v2296_v8 = vsel %vm165_vm4, %v476_v54, 0.0  ;;  %v2328_v48 = vperm.slane %v65_v9, 5 }
 0x3cf   :  { %492 = vrot.lane.b32.xlu2 %v471_v53, %s1984_s29  ;;  %484 = vrot.lane.b32.xlu0 %v471_v53, %s1985_s30  ;;  %v536_v2 = vmul.f32 %v471_v53, %v2306_v12 }
 0x3d4   :  { %500 = vrot.lane.b32.xlu1 %v2282_v50, %s1985_s30 }
 0x3d7   :  { %523 = vrot.lane.b32.xlu2 %v477_v4, %s1984_s29  ;;  %515 = vrot.lane.b32.xlu0 %v477_v4, %s1985_s30 }
 0x3dc   :  { %517 = vrot.lane.b32.xlu1 %v2296_v8, %s1985_s30 }
 0x3df   :  { %525 = vrot.lane.b32.xlu2 %v2296_v8, %s1984_s29  ;;  %508 = vrot.lane.b32.xlu0 %v2282_v50, %s1984_s29 }
 0x41e   :  { %v499_v10 = vpop.permute.xlu2 %498 }
 0x41f   :  { %v504_v23 = vsel %vm179_vm5, 0.0, %v499_v10 }
 0x420   :  { %v543_v36 = vmul.f32 %v504_v23, %v2314_v13 }
 0x429   :  { %v493_v27 = vpop.permute.xlu2 %492 }
 0x42a   :  { %v497_v52 = vsel %vm188_vm6, %v493_v27, 0.0  ;;  %v2341_v27 = vld [vmem:[#allocation7 + $0x28] ss:$0 sm:$0xff] }
 0x42b   :  { %v540_v47 = vmul.f32 %v497_v52, %v2316_v22  ;;  %2923 = vst [vmem:[#allocation12_spill] sm:$0xff] %v2341_v27 }
 0x431   :  { %v524_v53 = vpop.permute.xlu2 %523 }
 0x436   :  { %v507_v57 = vpop.permute.xlu1 %506 }
 0x437   :  { %v512_v54 = vsel %vm188_vm6, %v507_v57, 0.0 }
 0x439   :  { %v483_v41 = vpop.permute.xlu0 %482 }
 0x43a   :  { %v488_v16 = vsel %vm179_vm5, 0.0, %v483_v41 }
 0x43b   :  { %v531_v17 = vmul.f32 %v488_v16, %v2304_v11  ;;  %v2333_v16 = vperm.slane %v65_v9, 6 }
 0x43d   :  { %v533_v19 = vadd.f32 %v2308_v15, %v531_v17 }
 0x43e   :  { %v491_v45 = vpop.permute.xlu1 %490 }
 0x43f   :  { %v496_v29 = vsel %vm188_vm6, %v491_v45, 0.0  ;;  %v537_v20 = vadd.f32 %v535_v18, %v533_v19  ;;  %v2336_v18 = vperm.slane %v65_v9, 7  ;;  %v551_v19 = vmul.f32 %v512_v54, %v2328_v48 }
 0x440   :  { %v539_v31 = vmul.f32 %v496_v29, %v2316_v22 }
 0x441   :  { %v485_v35 = vpop.permute.xlu0 %484  ;;  %v559_v9 = vmul.f32 %v477_v4, %v2336_v18 }
 0x442   :  { %v541_v38 = vadd.f32 %v539_v31, %v537_v20  ;;  %v489_v39 = vsel %vm179_vm5, 0.0, %v485_v35  ;;  %v529_v35 = vsel %vm188_vm6, %v524_v53, 0.0 }
 0x443   :  { %v532_v44 = vmul.f32 %v489_v39, %v2304_v11 }
 0x444   :  { %v545_v60 = vadd.f32 %v543_v36, %v541_v38  ;;  %v563_v38 = vmul.f32 %v2341_v27, %v529_v35 }
 0x445   :  { %v534_v49 = vadd.f32 %v2308_v15, %v532_v44 }
 0x446   :  { %v501_v55 = vpop.permute.xlu1 %500  ;;  %v549_v10 = vadd.f32 %v547_v21, %v545_v60 }
 0x447   :  { %v538_v41 = vadd.f32 %v536_v2, %v534_v49  ;;  %v505_v17 = vsel %vm179_vm5, 0.0, %v501_v55  ;;  %v548_v2 = vmul.f32 %v2282_v50, %v2320_v30  ;;  %v526_v55 = vpop.permute.xlu2 %525 }
 0x448   :  { %v544_v29 = vmul.f32 %v505_v17, %v2314_v13  ;;  %v553_v20 = vadd.f32 %v551_v19, %v549_v10  ;;  %v530_v50 = vsel %vm188_vm6, %v526_v55, 0.0  ;;  %v560_v19 = vmul.f32 %v2296_v8, %v2336_v18 }
 0x449   :  { %v516_v45 = vpop.permute.xlu0 %515  ;;  %v542_v57 = vadd.f32 %v540_v47, %v538_v41 }
 0x44a   :  { %v521_v23 = vsel %vm179_vm5, 0.0, %v516_v45 }
 0x44b   :  { %v555_v31 = vmul.f32 %v521_v23, %v2333_v16  ;;  %v546_v39 = vadd.f32 %v544_v29, %v542_v57  ;;  %v564_v57 = vmul.f32 %v2341_v27, %v530_v50 }
 0x44d   :  { %v557_v36 = vadd.f32 %v555_v31, %v553_v20  ;;  %v550_v41 = vadd.f32 %v548_v2, %v546_v39 }
 0x44e   :  { %v518_v21 = vpop.permute.xlu1 %517 }
 0x44f   :  { %v561_v44 = vadd.f32 %v559_v9, %v557_v36  ;;  %v522_v52 = vsel %vm179_vm5, 0.0, %v518_v21  ;;  %v67_v21 = vld [vmem:[#allocation7 + $0x30] sm:$0xff] }
 0x450   :  { %v556_v17 = vmul.f32 %v522_v52, %v2333_v16  ;;  %v2380_v52 = vperm.slane %v67_v21, 1  ;;  %v2401_v27 = vperm.slane %v67_v21, 5 }
 0x451   :  { %v565_v60 = vadd.f32 %v563_v38, %v561_v44  ;;  %v509_v49 = vpop.permute.xlu0 %508 }
 0x452   :  { %v513_v54 = vsel %vm188_vm6, %v509_v49, 0.0 }
 0x453   :  { %v567_v10 = vmax.f32 %v565_v60, 0.0  ;;  %v552_v4 = vmul.f32 %v513_v54, %v2328_v48  ;;  %v2378_v60 = vperm.slane %v67_v21, 0 }
 0x455   :  { %v554_v47 = vadd.f32 %v552_v4, %v550_v41  ;;  %608 = vrot.lane.b32.xlu1 %v567_v10, %s1984_s29  ;;  %600 = vrot.lane.b32.xlu2 %v567_v10, %s1985_s30  ;;  %v571_v53 = vrot.slane %v567_v10, 7  ;;  %v577_v9 = vrot.slane %v567_v10, 1  ;;  %v2385_v4 = vperm.slane %v67_v21, 3 }
 0x457   :  { %v558_v45 = vadd.f32 %v556_v17, %v554_v47  ;;  %v576_v23 = vsel %vm158_vm3, 0.0, %v571_v53  ;;  %2924 = vst [vmem:[#allocation13_spill] sm:$0xff] %v2385_v4  ;;  %v2387_v17 = vperm.slane %v67_v21, 2 }
 0x458   :  { %584 = vrot.lane.b32.xlu0 %v576_v23, %s1985_s30  ;;  %v635_v41 = vmul.f32 %v576_v23, %v2380_v52 }
 0x459   :  { %v562_v29 = vadd.f32 %v560_v19, %v558_v45 }
 0x45b   :  { %v566_v20 = vadd.f32 %v564_v57, %v562_v29  ;;  %v2392_v57 = vperm.slane %v67_v21, 4 }
 0x45d   :  { %v568_v31 = vmax.f32 %v566_v20, 0.0  ;;  %592 = vrot.lane.b32.xlu1 %v576_v23, %s1984_s29  ;;  %2925 = vst [vmem:[#allocation14_spill] sm:$0xff] %v2392_v57 }
 0x45f   :  { %v572_v35 = vrot.slane %v568_v31, 7  ;;  %v578_v36 = vrot.slane %v568_v31, 1 }
 0x461   :  { %v573_v38 = vsel %vm158_vm3, %v571_v53, %v572_v35  ;;  %v579_v39 = vsel %vm165_vm4, %v577_v9, %v578_v36  ;;  %v2371_v8 = vsel %vm165_vm4, %v578_v36, 0.0 }
 0x462   :  { %594 = vrot.lane.b32.xlu2 %v573_v38, %s1984_s29  ;;  %586 = vrot.lane.b32.xlu0 %v573_v38, %s1985_s30 }
 0x465   :  { %602 = vrot.lane.b32.xlu1 %v568_v31, %s1985_s30 }
 0x46a   :  { %625 = vrot.lane.b32.xlu2 %v579_v39, %s1984_s29  ;;  %617 = vrot.lane.b32.xlu0 %v579_v39, %s1985_s30 }
 0x46d   :  { %619 = vrot.lane.b32.xlu1 %v2371_v8, %s1985_s30 }
 0x472   :  { %627 = vrot.lane.b32.xlu2 %v2371_v8, %s1984_s29  ;;  %610 = vrot.lane.b32.xlu0 %v568_v31, %s1984_s29 }
 0x4af   :  { %v601_v2 = vpop.permute.xlu2 %600 }
 0x4b0   :  { %v606_v53 = vsel %vm179_vm5, 0.0, %v601_v2  ;;  %v636_v2 = vmul.f32 %v573_v38, %v2380_v52 }
 0x4b1   :  { %v643_v20 = vmul.f32 %v606_v53, %v2385_v4 }
 0x4bc   :  { %v595_v29 = vpop.permute.xlu2 %594 }
 0x4bd   :  { %v599_v23 = vsel %vm188_vm6, %v595_v29, 0.0 }
 0x4c4   :  { %v626_v38 = vpop.permute.xlu2 %625 }
 0x4c7   :  { %v609_v44 = vpop.permute.xlu1 %608 }
 0x4ca   :  { %v585_v49 = vpop.permute.xlu0 %584 }
 0x4cb   :  { %v590_v54 = vsel %vm179_vm5, 0.0, %v585_v49 }
 0x4cc   :  { %v633_v55 = vmul.f32 %v590_v54, %v2378_v60  ;;  %v647_v54 = vmul.f32 %v567_v10, %v2392_v57  ;;  %v2408_v10 = vperm.slane %v67_v21, 7 }
 0x4ce   :  { %v637_v19 = vadd.f32 %v635_v41, %v633_v55 }
 0x4cf   :  { %v593_v47 = vpop.permute.xlu1 %592 }
 0x4d0   :  { %v598_v50 = vsel %vm188_vm6, %v593_v47, 0.0 }
 0x4d1   :  { %v639_v45 = vmul.f32 %v598_v50, %v2387_v17  ;;  %v640_v50 = vmul.f32 %v599_v23, %v2387_v17  ;;  %v648_v23 = vmul.f32 %v568_v31, %v2392_v57  ;;  %v628_v57 = vpop.permute.xlu2 %627 }
 0x4d3   :  { %v641_v35 = vadd.f32 %v639_v45, %v637_v19  ;;  %v614_v45 = vsel %vm188_vm6, %v609_v44, 0.0 }
 0x4d4   :  { %v587_v9 = vpop.permute.xlu0 %586 }
 0x4d5   :  { %v645_v36 = vadd.f32 %v643_v20, %v641_v35  ;;  %v591_v49 = vsel %vm179_vm5, 0.0, %v587_v9  ;;  %v2406_v35 = vperm.slane %v67_v21, 6  ;;  %v651_v9 = vmul.f32 %v614_v45, %v2401_v27 }
 0x4d6   :  { %v634_v55 = vmul.f32 %v591_v49, %v2378_v60  ;;  %v659_v21 = vmul.f32 %v579_v39, %v2408_v10 }
 0x4d7   :  { %v603_v41 = vpop.permute.xlu1 %602  ;;  %v649_v47 = vadd.f32 %v647_v54, %v645_v36 }
 0x4d8   :  { %v638_v53 = vadd.f32 %v636_v2, %v634_v55  ;;  %v607_v19 = vsel %vm179_vm5, 0.0, %v603_v41  ;;  %v2413_v2 = vld [vmem:[#allocation7 + $0x38] ss:$0 sm:$0xff] }
 0x4d9   :  { %v644_v29 = vmul.f32 %v607_v19, %v2385_v4  ;;  %v653_v55 = vadd.f32 %v651_v9, %v649_v47  ;;  %v632_v9 = vsel %vm188_vm6, %v628_v57, 0.0  ;;  %v2433_v57 = vld [vmem:[#allocation7 + $0x42] ss:$0 sm:$0xff] }
 0x4da   :  { %v642_v20 = vadd.f32 %v640_v50, %v638_v53  ;;  %v631_v50 = vsel %vm188_vm6, %v626_v38, 0.0  ;;  %2926 = vst [vmem:[#allocation15_spill] sm:$0xff] %v2433_v57 }
 0x4db   :  { %v663_v19 = vmul.f32 %v2413_v2, %v631_v50 }
 0x4dc   :  { %v646_v36 = vadd.f32 %v644_v29, %v642_v20  ;;  %v618_v49 = vpop.permute.xlu0 %617 }
 0x4dd   :  { %v623_v54 = vsel %vm179_vm5, 0.0, %v618_v49 }
 0x4de   :  { %v655_v44 = vmul.f32 %v623_v54, %v2406_v35  ;;  %v650_v41 = vadd.f32 %v648_v23, %v646_v36  ;;  %v660_v36 = vmul.f32 %v2371_v8, %v2408_v10  ;;  %v664_v54 = vmul.f32 %v2413_v2, %v632_v9 }
 0x4df   :  { %v620_v29 = vpop.permute.xlu1 %619 }
 0x4e0   :  { %v657_v53 = vadd.f32 %v655_v44, %v653_v55  ;;  %v624_v31 = vsel %vm179_vm5, 0.0, %v620_v29 }
 0x4e1   :  { %v656_v39 = vmul.f32 %v624_v31, %v2406_v35 }
 0x4e2   :  { %v661_v45 = vadd.f32 %v659_v21, %v657_v53 }
 0x4e4   :  { %v611_v20 = vpop.permute.xlu0 %610  ;;  %v665_v4 = vadd.f32 %v663_v19, %v661_v45 }
 0x4e5   :  { %v615_v49 = vsel %vm188_vm6, %v611_v20, 0.0 }
 0x4e6   :  { %v652_v47 = vmul.f32 %v615_v49, %v2401_v27  ;;  %685 = vrot.lane.b32.xlu2 %v665_v4, %s1986_s4  ;;  %677 = vrot.lane.b32.xlu1 %v665_v4, %s1987_s5 }
 0x4e7   :  { %669 = vrot.lane.b32.xlu0 %v665_v4, %s1988_s6 }
 0x4e8   :  { %v654_v38 = vadd.f32 %v652_v47, %v650_v41 }
 0x4ea   :  { %v658_v23 = vadd.f32 %v656_v39, %v654_v38 }
 0x4ec   :  { %v662_v55 = vadd.f32 %v660_v36, %v658_v23 }
 0x4ee   :  { %v666_v44 = vadd.f32 %v664_v54, %v662_v55 }
 0x4f0   :  { %687 = vrot.lane.b32.xlu2 %v666_v44, %s1986_s4  ;;  %679 = vrot.lane.b32.xlu1 %v666_v44, %s1987_s5 }
 0x4f1   :  { %671 = vrot.lane.b32.xlu0 %v666_v44, %s1988_s6 }
 0x540   :  { %v686_v19 = vpop.permute.xlu2 %685 }
 0x54a   :  { %v688_v47 = vpop.permute.xlu2 %687 }
 0x558   :  { %v678_v53 = vpop.permute.xlu1 %677 }
 0x559   :  { %v670_v50 = vpop.permute.xlu0 %669 }
 0x55a   :  { %v675_v21 = vadd.f32 %v670_v50, %v665_v4 }
 0x55c   :  { %v683_v41 = vadd.f32 %v678_v53, %v675_v21 }
 0x55e   :  { %v691_v45 = vadd.f32 %v686_v19, %v683_v41 }
 0x560   :  { %v693_v8 = vsub.f32 %v2025_v0, %v691_v45 }
 0x562   :  { %v2437_v29 = vsub.f32 %v693_v8, %v2433_v57  ;;  %v680_v4 = vpop.permute.xlu1 %679 }
 0x563   :  { %v672_v20 = vpop.permute.xlu0 %671 }
 0x564   :  { %2927 = vst [vmem:[#allocation16_spill] sm:$0xff] %v2437_v29  ;;  %v676_v31 = vadd.f32 %v672_v20, %v666_v44  ;;  %711 = vrot.lane.b32.xlu2 %v2437_v29, %s1981_s0  ;;  %705 = vrot.lane.b32.xlu1 %v2437_v29, %s1983_s28 }
 0x565   :  { %699 = vrot.lane.b32.xlu0 %v2437_v29, %s1982_s2 }
 0x566   :  { %v684_v49 = vadd.f32 %v680_v4, %v676_v31 }
 0x568   :  { %v692_v39 = vadd.f32 %v688_v47, %v684_v49 }
 0x56a   :  { %v694_v0 = vsub.f32 %v2027_v1, %v692_v39 }
 0x56c   :  { %v2447_v38 = vsub.f32 %v694_v0, %v2433_v57 }
 0x56e   :  { %2928 = vst [vmem:[#allocation17_spill] sm:$0xff] %v2447_v38  ;;  %713 = vrot.lane.b32.xlu2 %v2447_v38, %s1981_s0  ;;  %707 = vrot.lane.b32.xlu1 %v2447_v38, %s1983_s28 }
 0x56f   :  { %701 = vrot.lane.b32.xlu0 %v2447_v38, %s1982_s2 }
 0x5be   :  { %v712_v54 = vpop.permute.xlu2 %711 }
 0x5c8   :  { %v714_v19 = vpop.permute.xlu2 %713 }
 0x5d6   :  { %v706_v9 = vpop.permute.xlu1 %705 }
 0x5d7   :  { %v700_v36 = vpop.permute.xlu0 %699 }
 0x5d8   :  { %v717_v23 = vsel %vm147_vm0, %v2437_v29, %v700_v36 }
 0x5d9   :  { %v719_v1 = vsel %vm150_vm1, %v717_v23, %v706_v9 }
 0x5da   :  { %v721_v55 = vsel %vm153_vm2, %v719_v1, %v712_v54 }
 0x5db   :  { %762 = vrot.lane.b32.xlu1 %v721_v55, %s1984_s29  ;;  %754 = vrot.lane.b32.xlu2 %v721_v55, %s1985_s30  ;;  %v725_v44 = vrot.slane %v721_v55, 7  ;;  %v731_v49 = vrot.slane %v721_v55, 1 }
 0x5dd   :  { %v730_v50 = vsel %vm158_vm3, 0.0, %v725_v44 }
 0x5de   :  { %738 = vrot.lane.b32.xlu0 %v730_v50, %s1985_s30  ;;  %v791_v1 = vmul.f32 %v730_v50, %v2077_v26 }
 0x5e0   :  { %v708_v21 = vpop.permute.xlu1 %707 }
 0x5e1   :  { %v702_v53 = vpop.permute.xlu0 %701 }
 0x5e2   :  { %v718_v41 = vsel %vm147_vm0, %v2447_v38, %v702_v53 }
 0x5e3   :  { %v720_v45 = vsel %vm150_vm1, %v718_v41, %v708_v21  ;;  %746 = vrot.lane.b32.xlu1 %v730_v50, %s1984_s29  ;;  %v803_v50 = vmul.f32 %v721_v55, %v2091_v40 }
 0x5e4   :  { %v722_v8 = vsel %vm153_vm2, %v720_v45, %v714_v19 }
 0x5e5   :  { %v726_v20 = vrot.slane %v722_v8, 7  ;;  %v732_v4 = vrot.slane %v722_v8, 1 }
 0x5e7   :  { %v727_v31 = vsel %vm158_vm3, %v725_v44, %v726_v20  ;;  %v733_v47 = vsel %vm165_vm4, %v731_v49, %v732_v4  ;;  %v2476_v39 = vsel %vm165_vm4, %v732_v4, 0.0 }
 0x5e8   :  { %748 = vrot.lane.b32.xlu2 %v727_v31, %s1984_s29  ;;  %740 = vrot.lane.b32.xlu0 %v727_v31, %s1985_s30 }
 0x5eb   :  { %756 = vrot.lane.b32.xlu1 %v722_v8, %s1985_s30 }
 0x5f0   :  { %779 = vrot.lane.b32.xlu2 %v733_v47, %s1984_s29  ;;  %771 = vrot.lane.b32.xlu0 %v733_v47, %s1985_s30 }
 0x5f3   :  { %773 = vrot.lane.b32.xlu1 %v2476_v39, %s1985_s30 }
 0x5f8   :  { %781 = vrot.lane.b32.xlu2 %v2476_v39, %s1984_s29  ;;  %764 = vrot.lane.b32.xlu0 %v722_v8, %s1984_s29 }
 0x635   :  { %v755_v9 = vpop.permute.xlu2 %754 }
 0x636   :  { %v760_v53 = vsel %vm179_vm5, 0.0, %v755_v9 }
 0x637   :  { %v799_v4 = vmul.f32 %v760_v53, %v2085_v33 }
 0x642   :  { %v749_v20 = vpop.permute.xlu2 %748 }
 0x643   :  { %v753_v57 = vsel %vm188_vm6, %v749_v20, 0.0 }
 0x64d   :  { %v763_v0 = vpop.permute.xlu1 %762 }
 0x650   :  { %v739_v36 = vpop.permute.xlu0 %738 }
 0x651   :  { %v744_v23 = vsel %vm179_vm5, 0.0, %v739_v36 }
 0x652   :  { %v787_v54 = vmul.f32 %v744_v23, %v2075_v25 }
 0x654   :  { %v789_v44 = vadd.f32 %v2079_v28, %v787_v54 }
 0x655   :  { %v747_v21 = vpop.permute.xlu1 %746 }
 0x656   :  { %v752_v41 = vsel %vm188_vm6, %v747_v21, 0.0  ;;  %v793_v19 = vadd.f32 %v791_v1, %v789_v44  ;;  %v792_v1 = vmul.f32 %v727_v31, %v2077_v26  ;;  %v768_v21 = vsel %vm188_vm6, %v763_v0, 0.0 }
 0x657   :  { %v795_v45 = vmul.f32 %v752_v41, %v2087_v34  ;;  %v796_v41 = vmul.f32 %v753_v57, %v2087_v34  ;;  %v807_v55 = vmul.f32 %v768_v21, %v2100_v51  ;;  %v804_v0 = vmul.f32 %v722_v8, %v2091_v40 }
 0x658   :  { %v815_v57 = vmul.f32 %v733_v47, %v2109_v61 }
 0x659   :  { %v797_v49 = vadd.f32 %v795_v45, %v793_v19 }
 0x65a   :  { %v741_v38 = vpop.permute.xlu0 %740 }
 0x65b   :  { %v801_v36 = vadd.f32 %v799_v4, %v797_v49  ;;  %v745_v23 = vsel %vm179_vm5, 0.0, %v741_v38  ;;  %v780_v38 = vpop.permute.xlu2 %779 }
 0x65c   :  { %v788_v54 = vmul.f32 %v745_v23, %v2075_v25  ;;  %v785_v23 = vsel %vm188_vm6, %v780_v38, 0.0 }
 0x65d   :  { %v757_v9 = vpop.permute.xlu1 %756  ;;  %v805_v29 = vadd.f32 %v803_v50, %v801_v36 }
 0x65e   :  { %v790_v44 = vadd.f32 %v2079_v28, %v788_v54  ;;  %v761_v53 = vsel %vm179_vm5, 0.0, %v757_v9  ;;  %v819_v9 = vmul.f32 %v2115_v6, %v785_v23 }
 0x65f   :  { %v800_v4 = vmul.f32 %v761_v53, %v2085_v33  ;;  %v809_v31 = vadd.f32 %v807_v55, %v805_v29 }
 0x660   :  { %v794_v19 = vadd.f32 %v792_v1, %v790_v44 }
 0x662   :  { %v798_v45 = vadd.f32 %v796_v41, %v794_v19  ;;  %v772_v20 = vpop.permute.xlu0 %771 }
 0x663   :  { %v777_v49 = vsel %vm179_vm5, 0.0, %v772_v20  ;;  %v782_v19 = vpop.permute.xlu2 %781  ;;  %v816_v20 = vmul.f32 %v2476_v39, %v2109_v61 }
 0x664   :  { %v802_v36 = vadd.f32 %v800_v4, %v798_v45  ;;  %v811_v28 = vmul.f32 %v777_v49, %v2106_v59  ;;  %v786_v4 = vsel %vm188_vm6, %v782_v19, 0.0 }
 0x665   :  { %v774_v44 = vpop.permute.xlu1 %773 }
 0x666   :  { %v813_v50 = vadd.f32 %v811_v28, %v809_v31  ;;  %v806_v54 = vadd.f32 %v804_v0, %v802_v36  ;;  %v778_v41 = vsel %vm179_vm5, 0.0, %v774_v44  ;;  %v820_v31 = vmul.f32 %v2115_v6, %v786_v4 }
 0x667   :  { %v812_v38 = vmul.f32 %v778_v41, %v2106_v59 }
 0x668   :  { %v817_v1 = vadd.f32 %v815_v57, %v813_v50 }
 0x66a   :  { %v821_v21 = vadd.f32 %v819_v9, %v817_v1  ;;  %v765_v53 = vpop.permute.xlu0 %764 }
 0x66b   :  { %v769_v29 = vsel %vm188_vm6, %v765_v53, 0.0 }
 0x66c   :  { %v823_v55 = vmax.f32 %v821_v21, 0.0  ;;  %v808_v8 = vmul.f32 %v769_v29, %v2100_v51 }
 0x66e   :  { %v810_v45 = vadd.f32 %v808_v8, %v806_v54  ;;  %864 = vrot.lane.b32.xlu1 %v823_v55, %s1984_s29  ;;  %856 = vrot.lane.b32.xlu2 %v823_v55, %s1985_s30  ;;  %v827_v47 = vrot.slane %v823_v55, 7  ;;  %v833_v50 = vrot.slane %v823_v55, 1 }
 0x670   :  { %v814_v49 = vadd.f32 %v812_v38, %v810_v45  ;;  %v832_v36 = vsel %vm158_vm3, 0.0, %v827_v47 }
 0x671   :  { %840 = vrot.lane.b32.xlu0 %v832_v36, %s1985_s30  ;;  %v891_v29 = vmul.f32 %v832_v36, %v2191_v63 }
 0x672   :  { %v818_v28 = vadd.f32 %v816_v20, %v814_v49 }
 0x674   :  { %v822_v0 = vadd.f32 %v820_v31, %v818_v28 }
 0x676   :  { %v824_v23 = vmax.f32 %v822_v0, 0.0  ;;  %848 = vrot.lane.b32.xlu1 %v832_v36, %s1984_s29  ;;  %v903_v36 = vmul.f32 %v823_v55, %v2203_v14 }
 0x678   :  { %v828_v57 = vrot.slane %v824_v23, 7  ;;  %v834_v54 = vrot.slane %v824_v23, 1 }
 0x67a   :  { %v829_v9 = vsel %vm158_vm3, %v827_v47, %v828_v57  ;;  %v835_v1 = vsel %vm165_vm4, %v833_v50, %v834_v54  ;;  %v838_v6 = vsel %vm165_vm4, %v834_v54, 0.0 }
 0x67b   :  { %850 = vrot.lane.b32.xlu2 %v829_v9, %s1984_s29  ;;  %842 = vrot.lane.b32.xlu0 %v829_v9, %s1985_s30  ;;  %v892_v50 = vmul.f32 %v829_v9, %v2191_v63  ;;  %v904_v9 = vmul.f32 %v824_v23, %v2203_v14 }
 0x67e   :  { %858 = vrot.lane.b32.xlu1 %v824_v23, %s1985_s30 }
 0x683   :  { %881 = vrot.lane.b32.xlu2 %v835_v1, %s1984_s29  ;;  %873 = vrot.lane.b32.xlu0 %v835_v1, %s1985_s30 }
 0x686   :  { %875 = vrot.lane.b32.xlu1 %v838_v6, %s1985_s30 }
 0x68b   :  { %883 = vrot.lane.b32.xlu2 %v838_v6, %s1984_s29  ;;  %866 = vrot.lane.b32.xlu0 %v824_v23, %s1984_s29 }
 0x6c8   :  { %v857_v44 = vpop.permute.xlu2 %856 }
 0x6c9   :  { %v862_v8 = vsel %vm179_vm5, 0.0, %v857_v44 }
 0x6ca   :  { %v899_v20 = vmul.f32 %v862_v8, %v2196_v5 }
 0x6d5   :  { %v851_v4 = vpop.permute.xlu2 %850 }
 0x6d6   :  { %v855_v28 = vsel %vm188_vm6, %v851_v4, 0.0 }
 0x6e0   :  { %v865_v39 = vpop.permute.xlu1 %864 }
 0x6e3   :  { %v841_v21 = vpop.permute.xlu0 %840 }
 0x6e4   :  { %v846_v53 = vsel %vm179_vm5, 0.0, %v841_v21 }
 0x6e5   :  { %v889_v41 = vmul.f32 %v846_v53, %v2189_v58  ;;  %v896_v53 = vmul.f32 %v855_v28, %v2198_v7 }
 0x6e7   :  { %v893_v45 = vadd.f32 %v891_v29, %v889_v41 }
 0x6e8   :  { %v849_v19 = vpop.permute.xlu1 %848 }
 0x6e9   :  { %v854_v38 = vsel %vm188_vm6, %v849_v19, 0.0  ;;  %v870_v19 = vsel %vm188_vm6, %v865_v39, 0.0  ;;  %v915_v39 = vmul.f32 %v835_v1, %v2220_v24 }
 0x6ea   :  { %v895_v47 = vmul.f32 %v854_v38, %v2198_v7 }
 0x6ec   :  { %v897_v49 = vadd.f32 %v895_v47, %v893_v45  ;;  %v882_v45 = vpop.permute.xlu2 %881  ;;  %v907_v47 = vmul.f32 %v870_v19, %v2213_v32 }
 0x6ed   :  { %v843_v31 = vpop.permute.xlu0 %842 }
 0x6ee   :  { %v901_v0 = vadd.f32 %v899_v20, %v897_v49  ;;  %v847_v57 = vsel %vm179_vm5, 0.0, %v843_v31 }
 0x6ef   :  { %v890_v54 = vmul.f32 %v847_v57, %v2189_v58 }
 0x6f0   :  { %v859_v44 = vpop.permute.xlu1 %858  ;;  %v905_v21 = vadd.f32 %v903_v36, %v901_v0  ;;  %v887_v0 = vsel %vm188_vm6, %v882_v45, 0.0 }
 0x6f1   :  { %v894_v41 = vadd.f32 %v892_v50, %v890_v54  ;;  %v863_v29 = vsel %vm179_vm5, 0.0, %v859_v44  ;;  %v919_v36 = vmul.f32 %v2226_v3, %v887_v0 }
 0x6f2   :  { %v900_v8 = vmul.f32 %v863_v29, %v2196_v5  ;;  %v909_v49 = vadd.f32 %v907_v47, %v905_v21 }
 0x6f3   :  { %v898_v38 = vadd.f32 %v896_v53, %v894_v41 }
 0x6f4   :  { %v884_v29 = vpop.permute.xlu2 %883 }
 0x6f5   :  { %v902_v55 = vadd.f32 %v900_v8, %v898_v38  ;;  %v874_v4 = vpop.permute.xlu0 %873  ;;  %v888_v1 = vsel %vm188_vm6, %v884_v29, 0.0  ;;  %v916_v38 = vmul.f32 %v838_v6, %v2220_v24 }
 0x6f6   :  { %v879_v20 = vsel %vm179_vm5, 0.0, %v874_v4  ;;  %v920_v47 = vmul.f32 %v2226_v3, %v888_v1 }
 0x6f7   :  { %v911_v31 = vmul.f32 %v879_v20, %v2218_v42  ;;  %v906_v28 = vadd.f32 %v904_v9, %v902_v55 }
 0x6f8   :  { %v876_v54 = vpop.permute.xlu1 %875 }
 0x6f9   :  { %v913_v57 = vadd.f32 %v911_v31, %v909_v49  ;;  %v880_v41 = vsel %vm179_vm5, 0.0, %v876_v54 }
 0x6fa   :  { %v912_v19 = vmul.f32 %v880_v41, %v2218_v42 }
 0x6fb   :  { %v917_v50 = vadd.f32 %v915_v39, %v913_v57 }
 0x6fd   :  { %v867_v44 = vpop.permute.xlu0 %866  ;;  %v921_v53 = vadd.f32 %v919_v36, %v917_v50 }
 0x6fe   :  { %v871_v23 = vsel %vm188_vm6, %v867_v44, 0.0 }
 0x6ff   :  { %v908_v21 = vmul.f32 %v871_v23, %v2213_v32  ;;  %1829 = vmatmul.msk.f32.vlgmr.msrb.gmra.mxu3 %vm360_vm7, %v921_v53 }
 0x701   :  { %v910_v8 = vadd.f32 %v908_v21, %v906_v28 }
 0x703   :  { %v914_v45 = vadd.f32 %v912_v19, %v910_v8 }
 0x705   :  { %v918_v55 = vadd.f32 %v916_v38, %v914_v45 }
 0x707   :  { %v922_v4 = vadd.f32 %v920_v47, %v918_v55 }
 0x709   :  { %1830 = vmatmul.msk.f32.gmra.mxu3 %vm360_vm7, %v922_v4 }
 0x782   :  { %v946_v9 = vpop.f32.mrf.mxu3 }
 0x78c   :  { %v949_v20 = vpop.f32.mrf.mxu3 }
 0x78d   :  { %966 = vmatpush.msra.mxu1 %v949_v20 }
 0x78f   :  { %967 = vmatpush.msra.mxu1 %v946_v9 }
 0x790   :  { %1831 = vmatmul.msk.f32.vlgmr.msra.gmra.mxu1 %vm147_vm0, %v2243_v37 }
 0x80d   :  { %v969_v49 = vpop.f32.mrf.mxu1 }
 0x80e   :  { %v970_v31 = vadd.f32 %v969_v49, %v2247_v46 }
 0x810   :  { %v972_v28 = vsub.f32 %v970_v31, %v2249_v43 }
 0x812   :  { %1832 = vmatmul.msk.f32.vlgmr.msrb.gmra.mxu2 %vm147_vm0, %v972_v28 }
 0x895   :  { %v993_v6 = vpop.f32.mrf.mxu2 }
 0x896   :  { %1011 = vmatpush.msrb.mxu1 %v993_v6 }
 0x897   :  { %1833 = vmatmul.msk.f32.vlgmr.msrb.gmra.mxu1 %vm437_vm8, %v2262_v62 }
 0x89f   :  { %1834 = vmatmul.msk.f32.gmra.mxu1 %vm437_vm8, %v2268_v56 }
 0x914   :  { %v1013_v3 = vpop.f32.mrf.mxu1 }
 0x915   :  { %1058 = vrot.lane.b32.xlu1 %v1013_v3, %s1984_s29  ;;  %1050 = vrot.lane.b32.xlu2 %v1013_v3, %s1985_s30  ;;  %v1021_v37 = vrot.slane %v1013_v3, 7  ;;  %v1027_v56 = vrot.slane %v1013_v3, 1  ;;  %v1099_v49 = vmul.f32 %v1013_v3, %v2320_v30 }
 0x917   :  { %v1026_v46 = vsel %vm158_vm3, 0.0, %v1021_v37 }
 0x918   :  { %1034 = vrot.lane.b32.xlu0 %v1026_v46, %s1985_s30  ;;  %v1087_v23 = vmul.f32 %v1026_v46, %v2306_v12 }
 0x91c   :  { %v1016_v43 = vpop.f32.mrf.mxu1 }
 0x91d   :  { %1042 = vrot.lane.b32.xlu1 %v1026_v46, %s1984_s29  ;;  %v1022_v0 = vrot.slane %v1016_v43, 7  ;;  %v1028_v62 = vrot.slane %v1016_v43, 1 }
 0x91f   :  { %v1023_v39 = vsel %vm158_vm3, %v1021_v37, %v1022_v0  ;;  %v1029_v57 = vsel %vm165_vm4, %v1027_v56, %v1028_v62  ;;  %v2586_v36 = vsel %vm165_vm4, %v1028_v62, 0.0 }
 0x920   :  { %1044 = vrot.lane.b32.xlu2 %v1023_v39, %s1984_s29  ;;  %1036 = vrot.lane.b32.xlu0 %v1023_v39, %s1985_s30  ;;  %v1088_v28 = vmul.f32 %v1023_v39, %v2306_v12 }
 0x925   :  { %1052 = vrot.lane.b32.xlu1 %v1016_v43, %s1985_s30 }
 0x928   :  { %1075 = vrot.lane.b32.xlu2 %v1029_v57, %s1984_s29  ;;  %1067 = vrot.lane.b32.xlu0 %v1029_v57, %s1985_s30 }
 0x92d   :  { %1069 = vrot.lane.b32.xlu1 %v2586_v36, %s1985_s30 }
 0x930   :  { %1077 = vrot.lane.b32.xlu2 %v2586_v36, %s1984_s29  ;;  %1060 = vrot.lane.b32.xlu0 %v1016_v43, %s1984_s29 }
 0x96f   :  { %v1051_v54 = vpop.permute.xlu2 %1050 }
 0x970   :  { %v1056_v19 = vsel %vm179_vm5, 0.0, %v1051_v54 }
 0x971   :  { %v1095_v55 = vmul.f32 %v1056_v19, %v2314_v13  ;;  %v1111_v19 = vmul.f32 %v1029_v57, %v2336_v18 }
 0x97a   :  { %v1045_v8 = vpop.permute.xlu2 %1044 }
 0x97b   :  { %v1049_v37 = vsel %vm188_vm6, %v1045_v8, 0.0 }
 0x987   :  { %v1059_v50 = vpop.permute.xlu1 %1058 }
 0x988   :  { %v1064_v46 = vsel %vm188_vm6, %v1059_v50, 0.0 }
 0x98a   :  { %v1035_v44 = vpop.permute.xlu0 %1034 }
 0x98b   :  { %v1040_v53 = vsel %vm179_vm5, 0.0, %v1035_v44  ;;  %v1092_v44 = vmul.f32 %v1049_v37, %v2316_v22 }
 0x98c   :  { %v1083_v41 = vmul.f32 %v1040_v53, %v2304_v11  ;;  %v1076_v53 = vpop.permute.xlu2 %1075 }
 0x98d   :  { %v1081_v50 = vsel %vm188_vm6, %v1076_v53, 0.0 }
 0x98e   :  { %v1085_v29 = vadd.f32 %v2308_v15, %v1083_v41  ;;  %v1103_v41 = vmul.f32 %v1064_v46, %v2328_v48 }
 0x98f   :  { %v1043_v21 = vpop.permute.xlu1 %1042 }
 0x990   :  { %v1048_v1 = vsel %vm188_vm6, %v1043_v21, 0.0  ;;  %v1089_v38 = vadd.f32 %v1087_v23, %v1085_v29 }
 0x991   :  { %v1091_v45 = vmul.f32 %v1048_v1, %v2316_v22  ;;  %v2929_v1 = vld [vmem:[#allocation12_spill] sm:$0xff] }
 0x992   :  { %v1037_v47 = vpop.permute.xlu0 %1036 }
 0x993   :  { %v1093_v4 = vadd.f32 %v1091_v45, %v1089_v38  ;;  %v1041_v9 = vsel %vm179_vm5, 0.0, %v1037_v47  ;;  %v1115_v38 = vmul.f32 %v2929_v1, %v1081_v50 }
 0x994   :  { %v1084_v20 = vmul.f32 %v1041_v9, %v2304_v11  ;;  %v1100_v9 = vmul.f32 %v1016_v43, %v2320_v30 }
 0x995   :  { %v1097_v31 = vadd.f32 %v1095_v55, %v1093_v4 }
 0x996   :  { %v1086_v6 = vadd.f32 %v2308_v15, %v1084_v20 }
 0x997   :  { %v1053_v0 = vpop.permute.xlu1 %1052  ;;  %v1101_v62 = vadd.f32 %v1099_v49, %v1097_v31 }
 0x998   :  { %v1090_v56 = vadd.f32 %v1088_v28, %v1086_v6  ;;  %v1057_v54 = vsel %vm179_vm5, 0.0, %v1053_v0  ;;  %v1078_v28 = vpop.permute.xlu2 %1077 }
 0x999   :  { %v1096_v15 = vmul.f32 %v1057_v54, %v2314_v13  ;;  %v1105_v29 = vadd.f32 %v1103_v41, %v1101_v62  ;;  %v1082_v43 = vsel %vm188_vm6, %v1078_v28, 0.0  ;;  %v2930_v28 = vld [vmem:[#allocation13_spill] sm:$0xff] }
 0x99a   :  { %v1068_v3 = vpop.permute.xlu0 %1067  ;;  %v1094_v39 = vadd.f32 %v1092_v44, %v1090_v56  ;;  %v1112_v56 = vmul.f32 %v2586_v36, %v2336_v18  ;;  %v1116_v53 = vmul.f32 %v2929_v1, %v1082_v43 }
 0x99b   :  { %v1073_v23 = vsel %vm179_vm5, 0.0, %v1068_v3 }
 0x99c   :  { %v1107_v21 = vmul.f32 %v1073_v23, %v2333_v16  ;;  %v1098_v45 = vadd.f32 %v1096_v15, %v1094_v39 }
 0x99e   :  { %v1109_v8 = vadd.f32 %v1107_v21, %v1105_v29  ;;  %v1102_v37 = vadd.f32 %v1100_v9, %v1098_v45 }
 0x99f   :  { %v1070_v55 = vpop.permute.xlu1 %1069 }
 0x9a0   :  { %v1113_v47 = vadd.f32 %v1111_v19, %v1109_v8  ;;  %v1074_v49 = vsel %vm179_vm5, 0.0, %v1070_v55 }
 0x9a1   :  { %v1108_v57 = vmul.f32 %v1074_v49, %v2333_v16 }
 0x9a2   :  { %v1117_v4 = vadd.f32 %v1115_v38, %v1113_v47  ;;  %v1061_v20 = vpop.permute.xlu0 %1060 }
 0x9a3   :  { %v1065_v31 = vsel %vm188_vm6, %v1061_v20, 0.0 }
 0x9a4   :  { %v1119_v6 = vmax.f32 %v1117_v4, 0.0  ;;  %v1104_v46 = vmul.f32 %v1065_v31, %v2328_v48 }
 0x9a6   :  { %v1106_v0 = vadd.f32 %v1104_v46, %v1102_v37  ;;  %1160 = vrot.lane.b32.xlu1 %v1119_v6, %s1984_s29  ;;  %1152 = vrot.lane.b32.xlu2 %v1119_v6, %s1985_s30  ;;  %v1123_v62 = vrot.slane %v1119_v6, 7  ;;  %v1129_v15 = vrot.slane %v1119_v6, 1 }
 0x9a8   :  { %v1110_v54 = vadd.f32 %v1108_v57, %v1106_v0  ;;  %v1128_v44 = vsel %vm158_vm3, 0.0, %v1123_v62 }
 0x9a9   :  { %1136 = vrot.lane.b32.xlu0 %v1128_v44, %s1985_s30  ;;  %v1187_v47 = vmul.f32 %v1128_v44, %v2380_v52 }
 0x9aa   :  { %v1114_v41 = vadd.f32 %v1112_v56, %v1110_v54  ;;  %v2931_v56 = vld [vmem:[#allocation14_spill] sm:$0xff] }
 0x9ab   :  { %v1199_v54 = vmul.f32 %v1119_v6, %v2931_v56 }
 0x9ac   :  { %v1118_v3 = vadd.f32 %v1116_v53, %v1114_v41 }
 0x9ae   :  { %v1120_v23 = vmax.f32 %v1118_v3, 0.0  ;;  %1144 = vrot.lane.b32.xlu1 %v1128_v44, %s1984_s29 }
 0x9b0   :  { %v1124_v39 = vrot.slane %v1120_v23, 7  ;;  %v1130_v29 = vrot.slane %v1120_v23, 1 }
 0x9b2   :  { %v1125_v21 = vsel %vm158_vm3, %v1123_v62, %v1124_v39  ;;  %v1131_v50 = vsel %vm165_vm4, %v1129_v15, %v1130_v29  ;;  %v1134_v36 = vsel %vm165_vm4, %v1130_v29, 0.0 }
 0x9b3   :  { %1146 = vrot.lane.b32.xlu2 %v1125_v21, %s1984_s29  ;;  %1138 = vrot.lane.b32.xlu0 %v1125_v21, %s1985_s30  ;;  %v1188_v44 = vmul.f32 %v1125_v21, %v2380_v52  ;;  %v1200_v21 = vmul.f32 %v1120_v23, %v2931_v56 }
 0x9b6   :  { %1154 = vrot.lane.b32.xlu1 %v1120_v23, %s1985_s30 }
 0x9bb   :  { %1177 = vrot.lane.b32.xlu2 %v1131_v50, %s1984_s29  ;;  %1169 = vrot.lane.b32.xlu0 %v1131_v50, %s1985_s30 }
 0x9be   :  { %1171 = vrot.lane.b32.xlu1 %v1134_v36, %s1985_s30 }
 0x9c3   :  { %1179 = vrot.lane.b32.xlu2 %v1134_v36, %s1984_s29  ;;  %1162 = vrot.lane.b32.xlu0 %v1120_v23, %s1984_s29 }
 0xa00   :  { %v1153_v8 = vpop.permute.xlu2 %1152 }
 0xa01   :  { %v1158_v4 = vsel %vm179_vm5, 0.0, %v1153_v8 }
 0xa02   :  { %v1195_v37 = vmul.f32 %v1158_v4, %v2930_v28 }
 0xa0d   :  { %v1147_v31 = vpop.permute.xlu2 %1146 }
 0xa0e   :  { %v1151_v0 = vsel %vm188_vm6, %v1147_v31, 0.0 }
 0xa0f   :  { %v1192_v39 = vmul.f32 %v1151_v0, %v2387_v17 }
 0xa18   :  { %v1161_v19 = vpop.permute.xlu1 %1160 }
 0xa19   :  { %v1166_v8 = vsel %vm188_vm6, %v1161_v19, 0.0  ;;  %v1211_v19 = vmul.f32 %v1131_v50, %v2408_v10 }
 0xa1b   :  { %v1137_v1 = vpop.permute.xlu0 %1136 }
 0xa1c   :  { %v1142_v38 = vsel %vm179_vm5, 0.0, %v1137_v1 }
 0xa1d   :  { %v1185_v45 = vmul.f32 %v1142_v38, %v2378_v60 }
 0xa1f   :  { %v1189_v20 = vadd.f32 %v1187_v47, %v1185_v45  ;;  %v1178_v45 = vpop.permute.xlu2 %1177  ;;  %v1203_v47 = vmul.f32 %v1166_v8, %v2401_v27 }
 0xa20   :  { %v1145_v55 = vpop.permute.xlu1 %1144  ;;  %v1183_v31 = vsel %vm188_vm6, %v1178_v45, 0.0 }
 0xa21   :  { %v1150_v9 = vsel %vm188_vm6, %v1145_v55, 0.0 }
 0xa22   :  { %v1191_v49 = vmul.f32 %v1150_v9, %v2387_v17 }
 0xa24   :  { %v1193_v46 = vadd.f32 %v1191_v49, %v1189_v20 }
 0xa25   :  { %v1139_v57 = vpop.permute.xlu0 %1138 }
 0xa26   :  { %v1197_v62 = vadd.f32 %v1195_v37, %v1193_v46  ;;  %v1143_v43 = vsel %vm179_vm5, 0.0, %v1139_v57  ;;  %v1215_v46 = vmul.f32 %v2413_v2, %v1183_v31 }
 0xa27   :  { %v1186_v53 = vmul.f32 %v1143_v43, %v2378_v60 }
 0xa28   :  { %v1155_v41 = vpop.permute.xlu1 %1154  ;;  %v1201_v3 = vadd.f32 %v1199_v54, %v1197_v62 }
 0xa29   :  { %v1190_v15 = vadd.f32 %v1188_v44, %v1186_v53  ;;  %v1159_v29 = vsel %vm179_vm5, 0.0, %v1155_v41  ;;  %v1180_v44 = vpop.permute.xlu2 %1179 }
 0xa2a   :  { %v1196_v1 = vmul.f32 %v1159_v29, %v2930_v28  ;;  %v1205_v9 = vadd.f32 %v1203_v47, %v1201_v3  ;;  %v1184_v3 = vsel %vm188_vm6, %v1180_v44, 0.0 }
 0xa2b   :  { %v1194_v38 = vadd.f32 %v1192_v39, %v1190_v15  ;;  %v1212_v39 = vmul.f32 %v1134_v36, %v2408_v10  ;;  %v1216_v29 = vmul.f32 %v2413_v2, %v1184_v3  ;;  %v2933_v36 = vld [vmem:[#allocation15_spill] sm:$0xff] }
 0xa2d   :  { %v1198_v6 = vadd.f32 %v1196_v1, %v1194_v38  ;;  %v1170_v55 = vpop.permute.xlu0 %1169 }
 0xa2e   :  { %v1175_v4 = vsel %vm179_vm5, 0.0, %v1170_v55 }
 0xa2f   :  { %v1207_v20 = vmul.f32 %v1175_v4, %v2406_v35  ;;  %v1202_v49 = vadd.f32 %v1200_v21, %v1198_v6  ;;  %v2932_v4 = vld [vmem:[#allocation16_spill] sm:$0xff] }
 0xa30   :  { %v1172_v0 = vpop.permute.xlu1 %1171 }
 0xa31   :  { %v1209_v37 = vadd.f32 %v1207_v20, %v1205_v9  ;;  %v1176_v54 = vsel %vm179_vm5, 0.0, %v1172_v0 }
 0xa32   :  { %v1208_v50 = vmul.f32 %v1176_v54, %v2406_v35 }
 0xa33   :  { %v1213_v57 = vadd.f32 %v1211_v19, %v1209_v37 }
 0xa35   :  { %v1163_v62 = vpop.permute.xlu0 %1162  ;;  %v1217_v43 = vadd.f32 %v1215_v46, %v1213_v57  ;;  %v2934_v57 = vld [vmem:[#allocation17_spill] sm:$0xff] }
 0xa36   :  { %v1167_v23 = vsel %vm188_vm6, %v1163_v62, 0.0 }
 0xa37   :  { %v1204_v53 = vmul.f32 %v1167_v23, %v2401_v27  ;;  %1237 = vrot.lane.b32.xlu2 %v1217_v43, %s1986_s4  ;;  %1229 = vrot.lane.b32.xlu1 %v1217_v43, %s1987_s5 }
 0xa38   :  { %1221 = vrot.lane.b32.xlu0 %v1217_v43, %s1988_s6 }
 0xa39   :  { %v1206_v41 = vadd.f32 %v1204_v53, %v1202_v49 }
 0xa3b   :  { %v1210_v15 = vadd.f32 %v1208_v50, %v1206_v41 }
 0xa3d   :  { %v1214_v8 = vadd.f32 %v1212_v39, %v1210_v15 }
 0xa3f   :  { %v1218_v1 = vadd.f32 %v1216_v29, %v1214_v8 }
 0xa41   :  { %1239 = vrot.lane.b32.xlu2 %v1218_v1, %s1986_s4  ;;  %1231 = vrot.lane.b32.xlu1 %v1218_v1, %s1987_s5 }
 0xa42   :  { %1223 = vrot.lane.b32.xlu0 %v1218_v1, %s1988_s6 }
 0xa91   :  { %v1238_v55 = vpop.permute.xlu2 %1237 }
 0xa9b   :  { %v1240_v37 = vpop.permute.xlu2 %1239 }
 0xaa9   :  { %v1230_v47 = vpop.permute.xlu1 %1229 }
 0xaaa   :  { %v1222_v38 = vpop.permute.xlu0 %1221 }
 0xaab   :  { %v1227_v45 = vadd.f32 %v1222_v38, %v1217_v43 }
 0xaad   :  { %v1235_v6 = vadd.f32 %v1230_v47, %v1227_v45 }
 0xaaf   :  { %v1243_v21 = vadd.f32 %v1238_v55, %v1235_v6 }
 0xab1   :  { %v1245_v9 = vsub.f32 %v2932_v4, %v1243_v21 }
 0xab3   :  { %v2680_v20 = vsub.f32 %v1245_v9, %v2933_v36  ;;  %v1232_v31 = vpop.permute.xlu1 %1231 }
 0xab4   :  { %v1224_v2 = vpop.permute.xlu0 %1223 }
 0xab5   :  { %v1228_v49 = vadd.f32 %v1224_v2, %v1218_v1  ;;  %1263 = vrot.lane.b32.xlu2 %v2680_v20, %s1981_s0  ;;  %1257 = vrot.lane.b32.xlu1 %v2680_v20, %s1983_s28 }
 0xab6   :  { %1251 = vrot.lane.b32.xlu0 %v2680_v20, %s1982_s2 }
 0xab7   :  { %v1236_v19 = vadd.f32 %v1232_v31, %v1228_v49 }
 0xab9   :  { %v1244_v46 = vadd.f32 %v1240_v37, %v1236_v19  ;;  %v1862_v37 = vld [vmem:[#allocation7 + $0x40] ss:$0 sm:$0xff] }
 0xabb   :  { %v1246_v0 = vsub.f32 %v2934_v57, %v1244_v46 }
 0xabd   :  { %v2690_v62 = vsub.f32 %v1246_v0, %v2933_v36 }
 0xabf   :  { %1265 = vrot.lane.b32.xlu2 %v2690_v62, %s1981_s0  ;;  %1259 = vrot.lane.b32.xlu1 %v2690_v62, %s1983_s28 }
 0xac0   :  { %1253 = vrot.lane.b32.xlu0 %v2690_v62, %s1982_s2 }
 0xb0f   :  { %v1264_v44 = vpop.permute.xlu2 %1263 }
 0xb19   :  { %v1266_v8 = vpop.permute.xlu2 %1265 }
 0xb27   :  { %v1258_v43 = vpop.permute.xlu1 %1257 }
 0xb28   :  { %v1252_v54 = vpop.permute.xlu0 %1251 }
 0xb29   :  { %v1269_v23 = vsel %vm147_vm0, %v2680_v20, %v1252_v54 }
 0xb2a   :  { %v1271_v53 = vsel %vm150_vm1, %v1269_v23, %v1258_v43 }
 0xb2b   :  { %v1273_v50 = vsel %vm153_vm2, %v1271_v53, %v1264_v44 }
 0xb2c   :  { %1314 = vrot.lane.b32.xlu1 %v1273_v50, %s1984_s29  ;;  %1306 = vrot.lane.b32.xlu2 %v1273_v50, %s1985_s30  ;;  %v1277_v41 = vrot.slane %v1273_v50, 7  ;;  %v1283_v55 = vrot.slane %v1273_v50, 1 }
 0xb2e   :  { %v1282_v3 = vsel %vm158_vm3, 0.0, %v1277_v41 }
 0xb2f   :  { %1290 = vrot.lane.b32.xlu0 %v1282_v3, %s1985_s30  ;;  %v1343_v19 = vmul.f32 %v1282_v3, %v2077_v26 }
 0xb31   :  { %v1260_v39 = vpop.permute.xlu1 %1259 }
 0xb32   :  { %v1254_v15 = vpop.permute.xlu0 %1253 }
 0xb33   :  { %v1270_v29 = vsel %vm147_vm0, %v2690_v62, %v1254_v15 }
 0xb34   :  { %v1272_v1 = vsel %vm150_vm1, %v1270_v29, %v1260_v39  ;;  %1298 = vrot.lane.b32.xlu1 %v1282_v3, %s1984_s29  ;;  %v1355_v3 = vmul.f32 %v1273_v50, %v2091_v40 }
 0xb35   :  { %v1274_v38 = vsel %vm153_vm2, %v1272_v1, %v1266_v8 }
 0xb36   :  { %v1278_v45 = vrot.slane %v1274_v38, 7  ;;  %v1284_v6 = vrot.slane %v1274_v38, 1 }
 0xb38   :  { %v1279_v47 = vsel %vm158_vm3, %v1277_v41, %v1278_v45  ;;  %v1285_v21 = vsel %vm165_vm4, %v1283_v55, %v1284_v6  ;;  %v2719_v4 = vsel %vm165_vm4, %v1284_v6, 0.0 }
 0xb39   :  { %1300 = vrot.lane.b32.xlu2 %v1279_v47, %s1984_s29  ;;  %1292 = vrot.lane.b32.xlu0 %v1279_v47, %s1985_s30  ;;  %v1344_v55 = vmul.f32 %v1279_v47, %v2077_v26  ;;  %v1356_v47 = vmul.f32 %v1274_v38, %v2091_v40 }
 0xb3c   :  { %1308 = vrot.lane.b32.xlu1 %v1274_v38, %s1985_s30 }
 0xb41   :  { %1331 = vrot.lane.b32.xlu2 %v1285_v21, %s1984_s29  ;;  %1323 = vrot.lane.b32.xlu0 %v1285_v21, %s1985_s30 }
 0xb44   :  { %1325 = vrot.lane.b32.xlu1 %v2719_v4, %s1985_s30 }
 0xb49   :  { %1333 = vrot.lane.b32.xlu2 %v2719_v4, %s1984_s29  ;;  %1316 = vrot.lane.b32.xlu0 %v1274_v38, %s1984_s29 }
 0xb86   :  { %v1307_v36 = vpop.permute.xlu2 %1306 }
 0xb87   :  { %v1312_v0 = vsel %vm179_vm5, 0.0, %v1307_v36 }
 0xb88   :  { %v1351_v53 = vmul.f32 %v1312_v0, %v2085_v33 }
 0xb93   :  { %v1301_v44 = vpop.permute.xlu2 %1300 }
 0xb94   :  { %v1305_v1 = vsel %vm188_vm6, %v1301_v44, 0.0 }
 0xb9e   :  { %v1315_v9 = vpop.permute.xlu1 %1314 }
 0xba1   :  { %v1291_v2 = vpop.permute.xlu0 %1290 }
 0xba2   :  { %v1296_v49 = vsel %vm179_vm5, 0.0, %v1291_v2  ;;  %v1320_v2 = vsel %vm188_vm6, %v1315_v9, 0.0 }
 0xba3   :  { %v1339_v31 = vmul.f32 %v1296_v49, %v2075_v25 }
 0xba5   :  { %v1341_v46 = vadd.f32 %v1862_v37, %v1339_v31  ;;  %v1348_v31 = vmul.f32 %v1305_v1, %v2087_v34 }
 0xba6   :  { %v1299_v57 = vpop.permute.xlu1 %1298 }
 0xba7   :  { %v1304_v43 = vsel %vm188_vm6, %v1299_v57, 0.0  ;;  %v1345_v54 = vadd.f32 %v1343_v19, %v1341_v46  ;;  %v1332_v46 = vpop.permute.xlu2 %1331  ;;  %v1359_v57 = vmul.f32 %v1320_v2, %v2100_v51 }
 0xba8   :  { %v1347_v23 = vmul.f32 %v1304_v43, %v2087_v34  ;;  %v1337_v9 = vsel %vm188_vm6, %v1332_v46, 0.0  ;;  %v1367_v34 = vmul.f32 %v1285_v21, %v2109_v61 }
 0xbaa   :  { %v1349_v41 = vadd.f32 %v1347_v23, %v1345_v54 }
 0xbab   :  { %v1293_v39 = vpop.permute.xlu0 %1292 }
 0xbac   :  { %v1353_v15 = vadd.f32 %v1351_v53, %v1349_v41  ;;  %v1297_v29 = vsel %vm179_vm5, 0.0, %v1293_v39  ;;  %v1863_v53 = vld [vmem:[#allocation7 + $0x8] ss:$0 sm:$0xff] }
 0xbad   :  { %v1340_v8 = vmul.f32 %v1297_v29, %v2075_v25  ;;  %v1371_v41 = vmul.f32 %v1863_v53, %v1337_v9 }
 0xbae   :  { %v1309_v45 = vpop.permute.xlu1 %1308  ;;  %v1357_v6 = vadd.f32 %v1355_v3, %v1353_v15 }
 0xbaf   :  { %v1342_v36 = vadd.f32 %v1862_v37, %v1340_v8  ;;  %v1313_v49 = vsel %vm179_vm5, 0.0, %v1309_v45  ;;  %v1334_v1 = vpop.permute.xlu2 %1333 }
 0xbb0   :  { %v1352_v25 = vmul.f32 %v1313_v49, %v2085_v33  ;;  %v1361_v23 = vadd.f32 %v1359_v57, %v1357_v6 }
 0xbb1   :  { %v1346_v19 = vadd.f32 %v1344_v55, %v1342_v36  ;;  %v1338_v55 = vsel %vm188_vm6, %v1334_v1, 0.0  ;;  %v1368_v36 = vmul.f32 %v2719_v4, %v2109_v61 }
 0xbb3   :  { %v1350_v50 = vadd.f32 %v1348_v31, %v1346_v19  ;;  %v1324_v0 = vpop.permute.xlu0 %1323  ;;  %v1372_v31 = vmul.f32 %v1863_v53, %v1338_v55 }
 0xbb4   :  { %v1329_v43 = vsel %vm179_vm5, 0.0, %v1324_v0 }
 0xbb5   :  { %v1354_v54 = vadd.f32 %v1352_v25, %v1350_v50  ;;  %v1363_v26 = vmul.f32 %v1329_v43, %v2106_v59 }
 0xbb6   :  { %v1326_v15 = vpop.permute.xlu1 %1325 }
 0xbb7   :  { %v1365_v37 = vadd.f32 %v1363_v26, %v1361_v23  ;;  %v1358_v44 = vadd.f32 %v1356_v47, %v1354_v54  ;;  %v1330_v3 = vsel %vm179_vm5, 0.0, %v1326_v15 }
 0xbb8   :  { %v1364_v38 = vmul.f32 %v1330_v3, %v2106_v59 }
 0xbb9   :  { %v1369_v39 = vadd.f32 %v1367_v34, %v1365_v37 }
 0xbbb   :  { %v1373_v33 = vadd.f32 %v1371_v41, %v1369_v39  ;;  %v1317_v29 = vpop.permute.xlu0 %1316 }
 0xbbc   :  { %v1321_v8 = vsel %vm188_vm6, %v1317_v29, 0.0 }
 0xbbd   :  { %v1375_v45 = vmax.f32 %v1373_v33, 0.0  ;;  %v1360_v40 = vmul.f32 %v1321_v8, %v2100_v51 }
 0xbbf   :  { %v1362_v6 = vadd.f32 %v1360_v40, %v1358_v44  ;;  %1416 = vrot.lane.b32.xlu1 %v1375_v45, %s1984_s29  ;;  %1408 = vrot.lane.b32.xlu2 %v1375_v45, %s1985_s30  ;;  %v1379_v21 = vrot.slane %v1375_v45, 7  ;;  %v1385_v57 = vrot.slane %v1375_v45, 1  ;;  %v1455_v1 = vmul.f32 %v1375_v45, %v2203_v14 }
 0xbc1   :  { %v1366_v2 = vadd.f32 %v1364_v38, %v1362_v6  ;;  %v1384_v49 = vsel %vm158_vm3, 0.0, %v1379_v21 }
 0xbc2   :  { %1392 = vrot.lane.b32.xlu0 %v1384_v49, %s1985_s30  ;;  %v1443_v47 = vmul.f32 %v1384_v49, %v2191_v63 }
 0xbc3   :  { %v1370_v51 = vadd.f32 %v1368_v36, %v1366_v2 }
 0xbc5   :  { %v1374_v19 = vadd.f32 %v1372_v31, %v1370_v51 }
 0xbc7   :  { %v1376_v59 = vmax.f32 %v1374_v19, 0.0  ;;  %1400 = vrot.lane.b32.xlu1 %v1384_v49, %s1984_s29 }
 0xbc9   :  { %v1380_v46 = vrot.slane %v1376_v59, 7  ;;  %v1386_v50 = vrot.slane %v1376_v59, 1 }
 0xbcb   :  { %v1381_v25 = vsel %vm158_vm3, %v1379_v21, %v1380_v46  ;;  %v1387_v0 = vsel %vm165_vm4, %v1385_v57, %v1386_v50  ;;  %v1390_v61 = vsel %vm165_vm4, %v1386_v50, 0.0 }
 0xbcc   :  { %1402 = vrot.lane.b32.xlu2 %v1381_v25, %s1984_s29  ;;  %1394 = vrot.lane.b32.xlu0 %v1381_v25, %s1985_s30  ;;  %v1444_v40 = vmul.f32 %v1381_v25, %v2191_v63  ;;  %v1456_v63 = vmul.f32 %v1376_v59, %v2203_v14 }
 0xbcf   :  { %1410 = vrot.lane.b32.xlu1 %v1376_v59, %s1985_s30 }
 0xbd4   :  { %1433 = vrot.lane.b32.xlu2 %v1387_v0, %s1984_s29  ;;  %1425 = vrot.lane.b32.xlu0 %v1387_v0, %s1985_s30 }
 0xbd7   :  { %1427 = vrot.lane.b32.xlu1 %v1390_v61, %s1985_s30 }
 0xbdc   :  { %1435 = vrot.lane.b32.xlu2 %v1390_v61, %s1984_s29  ;;  %1418 = vrot.lane.b32.xlu0 %v1376_v59, %s1984_s29 }
 0xc19   :  { %v1409_v43 = vpop.permute.xlu2 %1408 }
 0xc1a   :  { %v1414_v34 = vsel %vm179_vm5, 0.0, %v1409_v43 }
 0xc1b   :  { %v1451_v39 = vmul.f32 %v1414_v34, %v2196_v5 }
 0xc26   :  { %v1403_v41 = vpop.permute.xlu2 %1402 }
 0xc27   :  { %v1407_v29 = vsel %vm188_vm6, %v1403_v41, 0.0 }
 0xc28   :  { %v1448_v55 = vmul.f32 %v1407_v29, %v2198_v7 }
 0xc2e   :  { %v1434_v19 = vpop.permute.xlu2 %1433 }
 0xc2f   :  { %v1439_v43 = vsel %vm188_vm6, %v1434_v19, 0.0 }
 0xc31   :  { %v1417_v4 = vpop.permute.xlu1 %1416 }
 0xc32   :  { %v1422_v49 = vsel %vm188_vm6, %v1417_v4, 0.0  ;;  %v1467_v4 = vmul.f32 %v1387_v0, %v2220_v24 }
 0xc33   :  { %v1459_v46 = vmul.f32 %v1422_v49, %v2213_v32 }
 0xc34   :  { %v1393_v54 = vpop.permute.xlu0 %1392 }
 0xc35   :  { %v1398_v23 = vsel %vm179_vm5, 0.0, %v1393_v54 }
 0xc36   :  { %v1441_v26 = vmul.f32 %v1398_v23, %v2189_v58  ;;  %v1436_v59 = vpop.permute.xlu2 %1435 }
 0xc37   :  { %v1440_v0 = vsel %vm188_vm6, %v1436_v59, 0.0 }
 0xc38   :  { %v1445_v44 = vadd.f32 %v1443_v47, %v1441_v26 }
 0xc39   :  { %v1401_v9 = vpop.permute.xlu1 %1400 }
 0xc3a   :  { %v1406_v37 = vsel %vm188_vm6, %v1401_v9, 0.0 }
 0xc3b   :  { %v1447_v53 = vmul.f32 %v1406_v37, %v2198_v7 }
 0xc3d   :  { %v1449_v15 = vadd.f32 %v1447_v53, %v1445_v44 }
 0xc3e   :  { %v1395_v33 = vpop.permute.xlu0 %1394 }
 0xc3f   :  { %v1453_v3 = vadd.f32 %v1451_v39, %v1449_v15  ;;  %v1399_v8 = vsel %vm179_vm5, 0.0, %v1395_v33  ;;  %v1468_v39 = vmul.f32 %v1390_v61, %v2220_v24  ;;  %v1868_v61 = vld [vmem:[#allocation7 + $0x50] sm:$0xff] }
 0xc40   :  { %v1442_v38 = vmul.f32 %v1399_v8, %v2189_v58 }
 0xc41   :  { %v1411_v6 = vpop.permute.xlu1 %1410  ;;  %v1457_v21 = vadd.f32 %v1455_v1, %v1453_v3 }
 0xc42   :  { %v1446_v36 = vadd.f32 %v1444_v40, %v1442_v38  ;;  %v1415_v2 = vsel %vm179_vm5, 0.0, %v1411_v6  ;;  %v1867_v6 = vld [vmem:[#allocation5] sm:$0xff] }
 0xc43   :  { %v1452_v31 = vmul.f32 %v1415_v2, %v2196_v5  ;;  %v1461_v50 = vadd.f32 %v1459_v46, %v1457_v21  ;;  %v1864_v5 = vld [vmem:[#allocation7 + $0x18] ss:$0 sm:$0xff] }
 0xc44   :  { %v1450_v51 = vadd.f32 %v1448_v55, %v1446_v36  ;;  %v1471_v23 = vmul.f32 %v1864_v5, %v1439_v43  ;;  %v1472_v33 = vmul.f32 %v1864_v5, %v1440_v0  ;;  %v1869_v55 = vld [vmem:[#allocation7 + $0x58] sm:$0xff] }
 0xc46   :  { %v1454_v45 = vadd.f32 %v1452_v31, %v1450_v51  ;;  %v1426_v57 = vpop.permute.xlu0 %1425 }
 0xc47   :  { %v1431_v58 = vsel %vm179_vm5, 0.0, %v1426_v57 }
 0xc48   :  { %v1463_v7 = vmul.f32 %v1431_v58, %v2218_v42  ;;  %v1458_v25 = vadd.f32 %v1456_v63, %v1454_v45 }
 0xc49   :  { %v1428_v47 = vpop.permute.xlu1 %1427 }
 0xc4a   :  { %v1465_v54 = vadd.f32 %v1463_v7, %v1461_v50  ;;  %v1432_v37 = vsel %vm179_vm5, 0.0, %v1428_v47  ;;  %v1870_v47 = vld [vmem:[#allocation7 + $0x41] ss:$0 sm:$0xff] }
 0xc4b   :  { %v1464_v53 = vmul.f32 %v1432_v37, %v2218_v42  ;;  %v1866_v42 = vld [vmem:[#allocation7 + $0x70] sm:$0xff] }
 0xc4c   :  { %v1469_v26 = vadd.f32 %v1467_v4, %v1465_v54 }
 0xc4e   :  { %v1473_v9 = vadd.f32 %v1471_v23, %v1469_v26  ;;  %v1419_v34 = vpop.permute.xlu0 %1418 }
 0xc4f   :  { %v1423_v14 = vsel %vm188_vm6, %v1419_v34, 0.0 }
 0xc50   :  { %v1460_v44 = vmul.f32 %v1423_v14, %v2213_v32  ;;  %1835 = vmatmul.msk.f32.vlgmr.msra.gmra.mxu2 %vm360_vm7, %v1473_v9  ;;  %v1865_v32 = vld [vmem:[#allocation7 + $0x48] sm:$0xff] }
 0xc52   :  { %v1462_v41 = vadd.f32 %v1460_v44, %v1458_v25 }
 0xc54   :  { %v1466_v15 = vadd.f32 %v1464_v53, %v1462_v41 }
 0xc56   :  { %v1470_v29 = vadd.f32 %v1468_v39, %v1466_v15 }
 0xc58   :  { %v1474_v3 = vadd.f32 %v1472_v33, %v1470_v29 }
 0xc5a   :  { %1836 = vmatmul.msk.f32.gmra.mxu2 %vm360_vm7, %v1474_v3 }
 0xcd3   :  { %v1498_v8 = vpop.f32.mrf.mxu2 }
 0xcdd   :  { %v1501_v1 = vpop.f32.mrf.mxu2 }
 0xcde   :  { %1518 = vmatpush.msra.mxu0 %v1501_v1 }
 0xce0   :  { %1519 = vmatpush.msra.mxu0 %v1498_v8 }
 0xce1   :  { %1837 = vmatmul.msk.f32.vlgmr.msra.gmra.mxu0 %vm147_vm0, %v1865_v32 }
 0xd5e   :  { %v1521_v40 = vpop.f32.mrf.mxu0 }
 0xd5f   :  { %v1522_v38 = vadd.f32 %v1866_v42, %v1521_v40 }
 0xd61   :  { %v1524_v21 = vsub.f32 %v1522_v38, %v1867_v6 }
 0xd63   :  { %1838 = vmatmul.msk.f32.vlgmr.msra.gmra.mxu3 %vm147_vm0, %v1524_v21 }
 0xde6   :  { %v1545_v24 = vpop.f32.mrf.mxu3 }
 0xde7   :  { %1563 = vmatpush.msra.mxu1 %v1545_v24 }
 0xde8   :  { %1839 = vmatmul.msk.f32.vlgmr.msra.gmra.mxu1 %vm437_vm8, %v1868_v61 }
 0xdf0   :  { %1840 = vmatmul.msk.f32.gmra.mxu1 %vm437_vm8, %v1869_v55 }
 0xe65   :  { %v1565_v36 = vpop.f32.mrf.mxu1 }
 0xe66   :  { %1610 = vrot.lane.b32.xlu0 %v1565_v36, %s1984_s29  ;;  %1602 = vrot.lane.b32.xlu1 %v1565_v36, %s1985_s30  ;;  %v1573_v2 = vrot.slane %v1565_v36, 7  ;;  %v1579_v45 = vrot.slane %v1565_v36, 1 }
 0xe68   :  { %v1578_v49 = vsel %vm158_vm3, 0.0, %v1573_v2 }
 0xe69   :  { %1594 = vrot.lane.b32.xlu2 %v1578_v49, %s1984_s29  ;;  %v1639_v26 = vmul.f32 %v1578_v49, %v2306_v12 }
 0xe6d   :  { %v1568_v31 = vpop.f32.mrf.mxu1 }
 0xe6e   :  { %v1574_v51 = vrot.slane %v1568_v31, 7  ;;  %1586 = vrot.lane.b32.xlu0 %v1578_v49, %s1985_s30  ;;  %v1580_v46 = vrot.slane %v1568_v31, 1  ;;  %v1652_v55 = vmul.f32 %v1568_v31, %v2320_v30 }
 0xe70   :  { %v1575_v19 = vsel %vm158_vm3, %v1573_v2, %v1574_v51  ;;  %v1581_v57 = vsel %vm165_vm4, %v1579_v45, %v1580_v46  ;;  %v1584_v63 = vsel %vm165_vm4, %v1580_v46, 0.0 }
 0xe71   :  { %1604 = vrot.lane.b32.xlu2 %v1568_v31, %s1985_s30  ;;  %1588 = vrot.lane.b32.xlu1 %v1575_v19, %s1985_s30  ;;  %v1640_v41 = vmul.f32 %v1575_v19, %v2306_v12  ;;  %v1663_v51 = vmul.f32 %v1581_v57, %v2336_v18 }
 0xe76   :  { %1596 = vrot.lane.b32.xlu0 %v1575_v19, %s1984_s29 }
 0xe79   :  { %1619 = vrot.lane.b32.xlu2 %v1581_v57, %s1985_s30  ;;  %1612 = vrot.lane.b32.xlu1 %v1568_v31, %s1984_s29 }
 0xe7e   :  { %1621 = vrot.lane.b32.xlu0 %v1584_v63, %s1985_s30 }
 0xe81   :  { %1629 = vrot.lane.b32.xlu2 %v1584_v63, %s1984_s29  ;;  %1627 = vrot.lane.b32.xlu1 %v1581_v57, %s1984_s29 }
 0xec3   :  { %v1595_v58 = vpop.permute.xlu2 %1594 }
 0xec4   :  { %v1600_v5 = vsel %vm188_vm6, %v1595_v58, 0.0 }
 0xec5   :  { %v1643_v59 = vmul.f32 %v1600_v5, %v2316_v22 }
 0xecb   :  { %v1605_v25 = vpop.permute.xlu2 %1604 }
 0xecc   :  { %v1609_v29 = vsel %vm179_vm5, 0.0, %v1605_v25 }
 0xecd   :  { %v1648_v38 = vmul.f32 %v1609_v29, %v2314_v13 }
 0xed3   :  { %v1620_v44 = vpop.permute.xlu2 %1619 }
 0xed4   :  { %v1625_v42 = vsel %vm179_vm5, 0.0, %v1620_v44 }
 0xed5   :  { %v1659_v2 = vmul.f32 %v1625_v42, %v2333_v16 }
 0xed8   :  { %v1611_v50 = vpop.permute.xlu0 %1610  ;;  %v1603_v7 = vpop.permute.xlu1 %1602 }
 0xed9   :  { %v1608_v37 = vsel %vm179_vm5, 0.0, %v1603_v7  ;;  %v1616_v3 = vsel %vm188_vm6, %v1611_v50, 0.0 }
 0xeda   :  { %v1647_v39 = vmul.f32 %v1608_v37, %v2314_v13  ;;  %v1655_v6 = vmul.f32 %v1616_v3, %v2328_v48 }
 0xee0   :  { %v1587_v43 = vpop.permute.xlu0 %1586 }
 0xee1   :  { %v1592_v4 = vsel %vm179_vm5, 0.0, %v1587_v43  ;;  %v1664_v43 = vmul.f32 %v1584_v63, %v2336_v18 }
 0xee2   :  { %v1635_v54 = vmul.f32 %v1592_v4, %v2304_v11 }
 0xee3   :  { %v1589_v23 = vpop.permute.xlu1 %1588 }
 0xee4   :  { %v1637_v9 = vadd.f32 %v1870_v47, %v1635_v54  ;;  %v1593_v34 = vsel %vm179_vm5, 0.0, %v1589_v23  ;;  %v1871_v54 = vld [vmem:[#allocation7 + $0x28] ss:$0 sm:$0xff] }
 0xee5   :  { %v1636_v14 = vmul.f32 %v1593_v34, %v2304_v11  ;;  %v1651_v11 = vmul.f32 %v1565_v36, %v2320_v30 }
 0xee6   :  { %v1641_v53 = vadd.f32 %v1639_v26, %v1637_v9 }
 0xee7   :  { %v1638_v0 = vadd.f32 %v1870_v47, %v1636_v14 }
 0xee8   :  { %v1645_v15 = vadd.f32 %v1643_v59, %v1641_v53  ;;  %v1597_v33 = vpop.permute.xlu0 %1596 }
 0xee9   :  { %v1601_v8 = vsel %vm188_vm6, %v1597_v33, 0.0  ;;  %v1642_v1 = vadd.f32 %v1640_v41, %v1638_v0 }
 0xeea   :  { %v1649_v32 = vadd.f32 %v1647_v39, %v1645_v15  ;;  %v1644_v40 = vmul.f32 %v1601_v8, %v2316_v22  ;;  %v1630_v22 = vpop.permute.xlu2 %1629 }
 0xeeb   :  { %v1613_v12 = vpop.permute.xlu1 %1612  ;;  %v1634_v30 = vsel %vm188_vm6, %v1630_v22, 0.0 }
 0xeec   :  { %v1646_v21 = vadd.f32 %v1644_v40, %v1642_v1  ;;  %v1653_v24 = vadd.f32 %v1651_v11, %v1649_v32  ;;  %v1617_v61 = vsel %vm188_vm6, %v1613_v12, 0.0  ;;  %v1668_v23 = vmul.f32 %v1871_v54, %v1634_v30 }
 0xeed   :  { %v1656_v46 = vmul.f32 %v1617_v61, %v2328_v48 }
 0xeee   :  { %v1650_v49 = vadd.f32 %v1648_v38, %v1646_v21  ;;  %v1657_v36 = vadd.f32 %v1655_v6, %v1653_v24 }
 0xef0   :  { %v1654_v19 = vadd.f32 %v1652_v55, %v1650_v49  ;;  %v1622_v45 = vpop.permute.xlu0 %1621  ;;  %v1661_v13 = vadd.f32 %v1659_v2, %v1657_v36 }
 0xef1   :  { %v1626_v58 = vsel %vm179_vm5, 0.0, %v1622_v45 }
 0xef2   :  { %v1658_v50 = vadd.f32 %v1656_v46, %v1654_v19  ;;  %v1660_v7 = vmul.f32 %v1626_v58, %v2333_v16  ;;  %v1665_v25 = vadd.f32 %v1663_v51, %v1661_v13 }
 0xef3   :  { %v1628_v31 = vpop.permute.xlu1 %1627 }
 0xef4   :  { %v1662_v4 = vadd.f32 %v1660_v7, %v1658_v50  ;;  %v1633_v57 = vsel %vm188_vm6, %v1628_v31, 0.0 }
 0xef5   :  { %v1667_v5 = vmul.f32 %v1871_v54, %v1633_v57 }
 0xef6   :  { %v1666_v48 = vadd.f32 %v1664_v43, %v1662_v4 }
 0xef7   :  { %v1669_v26 = vadd.f32 %v1667_v5, %v1665_v25 }
 0xef8   :  { %v1670_v47 = vadd.f32 %v1668_v23, %v1666_v48 }
 0xef9   :  { %v1671_v9 = vmax.f32 %v1669_v26, 0.0 }
 0xefa   :  { %v1672_v34 = vmax.f32 %v1670_v47, 0.0 }
 0xefb   :  { %1712 = vrot.lane.b32.xlu0 %v1671_v9, %s1984_s29  ;;  %1704 = vrot.lane.b32.xlu1 %v1671_v9, %s1985_s30  ;;  %v1675_v16 = vrot.slane %v1671_v9, 7  ;;  %v1681_v37 = vrot.slane %v1671_v9, 1  ;;  %v1751_v55 = vmul.f32 %v1671_v9, %v2931_v56 }
 0xefc   :  { %v1676_v14 = vrot.slane %v1672_v34, 7  ;;  %v1682_v59 = vrot.slane %v1672_v34, 1  ;;  %v1752_v4 = vmul.f32 %v1672_v34, %v2931_v56 }
 0xefd   :  { %v1680_v18 = vsel %vm158_vm3, 0.0, %v1675_v16 }
 0xefe   :  { %1696 = vrot.lane.b32.xlu2 %v1680_v18, %s1984_s29  ;;  %v1677_v63 = vsel %vm158_vm3, %v1675_v16, %v1676_v14  ;;  %v1683_v44 = vsel %vm165_vm4, %v1681_v37, %v1682_v59  ;;  %v1686_v53 = vsel %vm165_vm4, %v1682_v59, 0.0  ;;  %v1739_v11 = vmul.f32 %v1680_v18, %v2380_v52  ;;  %v1872_v37 = vld [vmem:[#allocation7 + $0x38] ss:$0 sm:$0xff] }
 0xeff   :  { %v1740_v49 = vmul.f32 %v1677_v63, %v2380_v52  ;;  %v1763_v31 = vmul.f32 %v1683_v44, %v2408_v10  ;;  %v1764_v56 = vmul.f32 %v1686_v53, %v2408_v10 }
 0xf03   :  { %1688 = vrot.lane.b32.xlu0 %v1680_v18, %s1985_s30  ;;  %1690 = vrot.lane.b32.xlu1 %v1677_v63, %s1985_s30 }
 0xf06   :  { %1706 = vrot.lane.b32.xlu2 %v1672_v34, %s1985_s30 }
 0xf0b   :  { %1698 = vrot.lane.b32.xlu0 %v1677_v63, %s1984_s29  ;;  %1714 = vrot.lane.b32.xlu1 %v1672_v34, %s1984_s29 }
 0xf0e   :  { %1721 = vrot.lane.b32.xlu2 %v1683_v44, %s1985_s30 }
 0xf13   :  { %1723 = vrot.lane.b32.xlu0 %v1686_v53, %s1985_s30  ;;  %1729 = vrot.lane.b32.xlu1 %v1683_v44, %s1984_s29 }
 0xf16   :  { %1731 = vrot.lane.b32.xlu2 %v1686_v53, %s1984_s29 }
 0xf58   :  { %v1697_v41 = vpop.permute.xlu2 %1696 }
 0xf59   :  { %v1702_v3 = vsel %vm188_vm6, %v1697_v41, 0.0 }
 0xf5a   :  { %v1743_v42 = vmul.f32 %v1702_v3, %v2387_v17 }
 0xf60   :  { %v1707_v15 = vpop.permute.xlu2 %1706 }
 0xf61   :  { %v1711_v22 = vsel %vm179_vm5, 0.0, %v1707_v15 }
 0xf62   :  { %v1748_v50 = vmul.f32 %v1711_v22, %v2930_v28 }
 0xf68   :  { %v1722_v38 = vpop.permute.xlu2 %1721 }
 0xf69   :  { %v1727_v19 = vsel %vm179_vm5, 0.0, %v1722_v38 }
 0xf6a   :  { %v1759_v7 = vmul.f32 %v1727_v19, %v2406_v35 }
 0xf6d   :  { %v1713_v0 = vpop.permute.xlu0 %1712  ;;  %v1705_v39 = vpop.permute.xlu1 %1704 }
 0xf6e   :  { %v1710_v32 = vsel %vm179_vm5, 0.0, %v1705_v39  ;;  %v1718_v61 = vsel %vm188_vm6, %v1713_v0, 0.0 }
 0xf6f   :  { %v1747_v6 = vmul.f32 %v1710_v32, %v2930_v28  ;;  %v1755_v45 = vmul.f32 %v1718_v61, %v2401_v27  ;;  %v1873_v32 = vld [vmem:[#allocation7 + $0x42] ss:$0 sm:$0xff] }
 0xf70   :  { %v1732_v54 = vpop.permute.xlu2 %1731 }
 0xf71   :  { %v1736_v59 = vsel %vm188_vm6, %v1732_v54, 0.0 }
 0xf72   :  { %v1768_v63 = vmul.f32 %v1872_v37, %v1736_v59 }
 0xf75   :  { %v1689_v33 = vpop.permute.xlu0 %1688  ;;  %v1691_v29 = vpop.permute.xlu1 %1690 }
 0xf76   :  { %v1694_v8 = vsel %vm179_vm5, 0.0, %v1689_v33  ;;  %v1695_v40 = vsel %vm179_vm5, 0.0, %v1691_v29 }
 0xf77   :  { %v1737_v1 = vmul.f32 %v1694_v8, %v2378_v60  ;;  %v1738_v24 = vmul.f32 %v1695_v40, %v2378_v60 }
 0xf79   :  { %v1741_v12 = vadd.f32 %v1739_v11, %v1737_v1  ;;  %v1742_v58 = vadd.f32 %v1740_v49, %v1738_v24 }
 0xf7b   :  { %v1745_v21 = vadd.f32 %v1743_v42, %v1741_v12 }
 0xf7d   :  { %v1749_v2 = vadd.f32 %v1747_v6, %v1745_v21  ;;  %v1699_v36 = vpop.permute.xlu0 %1698  ;;  %v1715_v51 = vpop.permute.xlu1 %1714 }
 0xf7e   :  { %v1703_v46 = vsel %vm188_vm6, %v1699_v36, 0.0  ;;  %v1719_v30 = vsel %vm188_vm6, %v1715_v51, 0.0 }
 0xf7f   :  { %v1753_v13 = vadd.f32 %v1751_v55, %v1749_v2  ;;  %v1744_v60 = vmul.f32 %v1703_v46, %v2387_v17  ;;  %v1756_v23 = vmul.f32 %v1719_v30, %v2401_v27 }
 0xf81   :  { %v1746_v25 = vadd.f32 %v1744_v60, %v1742_v58  ;;  %v1757_v52 = vadd.f32 %v1755_v45, %v1753_v13 }
 0xf83   :  { %v1750_v43 = vadd.f32 %v1748_v50, %v1746_v25  ;;  %v1761_v57 = vadd.f32 %v1759_v7, %v1757_v52 }
 0xf85   :  { %v1754_v5 = vadd.f32 %v1752_v4, %v1750_v43  ;;  %v1724_v48 = vpop.permute.xlu0 %1723  ;;  %v1765_v17 = vadd.f32 %v1763_v31, %v1761_v57  ;;  %v1730_v26 = vpop.permute.xlu1 %1729 }
 0xf86   :  { %v1728_v28 = vsel %vm179_vm5, 0.0, %v1724_v48  ;;  %v1735_v47 = vsel %vm188_vm6, %v1730_v26, 0.0 }
 0xf87   :  { %v1758_v9 = vadd.f32 %v1756_v23, %v1754_v5  ;;  %v1760_v16 = vmul.f32 %v1728_v28, %v2406_v35  ;;  %v1767_v14 = vmul.f32 %v1872_v37, %v1735_v47 }
 0xf89   :  { %v1762_v34 = vadd.f32 %v1760_v16, %v1758_v9  ;;  %v1769_v18 = vadd.f32 %v1767_v14, %v1765_v17 }
 0xf8b   :  { %v1766_v27 = vadd.f32 %v1764_v56, %v1762_v34  ;;  %1781 = vrot.lane.b32.xlu2 %v1769_v18, %s1987_s5  ;;  %1773 = vrot.lane.b32.xlu0 %v1769_v18, %s1988_s6 }
 0xf8d   :  { %v1770_v44 = vadd.f32 %v1768_v63, %v1766_v27 }
 0xf8f   :  { %1775 = vrot.lane.b32.xlu1 %v1770_v44, %s1988_s6 }
 0xf93   :  { %1791 = vrot.lane.b32.xlu2 %v1770_v44, %s1986_s4  ;;  %1783 = vrot.lane.b32.xlu0 %v1770_v44, %s1987_s5 }
 0xf97   :  { %1789 = vrot.lane.b32.xlu1 %v1769_v18, %s1986_s4 }
 0xfe5   :  { %v1782_v35 = vpop.permute.xlu2 %1781 }
 0xfed   :  { %v1792_v33 = vpop.permute.xlu2 %1791 }
 0xffd   :  { %v1774_v41 = vpop.permute.xlu0 %1773 }
 0xffe   :  { %v1779_v53 = vadd.f32 %v1774_v41, %v1769_v18 }
0x1000   :  { %v1787_v3 = vadd.f32 %v1782_v35, %v1779_v53 }
0x1001   :  { %v1776_v10 = vpop.permute.xlu1 %1775 }
0x1002   :  { %v1780_v0 = vadd.f32 %v1776_v10, %v1770_v44 }
0x1005   :  { %v1784_v39 = vpop.permute.xlu0 %1783 }
0x1006   :  { %v1788_v15 = vadd.f32 %v1784_v39, %v1780_v0 }
0x1008   :  { %v1796_v29 = vadd.f32 %v1792_v33, %v1788_v15 }
0x1009   :  { %v1790_v8 = vpop.permute.xlu1 %1789 }
0x100a   :  { %v1798_v1 = vsub.f32 %v2690_v62, %v1796_v29  ;;  %v1795_v11 = vadd.f32 %v1790_v8, %v1787_v3 }
0x100c   :  { %v1800_v40 = vsub.f32 %v1798_v1, %v1873_v32  ;;  %v1797_v42 = vsub.f32 %v2680_v20, %v1795_v11 }
0x100e   :  { %1802 = vst.msk [vmem:[#allocation8 + $0x8] sm:$0xff] %vm147_vm0, %v1800_v40  ;;  %v1799_v12 = vsub.f32 %v1797_v42, %v1873_v32 }
0x1010   :  { %1801 = vst.msk [vmem:[#allocation8] sm:$0xff] %vm147_vm0, %v1799_v12 }
0x1011   :  { %1815 = dma.vmem_to_hbm [thread:$0]  %s1808_s8, 256, %s1810_s11, [#allocation4], %s1978_s22, %s1978_s22, %s1979_s23  }
0x1012   :  { %1974 = dma.done.wait [#allocation4], 256  }
0x1013   :  { %1975 = vsyncadd [#allocation4], 4294967040 }
0x1014   :  { %1820 = vsyncpa [#allocation3], 1 }
0x1015   :  { %1821 = vsyncpa [#allocation6], 1 }
0x1016   :  { %1822 = vsyncpa [#allocation4], 1 }

</bundles_post_ra>
